<compile_context>
chip_gen: v5e
topology: v5e:2x2
jax: 0.10.0
libtpu: 0.0.40
codegen_flags: <defaults>
</compile_context>

<pallas_src>
import functools

import jax
import jax.numpy as jnp
from jax.experimental import pallas as pl
from jax.experimental.pallas import tpu as pltpu


# ----------------------------------------------------------------------------
# Fused kernel: 3x3 conv (pad=1) + bias + LeakyReLU, `bn` images per grid step
# ----------------------------------------------------------------------------
def _conv3x3_bias_lrelu_kernel(x_ref, w_ref, b_ref, o_ref, xpad_ref, col_ref,
                               *, H, W, Cin, slope):
    """Per grid step:
       x_ref   : (bn, H, W, Cin)     f32   unpadded NHWC image block
       w_ref   : (9*Cin, Cout_pad)   bf16  packed taps, lane-padded to 128
       b_ref   : (1, Cout_pad)       f32   bias row
       o_ref   : (bn*H*W, Cout_pad)  bf16  flattened NHWC output block
       xpad_ref: (bn, H+2, W+2, Cin) bf16  VMEM scratch: halo'd image
       col_ref : (bn*H*W, 9*Cin)     bf16  VMEM scratch: im2col slab
    """
    bn = x_ref.shape[0]
    M = bn * H * W

    # 1) halo: zero the padded scratch every step (cheap; must not rely on
    #    program_id==0 because v7x splits the parallel axis across 2 cores),
    #    then drop the bf16-cast interior in.
    xpad_ref[...] = jnp.zeros_like(xpad_ref)
    xpad_ref[:, 1:H + 1, 1:W + 1, :] = x_ref[...].astype(jnp.bfloat16)

    # 2) in-VMEM im2col: 9 shifted windows side by side -> (M, 9*Cin) slab.
    for t in range(9):                      # static, unrolled
        ki, kj = divmod(t, 3)
        win = xpad_ref[:, ki:ki + H, kj:kj + W, :]          # (bn, H, W, Cin)
        col_ref[:, t * Cin:(t + 1) * Cin] = win.reshape(M, Cin)

    # 3) ONE MXU matmul: K = 9*Cin, lane-dense N = Cout_pad, f32 accumulation.
    acc = jnp.dot(col_ref[...], w_ref[...], preferred_element_type=jnp.float32)

    # 4) fused epilogue: bias + LeakyReLU + bf16 cast, one unmasked store.
    y = acc + b_ref[...]
    o_ref[...] = jnp.where(y >= 0.0, y, slope * y).astype(o_ref.dtype)


def _pick_batch_block(n, h, w, *, max_rows=4096):
    """Images per grid step: keep >=2 grid steps (both v7x TensorCores busy)
    while capping matmul rows per step (accumulator/slab pressure)."""
    bn = min(max(n // 2, 1), max(max_rows // (h * w), 1))
    while n % bn:
        bn -= 1
    return bn


def conv3x3_bias_lrelu(x_nchw, w_packed, b_row, *, cout=None, slope=0.01):
    """LeakyReLU(conv3x3(x, padding=1) + bias).  x_nchw: (N, Cin, H, W)."""
    N, Cin, H, W = x_nchw.shape
    Kdim, Cout_pad = w_packed.shape
    assert Kdim == 9 * Cin, (Kdim, Cin)
    cout = Cout_pad if cout is None else cout

    # Single boundary layout pass: NCHW -> NHWC.  No jnp.pad, no pre-cast —
    # halo and bf16 cast live inside the kernel, so the image is read from HBM
    # exactly once by the kernel's DMA.
    x = jnp.transpose(x_nchw, (0, 2, 3, 1))

    bn = _pick_batch_block(N, H, W)
    M = bn * H * W
    grid = (N // bn,)

    # Explicit VMEM budget: double-buffered blocks + single-buffered scratch.
    block_bytes = (2 * (bn * H * W * Cin * x.dtype.itemsize)         # input
                   + 2 * (Kdim * Cout_pad * 2) + 2 * (Cout_pad * 4)  # weights/bias
                   + 2 * (M * Cout_pad * 2)                          # output
                   + bn * (H + 2) * (W + 2) * Cin * 2                # halo scratch
                   + M * Kdim * 2)                                   # im2col slab
    vmem_limit = int(min(max(2 * block_bytes, 16 << 20), 64 << 20))

    flops = 2 * N * H * W * Kdim * Cout_pad
    bytes_accessed = (x.size * x.dtype.itemsize + w_packed.size * 2
                      + b_row.size * 4 + N * H * W * Cout_pad * 2)

    out = pl.pallas_call(
        functools.partial(_conv3x3_bias_lrelu_kernel,
                          H=H, W=W, Cin=Cin, slope=slope),
        out_shape=jax.ShapeDtypeStruct((N * H * W, Cout_pad), jnp.bfloat16),
        grid=grid,
        in_specs=[
            pl.BlockSpec((bn, H, W, Cin), lambda n: (n, 0, 0, 0)),
            pl.BlockSpec((Kdim, Cout_pad), lambda n: (0, 0)),
            pl.BlockSpec((1, Cout_pad), lambda n: (0, 0)),
        ],
        out_specs=pl.BlockSpec((M, Cout_pad), lambda n: (n, 0)),
        scratch_shapes=[
            pltpu.VMEM((bn, H + 2, W + 2, Cin), jnp.bfloat16),   # halo'd image
            pltpu.VMEM((M, Kdim), jnp.bfloat16),                 # im2col slab
        ],
        compiler_params=pltpu.CompilerParams(
            dimension_semantics=("parallel",),
            vmem_limit_bytes=vmem_limit),
        cost_estimate=pl.CostEstimate(flops=flops, transcendentals=0,
                                      bytes_accessed=bytes_accessed),
    )(x, w_packed, b_row)

    # Boundary: drop the lane padding, restore NCHW, return caller dtype.
    out = out.reshape(N, H, W, Cout_pad)[..., :cout]
    return jnp.transpose(out, (0, 3, 1, 2)).astype(x_nchw.dtype)


# ----------------------------------------------------------------------------
# Parameters: kaiming-normal (fan_in, relu) weight like weight_init(), bias.
# ----------------------------------------------------------------------------
def make_params(key, num_features, reduce_to):
    kw_, kb_ = jax.random.split(key)
    fan_in = num_features * 9
    w = jax.random.normal(kw_, (reduce_to, num_features, 3, 3),
                          jnp.float32) * jnp.sqrt(2.0 / fan_in)
    b = 0.1 * jax.random.normal(kb_, (reduce_to,), jnp.float32)
    return {"w": w, "b": b}


def pack_params(p, *, lane=128):
    """One-time packing (outside jit): OIHW f32 -> (9*Cin, Cout_pad) bf16
    im2col weight matrix and a (1, Cout_pad) f32 bias row, with Cout
    zero-padded to a multiple of 128 so every kernel store is lane-dense."""
    w = p["w"]
    Cout, Cin, kh, kw_ = w.shape
    cout_pad = -(-Cout // lane) * lane
    w_mat = jnp.transpose(w, (2, 3, 1, 0)).reshape(kh * kw_ * Cin, Cout)
    w_packed = jnp.pad(w_mat, ((0, 0), (0, cout_pad - Cout))).astype(jnp.bfloat16)
    b_row = jnp.pad(p["b"], (0, cout_pad - Cout)).reshape(1, cout_pad)
    return {"w_packed": w_packed, "b_row": b_row.astype(jnp.float32)}


def channel_adapter_forward(packed, x, *, cout):
    # TODO(synk): `channel_attention` is referenced in the reference module but
    # undefined in the source and never used in forward()'s data path; omitted.
    return conv3x3_bias_lrelu(x, packed["w_packed"], packed["b_row"], cout=cout)


# ----------------------------------------------------------------------------
# Demo / self-check
# ----------------------------------------------------------------------------
if __name__ == "__main__":
    num_features, reduce_to = 32, 64          # num_features > 20 (reduce branch)
    N, H, W = 2, 16, 16

    key = jax.random.PRNGKey(0)
    kp, kx = jax.random.split(key)
    params = make_params(kp, num_features, reduce_to)
    packed = pack_params(params)
    x = jax.random.normal(kx, (N, num_features, H, W), jnp.float32)

    fwd = jax.jit(functools.partial(channel_adapter_forward, cout=reduce_to))
    out = fwd(packed, x)
    jax.block_until_ready(out)

    assert out.shape == (N, reduce_to, H, W), out.shape
    assert bool(jnp.all(jnp.isfinite(out)))

    # Pure-JAX reference (same bf16 MXU operands, f32 accumulation; the kernel
    # additionally stores a bf16 result, hence the slightly looser tolerance).
    ref = jax.lax.conv_general_dilated(
        x.astype(jnp.bfloat16), params["w"].astype(jnp.bfloat16),
        window_strides=(1, 1), padding=((1, 1), (1, 1)),
        dimension_numbers=("NCHW", "OIHW", "NCHW"),
        preferred_element_type=jnp.float32)
    ref = ref + params["b"][None, :, None, None]
    ref = jnp.where(ref >= 0.0, ref, 0.01 * ref)
    err = float(jnp.max(jnp.abs(out.astype(jnp.float32) - ref)))
    assert err < 5e-2, f"max abs error vs reference: {err}"

    print("KERNEL_OK")
</pallas_src>

<mosaic_0001>
module attributes {stable_mosaic.version = 11 : i64} {
  func.func @_conv3x3_bias_lrelu_kernel(%arg0: i32, %arg1: memref<1x16x16x32xf32, #tpu.memory_space<vmem>>, %arg2: memref<288x128xbf16, #tpu.memory_space<vmem>>, %arg3: memref<1x128xf32, #tpu.memory_space<vmem>>, %arg4: memref<256x128xbf16, #tpu.memory_space<vmem>>, %arg5: memref<1x18x18x32xbf16, #tpu.memory_space<vmem>>, %arg6: memref<256x288xbf16, #tpu.memory_space<vmem>>) attributes {dimension_semantics = [#tpu.dimension_semantics<parallel>], iteration_bounds = array<i64: 2>, scalar_prefetch = 0 : i64, scratch_operands = 2 : i64, tpu.core_type = #tpu.core_type<tc>, window_params = [{transform_indices = @transform_0, window_bounds = array<i64: 1, 16, 16, 32>}, {pipeline_mode = #tpu.pipeline_mode<synchronous>, transform_indices = @transform_1, window_bounds = array<i64: 288, 128>}, {pipeline_mode = #tpu.pipeline_mode<synchronous>, transform_indices = @transform_2, window_bounds = array<i64: 1, 128>}, {transform_indices = @transform_3, window_bounds = array<i64: 256, 128>}]} {
    %cst = arith.constant 0.000000e+00 : bf16
    %0 = vector.broadcast %cst : bf16 to vector<1x18x18x32xbf16>
    %c0 = arith.constant 0 : index
    %c0_0 = arith.constant 0 : index
    %c0_1 = arith.constant 0 : index
    %c0_2 = arith.constant 0 : index
    %1 = vector.load %arg5[%c0, %c0_0, %c0_1, %c0_2] : memref<1x18x18x32xbf16, #tpu.memory_space<vmem>>, vector<1x18x18x32xbf16>
    tpu.vector_store %arg5[%c0, %c0_0, %c0_1, %c0_2], %0 {strides = array<i32>} : memref<1x18x18x32xbf16, #tpu.memory_space<vmem>>, vector<1x18x18x32xbf16>,
    %c0_3 = arith.constant 0 : index
    %c0_4 = arith.constant 0 : index
    %c0_5 = arith.constant 0 : index
    %c0_6 = arith.constant 0 : index
    %2 = vector.load %arg1[%c0_3, %c0_4, %c0_5, %c0_6] : memref<1x16x16x32xf32, #tpu.memory_space<vmem>>, vector<1x16x16x32xf32>
    %3 = arith.truncf %2 : vector<1x16x16x32xf32> to vector<1x16x16x32xbf16>
    %c0_7 = arith.constant 0 : index
    %c1 = arith.constant 1 : index
    %c1_8 = arith.constant 1 : index
    %c0_9 = arith.constant 0 : index
    %4 = vector.load %arg5[%c0_7, %c1, %c1_8, %c0_9] : memref<1x18x18x32xbf16, #tpu.memory_space<vmem>>, vector<1x16x16x32xbf16>
    tpu.vector_store %arg5[%c0_7, %c1, %c1_8, %c0_9], %3 {strides = array<i32>} : memref<1x18x18x32xbf16, #tpu.memory_space<vmem>>, vector<1x16x16x32xbf16>,
    %c0_10 = arith.constant 0 : index
    %c0_11 = arith.constant 0 : index
    %c0_12 = arith.constant 0 : index
    %c0_13 = arith.constant 0 : index
    %5 = vector.load %arg5[%c0_10, %c0_11, %c0_12, %c0_13] : memref<1x18x18x32xbf16, #tpu.memory_space<vmem>>, vector<1x16x16x32xbf16>
    %6 = vector.shape_cast %5 : vector<1x16x16x32xbf16> to vector<256x32xbf16>
    %c0_14 = arith.constant 0 : index
    %c0_15 = arith.constant 0 : index
    %7 = vector.load %arg6[%c0_14, %c0_15] : memref<256x288xbf16, #tpu.memory_space<vmem>>, vector<256x32xbf16>
    tpu.vector_store %arg6[%c0_14, %c0_15], %6 {strides = array<i32>} : memref<256x288xbf16, #tpu.memory_space<vmem>>, vector<256x32xbf16>,
    %c0_16 = arith.constant 0 : index
    %c0_17 = arith.constant 0 : index
    %c1_18 = arith.constant 1 : index
    %c0_19 = arith.constant 0 : index
    %8 = vector.load %arg5[%c0_16, %c0_17, %c1_18, %c0_19] : memref<1x18x18x32xbf16, #tpu.memory_space<vmem>>, vector<1x16x16x32xbf16>
    %9 = vector.shape_cast %8 : vector<1x16x16x32xbf16> to vector<256x32xbf16>
    %c0_20 = arith.constant 0 : index
    %c32 = arith.constant 32 : index
    %10 = vector.load %arg6[%c0_20, %c32] : memref<256x288xbf16, #tpu.memory_space<vmem>>, vector<256x32xbf16>
    tpu.vector_store %arg6[%c0_20, %c32], %9 {strides = array<i32>} : memref<256x288xbf16, #tpu.memory_space<vmem>>, vector<256x32xbf16>,
    %c0_21 = arith.constant 0 : index
    %c0_22 = arith.constant 0 : index
    %c2 = arith.constant 2 : index
    %c0_23 = arith.constant 0 : index
    %11 = vector.load %arg5[%c0_21, %c0_22, %c2, %c0_23] : memref<1x18x18x32xbf16, #tpu.memory_space<vmem>>, vector<1x16x16x32xbf16>
    %12 = vector.shape_cast %11 : vector<1x16x16x32xbf16> to vector<256x32xbf16>
    %c0_24 = arith.constant 0 : index
    %c64 = arith.constant 64 : index
    %13 = vector.load %arg6[%c0_24, %c64] : memref<256x288xbf16, #tpu.memory_space<vmem>>, vector<256x32xbf16>
    tpu.vector_store %arg6[%c0_24, %c64], %12 {strides = array<i32>} : memref<256x288xbf16, #tpu.memory_space<vmem>>, vector<256x32xbf16>,
    %c0_25 = arith.constant 0 : index
    %c1_26 = arith.constant 1 : index
    %c0_27 = arith.constant 0 : index
    %c0_28 = arith.constant 0 : index
    %14 = vector.load %arg5[%c0_25, %c1_26, %c0_27, %c0_28] : memref<1x18x18x32xbf16, #tpu.memory_space<vmem>>, vector<1x16x16x32xbf16>
    %15 = vector.shape_cast %14 : vector<1x16x16x32xbf16> to vector<256x32xbf16>
    %c0_29 = arith.constant 0 : index
    %c96 = arith.constant 96 : index
    %16 = vector.load %arg6[%c0_29, %c96] : memref<256x288xbf16, #tpu.memory_space<vmem>>, vector<256x32xbf16>
    tpu.vector_store %arg6[%c0_29, %c96], %15 {strides = array<i32>} : memref<256x288xbf16, #tpu.memory_space<vmem>>, vector<256x32xbf16>,
    %c0_30 = arith.constant 0 : index
    %c1_31 = arith.constant 1 : index
    %c1_32 = arith.constant 1 : index
    %c0_33 = arith.constant 0 : index
    %17 = vector.load %arg5[%c0_30, %c1_31, %c1_32, %c0_33] : memref<1x18x18x32xbf16, #tpu.memory_space<vmem>>, vector<1x16x16x32xbf16>
    %18 = vector.shape_cast %17 : vector<1x16x16x32xbf16> to vector<256x32xbf16>
    %c0_34 = arith.constant 0 : index
    %c128 = arith.constant 128 : index
    %19 = vector.load %arg6[%c0_34, %c128] : memref<256x288xbf16, #tpu.memory_space<vmem>>, vector<256x32xbf16>
    tpu.vector_store %arg6[%c0_34, %c128], %18 {strides = array<i32>} : memref<256x288xbf16, #tpu.memory_space<vmem>>, vector<256x32xbf16>,
    %c0_35 = arith.constant 0 : index
    %c1_36 = arith.constant 1 : index
    %c2_37 = arith.constant 2 : index
    %c0_38 = arith.constant 0 : index
    %20 = vector.load %arg5[%c0_35, %c1_36, %c2_37, %c0_38] : memref<1x18x18x32xbf16, #tpu.memory_space<vmem>>, vector<1x16x16x32xbf16>
    %21 = vector.shape_cast %20 : vector<1x16x16x32xbf16> to vector<256x32xbf16>
    %c0_39 = arith.constant 0 : index
    %c160 = arith.constant 160 : index
    %22 = vector.load %arg6[%c0_39, %c160] : memref<256x288xbf16, #tpu.memory_space<vmem>>, vector<256x32xbf16>
    tpu.vector_store %arg6[%c0_39, %c160], %21 {strides = array<i32>} : memref<256x288xbf16, #tpu.memory_space<vmem>>, vector<256x32xbf16>,
    %c0_40 = arith.constant 0 : index
    %c2_41 = arith.constant 2 : index
    %c0_42 = arith.constant 0 : index
    %c0_43 = arith.constant 0 : index
    %23 = vector.load %arg5[%c0_40, %c2_41, %c0_42, %c0_43] : memref<1x18x18x32xbf16, #tpu.memory_space<vmem>>, vector<1x16x16x32xbf16>
    %24 = vector.shape_cast %23 : vector<1x16x16x32xbf16> to vector<256x32xbf16>
    %c0_44 = arith.constant 0 : index
    %c192 = arith.constant 192 : index
    %25 = vector.load %arg6[%c0_44, %c192] : memref<256x288xbf16, #tpu.memory_space<vmem>>, vector<256x32xbf16>
    tpu.vector_store %arg6[%c0_44, %c192], %24 {strides = array<i32>} : memref<256x288xbf16, #tpu.memory_space<vmem>>, vector<256x32xbf16>,
    %c0_45 = arith.constant 0 : index
    %c2_46 = arith.constant 2 : index
    %c1_47 = arith.constant 1 : index
    %c0_48 = arith.constant 0 : index
    %26 = vector.load %arg5[%c0_45, %c2_46, %c1_47, %c0_48] : memref<1x18x18x32xbf16, #tpu.memory_space<vmem>>, vector<1x16x16x32xbf16>
    %27 = vector.shape_cast %26 : vector<1x16x16x32xbf16> to vector<256x32xbf16>
    %c0_49 = arith.constant 0 : index
    %c224 = arith.constant 224 : index
    %28 = vector.load %arg6[%c0_49, %c224] : memref<256x288xbf16, #tpu.memory_space<vmem>>, vector<256x32xbf16>
    tpu.vector_store %arg6[%c0_49, %c224], %27 {strides = array<i32>} : memref<256x288xbf16, #tpu.memory_space<vmem>>, vector<256x32xbf16>,
    %c0_50 = arith.constant 0 : index
    %c2_51 = arith.constant 2 : index
    %c2_52 = arith.constant 2 : index
    %c0_53 = arith.constant 0 : index
    %29 = vector.load %arg5[%c0_50, %c2_51, %c2_52, %c0_53] : memref<1x18x18x32xbf16, #tpu.memory_space<vmem>>, vector<1x16x16x32xbf16>
    %30 = vector.shape_cast %29 : vector<1x16x16x32xbf16> to vector<256x32xbf16>
    %c0_54 = arith.constant 0 : index
    %c256 = arith.constant 256 : index
    %31 = vector.load %arg6[%c0_54, %c256] : memref<256x288xbf16, #tpu.memory_space<vmem>>, vector<256x32xbf16>
    tpu.vector_store %arg6[%c0_54, %c256], %30 {strides = array<i32>} : memref<256x288xbf16, #tpu.memory_space<vmem>>, vector<256x32xbf16>,
    %c0_55 = arith.constant 0 : index
    %c0_56 = arith.constant 0 : index
    %32 = vector.load %arg6[%c0_55, %c0_56] : memref<256x288xbf16, #tpu.memory_space<vmem>>, vector<256x288xbf16>
    %c0_57 = arith.constant 0 : index
    %c0_58 = arith.constant 0 : index
    %33 = vector.load %arg2[%c0_57, %c0_58] : memref<288x128xbf16, #tpu.memory_space<vmem>>, vector<288x128xbf16>
    %cst_59 = arith.constant dense<0.000000e+00> : vector<256x128xf32>
    %34 = tpu.matmul %32, %33, %cst_59 {dimension_numbers = #tpu.dot_dimension_numbers<[1], [0], [0], [1], [0, 0, 1, 1], [], []>} : vector<256x288xbf16>, vector<288x128xbf16>, vector<256x128xf32> -> vector<256x128xf32>
    %c0_60 = arith.constant 0 : index
    %c0_61 = arith.constant 0 : index
    %35 = vector.load %arg3[%c0_60, %c0_61] : memref<1x128xf32, #tpu.memory_space<vmem>>, vector<1x128xf32>
    %36 = vector.broadcast %35 : vector<1x128xf32> to vector<256x128xf32>
    %37 = arith.addf %34, %36 : vector<256x128xf32>
    %cst_62 = arith.constant 0.000000e+00 : f32
    %38 = vector.broadcast %cst_62 : f32 to vector<256x128xf32>
    %39 = arith.cmpf oge, %37, %38 : vector<256x128xf32>
    %cst_63 = arith.constant 0.00999999977 : f32
    %40 = vector.broadcast %cst_63 : f32 to vector<256x128xf32>
    %41 = arith.mulf %40, %37 : vector<256x128xf32>
    %42 = arith.select %39, %37, %41 : vector<256x128xi1>, vector<256x128xf32>
    %43 = arith.truncf %42 : vector<256x128xf32> to vector<256x128xbf16>
    %c0_64 = arith.constant 0 : index
    %c0_65 = arith.constant 0 : index
    %44 = vector.load %arg4[%c0_64, %c0_65] : memref<256x128xbf16, #tpu.memory_space<vmem>>, vector<256x128xbf16>
    tpu.vector_store %arg4[%c0_64, %c0_65], %43 {strides = array<i32>} : memref<256x128xbf16, #tpu.memory_space<vmem>>, vector<256x128xbf16>,
    return
  }
  func.func @transform_0(%arg0: i32) -> (i32, i32, i32, i32) {
    %c0_i32 = arith.constant 0 : i32
    %c0_i32_0 = arith.constant 0 : i32
    %c0_i32_1 = arith.constant 0 : i32
    %c0_i32_2 = arith.constant 0 : i32
    return %arg0, %c0_i32, %c0_i32_0, %c0_i32_1 : i32, i32, i32, i32
  }
  func.func @transform_1(%arg0: i32) -> (i32, i32) {
    %c0_i32 = arith.constant 0 : i32
    %c0_i32_0 = arith.constant 0 : i32
    %c0_i32_1 = arith.constant 0 : i32
    return %c0_i32, %c0_i32_0 : i32, i32
  }
  func.func @transform_2(%arg0: i32) -> (i32, i32) {
    %c0_i32 = arith.constant 0 : i32
    %c0_i32_0 = arith.constant 0 : i32
    %c0_i32_1 = arith.constant 0 : i32
    return %c0_i32, %c0_i32_0 : i32, i32
  }
  func.func @transform_3(%arg0: i32) -> (i32, i32) {
    %c0_i32 = arith.constant 0 : i32
    %c0_i32_0 = arith.constant 0 : i32
    return %arg0, %c0_i32 : i32, i32
  }
}

</mosaic_0001>

<bundles_post_ra>
// kernel: channel_adapter_forward.1
= control target key start
LH: loop header
LB: loop body
LE: loop exit
PB: predicated region body
PF: predicated region fallthrough
CT: control target
= control target key end

     0   :  { %8 = vsyncpa [#allocation5], 0  ;;  %s7483_s0 = inlined_call_operand.hbm [shape: f32[2,16,16,32], index: 0, kind: input, shape index: {}]   ;;  %s7484_s1 = inlined_call_operand.hbm [shape: bf16[288,128], index: 1, kind: input, shape index: {}]   ;;  %s7485_s2 = inlined_call_operand.hbm [shape: f32[1,128], index: 2, kind: input, shape index: {}]   ;;  %s7486_s3 = inlined_call_operand.vmem [shape: bf16[512,128], index: 3, kind: output, shape index: {}]  }
   0x1   :  { %10 = vsyncpa [#allocation5 + $0x1], 0 }
   0x2   :  { %11 = vsyncpa [#allocation7], 0  ;;  %s5576_s12 = smov 0   ;;  %s5578_s13 = smov 0  }
   0x3   :  { %s5580_s14 = smov 0   ;;  %s5582_s15 = smov 0  }
   0x4 LB: > { %s4819_s16 = sadd.s32 4294967295, %s5544_s15   ;;  %p37_p0 = scmp.ne.s32.totalorder %s5536_s13, %s5532_s12  ;;  %s5544_s15 = sphi %s5582_s15, %s7504_s15   ;;  %s5540_s14 = sphi %s5580_s14, %s7503_s14   ;;  %s5536_s13 = sphi %s5578_s13, %s7502_s13   ;;  %s5532_s12 = sphi %s5576_s12, %s7501_s12  }
   0x5   : > { %p5598_p1 = scmp.eq.s32.totalorder %s4819_s16, 0  ;;  %p4821_p2 = scmp.ge.s32.totalorder %s5544_s15, 1 }
   0x6   : > { %p116_p3 = scmp.lt.s32.totalorder %s5544_s15, 3  ;;  %s127_s21 = sshll.u32 %s7484_s1, 4  ;;  %s128_s21 = int_to_ptr.hbm [resolvable:$true] %s127_s21 }
   0x7   : > { %p5606_p4 = por %p5598_p1, %p37_p0  ;;  %s5546_s23 = smov [#allocation6]  }
   0x8   : > { %p5613_p5 = pnand %p4821_p2, %p116_p3  ;;  %s129_s24 = sshll.u32 %s5546_s23, 4  ;;  %s130_s24 = int_to_ptr.vmem [resolvable:$true] %s129_s24 }
   0x9   : > { %s142_s27 = sshll.u32 %s7485_s2, 4  ;;  %s5547_s28 = smov 64   ;;  %s143_s27 = int_to_ptr.hbm [resolvable:$true] %s142_s27 }
   0xa   : > { %p5354_p6 = pneg %p5613_p5  ;;  %s5548_s29 = smov 4  }
   0xb   : > { %s5549_s30 = smov [#allocation8]   ;;  %s5625_s5 = sadd.s32 1, %s5544_s15  }
   0xc   : > { %p5355_p7 = pnand %p5354_p6, %p5598_p1  ;;  %s144_s4 = sshll.u32 %s5549_s30, 4  ;;  %s145_s4 = int_to_ptr.vmem [resolvable:$true] %s144_s4 }
   0xd   : > { %s24_s6 = sadd.s32 1, %s5540_s14  ;;  %s21_s7 = ssub.s32 %s5544_s15, %s5625_s5 }
   0xe   : > { %5357 = dma.hbm_to_vmem [thread:$0]  (!%p5355_p7), %s128_s21, 2304, %s130_s24, [#allocation7], %s5547_s28, %s5547_s28, %s5548_s29  }
   0xf   : > { %5360 = dma.hbm_to_vmem [thread:$0]  (!%p5355_p7), %s143_s27, 16, %s145_s4, [#allocation7]  }
  0x10   : > { %p31_p8 = scmp.ne.s32.totalorder %s5540_s14, %s5536_s13  ;;  %p22_p9 = scmp.eq.s32.totalorder %s21_s7, 0 }
  0x11   : > { %p32_p10 = scmp.eq.s32.totalorder %s5544_s15, 0  ;;  %p5367_p11 = scmp.lt.s32.totalorder %s5544_s15, 2 }
  0x12   : > { %s155_s8 = sand.u32 1, %s5540_s14   ;;  %s5164_s11 = sshll.u32 %s5544_s15, 8 }
  0x13   : > { %s5636_s9 = scalar_select %p22_p9, %s5540_s14, %s24_s6  }
  0x14   : > { %p33_p12 = por %p32_p10, %p31_p8  ;;  %s4825_s10 = sshll.u32 %s155_s8, 8 }
  0x15   : > { %s164_s20 = scalar_lea.hbm %s7483_s0, %s5164_s11  ;;  %s159_s23 = scalar_lea.vmem [#allocation4], %s4825_s10 }
  0x16   : > { %s165_s21 = sshll.u32 %s164_s20, 4  ;;  %s167_s24 = sshll.u32 %s159_s23, 4  ;;  %s166_s21 = int_to_ptr.hbm [resolvable:$true] %s165_s21  ;;  %s168_s24 = int_to_ptr.vmem [resolvable:$true] %s167_s24 }
  0x17   : > { %p5642_p13 = pnand %p5367_p11, %p33_p12  ;;  %s156_s26 = scalar_lea.sflag [#allocation5], %s155_s8 }
  0x18   : > { %s5476_s27 = sshra.s32 %s166_s21, 4  ;;  %s5483_s4 = scalar_lea.hbm %s7483_s0, 512  ;;  %s5477_s27 = int_to_ptr.hbm [resolvable:$true] %s5476_s27 }
  0x19   : > { %s5478_s28 = scalar_lea.hbm %s5477_s27, 256  ;;  %p5480_p2 = pneg %p5642_p13 }
  0x1a   : > { %p5479_p0 = scmp.ne.s32.totalorder %s5477_s27, %s5478_s28  ;;  %p5484_p7 = scmp.lt.s32.totalorder %s5477_s27, %s7483_s0 }
  0x1b   : > { %p5485_p8 = scmp.lt.s32.totalorder %s5483_s4, %s5478_s28 }
  0x1c   : > { %p5481_p3 = pnand %p5480_p2, %p5479_p0 }
  0x1d   : > { %p5486_p9 = por %p5485_p8, %p5484_p7 }
  0x1e   : > { %p5482_p6 = pneg %p5481_p3 }
  0x20   : > { %p5487_p10 = pnand %p5486_p9, %p5482_p6 }
  0x22   : > { %5490 = shalt.err (!%p5487_p10)
}
  0x23   : > { %s5550_s8 = smov 128   ;;  %s5551_s10 = smov 8  }
  0x24   : > { %5364 = dma.hbm_to_vmem [thread:$0]  (!%p5642_p13), %s166_s21, 4096, %s168_s24, %s156_s26, %s5550_s8, %s5550_s8, %s5551_s10  }
  0x25   : > { %179 = sbr.rel (%p5613_p5) target bundleno = 906 (0x38a), region = 32  ;;  %s181_s11 = sand.u32 (!%p5613_p5), 1, %s5536_s13  }
  0x26   : > { %s4829_s12 = sshll.u32 (!%p5613_p5), %s181_s11, 8  ;;  %s182_s19 = scalar_lea.sflag (!%p5613_p5), [#allocation5], %s181_s11 }
  0x27   : > { %s5659_s20 = scalar_lea.vmem (!%p5613_p5), [#allocation4], %s4829_s12 }
  0x2a   : > { %5523 = dma.done.wait (%p5606_p4), %s182_s19, 4096  }
  0x2b   : > { %5525 = vsyncadd (%p5606_p4), %s182_s19, 4294963200 }
  0x2c   : > { %5527 = dma.done.wait (%p5598_p1), [#allocation7], 2320  }
  0x2d   : > { %5529 = vsyncadd (%p5598_p1), [#allocation7], 4294964976  ;;  %vm226_vm0 = vcmask 257024   ;;  %v5552_v0 = vmov 0   ;;  %vm899_vm1 = vsmask.f32 3328 }
  0x2e   : > { %227 = vst.msk [vmem:[#allocation2] sm:$0xf] %vm226_vm0, %v5552_v0  ;;  %vm900_vm2 = vsmask.f32 7440  ;;  %s5553_s17 = smov 32   ;;  %v284_v13 = vld [vmem:[%s5659_s20 + $0x10] sm:$0xff] }
  0x2f   : > { %228 = vst.msk [vmem:[#allocation2 + $0x4] sm:$0xf] %vm226_vm0, %v5552_v0  ;;  %vm5697_vm3 = vmor %vm899_vm1, %vm900_vm2  ;;  %v285_v14 = vld [vmem:[%s5659_s20 + $0x18] sm:$0xff]  ;;  %v316_v15 = vpack.c.bf16 %v284_v13, %v284_v13  ;;  %v282_v16 = vld [vmem:[%s5659_s20] sm:$0xff]  ;;  %vm229_vm4 = vcmask 253952   ;;  %vm1511_vm11 = vcmask 1042432  }
  0x30   : > { %231 = vst.msk [vmem:[#allocation2 + $0xc] sm:$0xf] %vm226_vm0, %v5552_v0  ;;  %v286_v17 = vld [vmem:[%s5659_s20 + $0x20] sm:$0xff]  ;;  %v317_v19 = vpack.c.bf16 %v285_v14, %v285_v14  ;;  %v314_v20 = vpack.c.bf16 %v282_v16, %v282_v16  ;;  %v283_v23 = vld [vmem:[%s5659_s20 + $0x8] sm:$0xff]  ;;  %v288_v28 = vld [vmem:[%s5659_s20 + $0x30] sm:$0xff]  ;;  %vm1512_vm12 = vcmask 1046532  }
  0x31   : > { %232 = vst.msk [vmem:[#allocation2 + $0x10] sm:$0xf] %vm226_vm0, %v5552_v0  ;;  %v367_v21 = vshrl.u32 %v316_v15, 16  ;;  %v318_v22 = vpack.c.bf16 %v286_v17, %v286_v17  ;;  %v287_v25 = vld [vmem:[%s5659_s20 + $0x28] sm:$0xff]  ;;  %v289_v29 = vld [vmem:[%s5659_s20 + $0x38] sm:$0xff]  ;;  %v370_v31 = vshll.u32 %v316_v15, 16  ;;  %v5751_v32 = vpack.c.bf16 %v283_v23, %v283_v23  ;;  %vm6329_vm13 = vmor %vm1511_vm11, %vm1512_vm12 }
  0x32   : > { %234 = vst.msk [vmem:[#allocation2 + $0x18] sm:$0xf] %vm226_vm0, %v5552_v0  ;;  %v375_v26 = vshrl.u32 %v317_v19, 16  ;;  %v350_v27 = vshrl.u32 %v314_v20, 16  ;;  %vm346_vm5 = vsmask.f32 256  ;;  %v5755_v34 = vpack.c.bf16 %v287_v25, %v287_v25 }
  0x33   : > { %235 = vst.msk [vmem:[#allocation2 + $0x1c] sm:$0xf] %vm226_vm0, %v5552_v0  ;;  %v369_v30 = vrot.slane %v367_v21, 7  ;;  %v384_v33 = vshrl.u32 %v318_v22, 16  ;;  %vm671_vm6 = vsmask.f32 7938  ;;  %v5759_v36 = vpack.c.bf16 %v288_v28, %v288_v28  ;;  %vm5938_vm10 = vmand %vm229_vm4, %vm346_vm5 }
  0x34   : > { %237 = vst.msk [vmem:[#allocation2 + $0x24] sm:$0xf] %vm226_vm0, %v5552_v0  ;;  %vm347_vm7 = vsmask.f32 4368  ;;  %v378_v35 = vshll.u32 %v317_v19, 16  ;;  %v5761_v37 = vpack.c.bf16 %v289_v29, %v289_v29  ;;  %v292_v38 = vld [vmem:[%s5659_s20 + $0x50] sm:$0xff]  ;;  %vm5782_vm8 = vmand %vm226_vm0, %vm671_vm6 }
  0x35   : > { %v851_v1 = vld [vmem:[#allocation2] sm:$0xf]  ;;  %238 = vst.msk [vmem:[#allocation2 + $0x28] sm:$0xf] %vm226_vm0, %v5552_v0  ;;  %v5767_v40 = vrot.slane %v375_v26, 7  ;;  %v5769_v41 = vrot.slane %v350_v27, 7  ;;  %v5773_v43 = vor.u32 %v370_v31, %v369_v30  ;;  %v5789_v50 = vpack.c.bf16 %v292_v38, %v292_v38  ;;  %vm5810_vm9 = vmor %vm346_vm5, %vm347_vm7 }
  0x36   : > { %v852_v2 = vld [vmem:[#allocation2 + $0x4] sm:$0xf]  ;;  %v903_v3 = vshrl.u32 %v851_v1, 16  ;;  %v906_v4 = vshll.u32 %v851_v1, 16  ;;  %240 = vst.msk [vmem:[#allocation2 + $0x30] sm:$0xf] %vm226_vm0, %v5552_v0 }
  0x37   : > { %v912_v5 = vshll.u32 %v852_v2, 16  ;;  %241 = vst.msk [vmem:[#allocation2 + $0x34] sm:$0xf] %vm226_vm0, %v5552_v0  ;;  %v916_v18 = vshrl.u32 %v852_v2, 16  ;;  %v353_v42 = vshll.u32 %v314_v20, 16  ;;  %v358_v44 = vshrl.u32 %v5751_v32, 16 }
  0x38   : > { %v905_v6 = vrot.slane %v903_v3, 4  ;;  %v908_v7 = vrot.slane %v906_v4, 5  ;;  %243 = vst.msk [vmem:[#allocation2 + $0x3c] sm:$0xf] %vm226_vm0, %v5552_v0  ;;  %v5776_v45 = vrot.slane %v384_v33, 7  ;;  %v387_v46 = vshll.u32 %v318_v22, 16 }
  0x39   : > { %244 = vst.msk [vmem:[#allocation2 + $0x40] sm:$0xf] %vm226_vm0, %v5552_v0  ;;  %v5693_v9 = vrot.slane %v912_v5, 5  ;;  %v918_v24 = vrot.slane %v916_v18, 4  ;;  %v5786_v48 = vld [vmem:[#allocation2 + $0x18] sm:$0xf]  ;;  %v380_v56 = vor.u32 %v378_v35, %v5767_v40  ;;  %v5802_v57 = vor.u32 %v353_v42, %v5769_v41 }
  0x3a   : > { %v909_v8 = vor.u32 %v908_v7, %v905_v6  ;;  %246 = vst.msk [vmem:[#allocation2 + $0x48] sm:$0xf] %vm226_vm0, %v5552_v0  ;;  %v392_v49 = vshrl.u32 %v5755_v34, 16  ;;  %v401_v51 = vshrl.u32 %v5759_v36, 16  ;;  %v409_v52 = vshrl.u32 %v5761_v37, 16  ;;  %v293_v53 = vld [vmem:[%s5659_s20 + $0x58] sm:$0xff] }
  0x3b   : > { %247 = vst.msk [vmem:[#allocation2 + $0x4c] sm:$0xf] %vm226_vm0, %v5552_v0  ;;  %v919_v39 = vor.u32 %v918_v24, %v5693_v9  ;;  %v373_v55 = vrot.slane %v369_v30, 4  ;;  %v5804_v58 = vld [vmem:[#allocation2 + $0xc] sm:$0xf]  ;;  %v683_v60 = vsel %vm5782_vm8, %v5773_v43, %v5786_v48  ;;  %v5818_v61 = vrot.slane %v358_v44, 7 }
  0x3c   : > { %v910_v11 = vrot.slane %v909_v8, 4  ;;  %249 = vst.msk [vmem:[#allocation2 + $0x54] sm:$0xf] %vm226_vm0, %v5552_v0  ;;  %v361_v62 = vshll.u32 %v5751_v32, 16  ;;  %v5822_v63 = vor.u32 %v387_v46, %v5776_v45  ;;  %v5824_v1 = vld [vmem:[#allocation2 + $0x24] sm:$0xf]  ;;  %v5831_v4 = vpack.c.bf16 %v293_v53, %v293_v53 }
  0x3d   : > { %250 = vst.msk [vmem:[#allocation2 + $0x58] sm:$0xf] %vm226_vm0, %v5552_v0  ;;  %v5796_v54 = vrot.slane %v919_v39, 4  ;;  %v356_v2 = vrot.slane %v5769_v41, 4  ;;  %v5829_v3 = vrot.slane %v392_v49, 7  ;;  %v435_v5 = vshrl.u32 %v5789_v50, 16 }
  0x3e   : > { %v915_v12 = vsel %vm5697_vm3, %v910_v11, %v5693_v9  ;;  %252 = vst.msk [vmem:[#allocation2 + $0x60] sm:$0xf] %vm226_vm0, %v5552_v0  ;;  %v390_v6 = vrot.slane %v5776_v45, 4  ;;  %v395_v7 = vshll.u32 %v5755_v34, 16  ;;  %v5838_v8 = vrot.slane %v401_v51, 7  ;;  %v290_v15 = vld [vmem:[%s5659_s20 + $0x40] sm:$0xff] }
  0x3f   : > { %1286 = vrot.lane.b32.xlu0 %v915_v12, %s5553_s17  ;;  %253 = vst.msk [vmem:[#allocation2 + $0x64] sm:$0xf] %vm226_vm0, %v5552_v0  ;;  %v5840_v9 = vrot.slane %v409_v52, 7  ;;  %v5846_v11 = vsel %vm5810_vm9, %v373_v55, %v380_v56  ;;  %v674_v12 = vsel %vm5782_vm8, %v5802_v57, %v5804_v58  ;;  %v412_v13 = vshll.u32 %v5761_v37, 16  ;;  %v291_v16 = vld [vmem:[%s5659_s20 + $0x48] sm:$0xff]  ;;  %v294_v22 = vld [vmem:[%s5659_s20 + $0x60] sm:$0xff] }
  0x40   : > { %255 = vst.msk [vmem:[#allocation2 + $0x6c] sm:$0xf] %vm226_vm0, %v5552_v0  ;;  %v404_v14 = vshll.u32 %v5759_v36, 16  ;;  %v363_v18 = vor.u32 %v361_v62, %v5818_v61  ;;  %v690_v19 = vsel %vm5782_vm8, %v5822_v63, %v5824_v1  ;;  %v5863_v20 = vpack.c.bf16 %v290_v15, %v290_v15  ;;  %v295_v23 = vld [vmem:[%s5659_s20 + $0x68] sm:$0xff]  ;;  %v5891_v41 = vld [vmem:[#allocation2 + $0x30] sm:$0xf] }
  0x41   : > { %256 = vst.msk [vmem:[#allocation2 + $0x70] sm:$0xf] %vm226_vm0, %v5552_v0  ;;  %v323_v21 = vpack.c.bf16 %v291_v16, %v291_v16  ;;  %v5869_v25 = vrot.slane %v435_v5, 7  ;;  %v438_v26 = vshll.u32 %v5789_v50, 16  ;;  %v443_v27 = vshrl.u32 %v5831_v4, 16  ;;  %s5554_s18 = smov 64  }
  0x42   : > { %258 = vst.msk [vmem:[#allocation2 + $0x78] sm:$0xf] %vm226_vm0, %v5552_v0  ;;  %v397_v28 = vor.u32 %v395_v7, %v5829_v3  ;;  %v407_v29 = vrot.slane %v5838_v8, 4  ;;  %v418_v30 = vshrl.u32 %v5863_v20, 16  ;;  %v5878_v31 = vpack.c.bf16 %v294_v22, %v294_v22  ;;  %v5904_v46 = vld [vmem:[#allocation2 + $0x48] sm:$0xf] }
  0x43   : > { %259 = vst.msk [vmem:[#allocation2 + $0x7c] sm:$0xf] %vm226_vm0, %v5552_v0  ;;  %v382_v33 = vrot.slane %v5767_v40, 4  ;;  %v426_v34 = vshrl.u32 %v323_v21, 16  ;;  %v327_v35 = vpack.c.bf16 %v295_v23, %v295_v23  ;;  %v365_v36 = vrot.slane %v5818_v61, 4  ;;  %v298_v61 = vld [vmem:[%s5659_s20 + $0x80] sm:$0xff] }
  0x44   : > { %261 = vst.msk [vmem:[#allocation2 + $0x84] sm:$0xf] %vm226_vm0, %v5552_v0  ;;  %v414_v37 = vor.u32 %v412_v13, %v5840_v9  ;;  %v416_v38 = vrot.slane %v5840_v9, 4  ;;  %v5889_v39 = vor.u32 %v404_v14, %v5838_v8  ;;  %v5899_v42 = vor.u32 %v438_v26, %v5869_v25  ;;  %v5948_v23 = vld [vmem:[#allocation2 + $0x3c] sm:$0xf]  ;;  %s5555_s22 = smov 96  }
  0x45   : > { %262 = vst.msk [vmem:[#allocation2 + $0x88] sm:$0xf] %vm226_vm0, %v5552_v0  ;;  %v5901_v44 = vrot.slane %v443_v27, 7  ;;  %v446_v45 = vshll.u32 %v5831_v4, 16  ;;  %v420_v49 = vrot.slane %v418_v30, 7  ;;  %v5909_v50 = vrot.slane %v426_v34, 7 }
  0x46   : > { %264 = vst.msk [vmem:[#allocation2 + $0x90] sm:$0xf] %vm226_vm0, %v5552_v0  ;;  %v429_v51 = vshll.u32 %v323_v21, 16  ;;  %v452_v52 = vshrl.u32 %v5878_v31, 16  ;;  %v364_v53 = vsel %vm5810_vm9, %v356_v2, %v363_v18  ;;  %v421_v55 = vshll.u32 %v5863_v20, 16  ;;  %s4832_s21 = sshll.u32 %s4819_s16, 5 }
  0x47   : > { %265 = vst.msk [vmem:[#allocation2 + $0x94] sm:$0xf] %vm226_vm0, %v5552_v0  ;;  %v460_v56 = vshrl.u32 %v327_v35, 16  ;;  %v398_v62 = vsel %vm5810_vm9, %v390_v6, %v397_v28  ;;  %v463_v8 = vshll.u32 %v327_v35, 16  ;;  %v330_v13 = vpack.c.bf16 %v298_v61, %v298_v61  ;;  %v5982_v58 = vld [vmem:[#allocation2 + $0x54] sm:$0xf] }
  0x48   : > { %267 = vst.msk [vmem:[#allocation2 + $0x9c] sm:$0xf] %vm226_vm0, %v5552_v0  ;;  %v454_v7 = vrot.slane %v452_v52, 7  ;;  %v5927_v2 = vsel %vm5810_vm9, %v407_v29, %v414_v37  ;;  %v441_v6 = vrot.slane %v5869_v25, 4  ;;  %v448_v18 = vor.u32 %v446_v45, %v5901_v44  ;;  %v301_v52 = vld [vmem:[%s5659_s20 + $0x98] sm:$0xff]  ;;  %p220_p1 = scmp.lt.s32.totalorder %s4832_s21, 63 }
  0x49   : > { %268 = vst.msk [vmem:[#allocation2 + $0xa0] sm:$0xf] %vm226_vm0, %v5552_v0  ;;  %v462_v15 = vrot.slane %v460_v56, 7  ;;  %v711_v20 = vsel %vm5782_vm8, %v5899_v42, %v5904_v46  ;;  %v424_v21 = vrot.slane %v420_v49, 4  ;;  %v431_v22 = vor.u32 %v429_v51, %v5909_v50  ;;  %v300_v51 = vld [vmem:[%s5659_s20 + $0x90] sm:$0xff]  ;;  %v305_v46 = vld [vmem:[%s5659_s20 + $0xb8] sm:$0xff] }
  0x4a   : > { %270 = vst.msk [vmem:[#allocation2 + $0xa8] sm:$0xf] %vm226_vm0, %v5552_v0  ;;  %v5957_v25 = vor.u32 %v421_v55, %v420_v49  ;;  %v458_v26 = vrot.slane %v454_v7, 4  ;;  %v455_v27 = vshll.u32 %v5878_v31, 16  ;;  %v489_v34 = vshll.u32 %v330_v13, 16  ;;  %s7506_s21 = smov (!%p220_p1, %s4832_s21), 63 }
  0x4b   : > { %271 = vst.msk [vmem:[#allocation2 + $0xac] sm:$0xf] %vm226_vm0, %v5552_v0  ;;  %v465_v29 = vor.u32 %v463_v8, %v462_v15  ;;  %v5980_v57 = vsel %vm5810_vm9, %v441_v6, %v448_v18  ;;  %v5995_v37 = vsel %vm5810_vm9, %v424_v21, %v431_v22  ;;  %v6001_v49 = vld [vmem:[#allocation2 + $0x6c] sm:$0xf]  ;;  %v450_v55 = vrot.slane %v5901_v44, 4  ;;  %s4833_s15 = sshll.u32 %s7506_s21, 2 }
  0x4c   : > { %273 = vst.msk [vmem:[#allocation2 + $0xb4] sm:$0xf] %vm226_vm0, %v5552_v0  ;;  %v5971_v31 = vor.u32 %v455_v27, %v454_v7  ;;  %v6034_v8 = vpack.c.bf16 %v300_v51, %v300_v51  ;;  %vm1382_vm14 = vcmask 519424   ;;  %vm1722_vm15 = vcmask 781824   ;;  %s7173_s24 = scalar_lea.vmem %s7486_s3, %s4833_s15 }
  0x4d   : > { %274 = vst.msk [vmem:[#allocation2 + $0xb8] sm:$0xf] %vm226_vm0, %v5552_v0  ;;  %v6011_v1 = vsel %vm5810_vm9, %v458_v26, %v465_v29  ;;  %vm4257_vm1 = vcmask 261120   ;;  %vm1915_vm2 = vcmask 1044224  }
  0x4e   : > { %276 = vst.msk [vmem:[#allocation2 + $0xc0] sm:$0xf] %vm226_vm0, %v5552_v0 }
  0x4f   : > { %277 = vst.msk [vmem:[#allocation2 + $0xc4] sm:$0xf] %vm226_vm0, %v5552_v0 }
  0x50   : > { %279 = vst.msk [vmem:[#allocation2 + $0xcc] sm:$0xf] %vm226_vm0, %v5552_v0 }
  0x51   : > { %280 = vst.msk [vmem:[#allocation2 + $0xd0] sm:$0xf] %vm226_vm0, %v5552_v0 }
  0x52   : > { %230 = vst.msk [vmem:[#allocation2 + $0x8] sm:$0x1] %vm229_vm4, %v5552_v0 }
  0x53   : > { %233 = vst.msk [vmem:[#allocation2 + $0x14] sm:$0x1] %vm229_vm4, %v5552_v0 }
  0x54   : > { %236 = vst.msk [vmem:[#allocation2 + $0x20] sm:$0x1] %vm229_vm4, %v5552_v0 }
  0x55   : > { %239 = vst.msk [vmem:[#allocation2 + $0x2c] sm:$0x1] %vm229_vm4, %v5552_v0 }
  0x56   : > { %242 = vst.msk [vmem:[#allocation2 + $0x38] sm:$0x1] %vm229_vm4, %v5552_v0 }
  0x57   : > { %245 = vst.msk [vmem:[#allocation2 + $0x44] sm:$0x1] %vm229_vm4, %v5552_v0 }
  0x58   : > { %248 = vst.msk [vmem:[#allocation2 + $0x50] sm:$0x1] %vm229_vm4, %v5552_v0 }
  0x59   : > { %v853_v17 = vld [vmem:[#allocation2 + $0x8] sm:$0x1]  ;;  %251 = vst.msk [vmem:[#allocation2 + $0x5c] sm:$0x1] %vm229_vm4, %v5552_v0 }
  0x5a   : > { %v922_v24 = vshll.u32 %v853_v17, 16  ;;  %254 = vst.msk [vmem:[#allocation2 + $0x68] sm:$0x1] %vm229_vm4, %v5552_v0  ;;  %v679_v5 = vld [vmem:[#allocation2 + $0x14] sm:$0x1] }
  0x5b   : > { %257 = vst.msk [vmem:[#allocation2 + $0x74] sm:$0x1] %vm229_vm4, %v5552_v0  ;;  %v686_v4 = vld [vmem:[#allocation2 + $0x20] sm:$0x1]  ;;  %v680_v48 = vsel %vm5938_vm10, %v365_v36, %v679_v5 }
  0x5c   : > { %v924_v32 = vrot.slane %v922_v24, 5  ;;  %260 = vst.msk [vmem:[#allocation2 + $0x80] sm:$0x1] %vm229_vm4, %v5552_v0  ;;  %v693_v14 = vld [vmem:[#allocation2 + $0x2c] sm:$0x1]  ;;  %v433_v24 = vrot.slane %v5909_v50, 4  ;;  %v687_v43 = vsel %vm5938_vm10, %v382_v33, %v686_v4 }
  0x5d   : > { %263 = vst.msk [vmem:[#allocation2 + $0x8c] sm:$0x1] %vm229_vm4, %v5552_v0  ;;  %v700_v17 = vld [vmem:[#allocation2 + $0x38] sm:$0x1]  ;;  %v296_v50 = vld [vmem:[%s5659_s20 + $0x70] sm:$0xff] }
  0x5e   : > { %v925_v40 = vsel %vm5697_vm3, %v5796_v54, %v924_v32  ;;  %266 = vst.msk [vmem:[#allocation2 + $0x98] sm:$0x1] %vm229_vm4, %v5552_v0  ;;  %v399_v54 = vrot.slane %v5829_v3, 4  ;;  %v697_v3 = vsel %vm5782_vm8, %v5889_v39, %v5891_v41  ;;  %v707_v28 = vld [vmem:[#allocation2 + $0x44] sm:$0x1]  ;;  %v486_v32 = vshrl.u32 %v330_v13, 16 }
  0x5f   : > { %1288 = vrot.lane.b32.xlu0 %v925_v40, %s5553_s17  ;;  %269 = vst.msk [vmem:[#allocation2 + $0xa4] sm:$0x1] %vm229_vm4, %v5552_v0  ;;  %v701_v36 = vsel %vm5938_vm10, %v416_v38, %v700_v17  ;;  %v704_v40 = vsel %vm5782_vm8, %v5957_v25, %v5948_v23  ;;  %v6007_v63 = vsel %vm5938_vm10, %v433_v24, %v707_v28  ;;  %v297_v38 = vld [vmem:[%s5659_s20 + $0x78] sm:$0xff] }
  0x60   : > { %272 = vst.msk [vmem:[#allocation2 + $0xb0] sm:$0x1] %vm229_vm4, %v5552_v0  ;;  %v5976_v35 = vsel %vm5938_vm10, %v399_v54, %v693_v14  ;;  %v718_v54 = vsel %vm5782_vm8, %v5971_v31, %v5982_v58  ;;  %v6030_v5 = vpack.c.bf16 %v296_v50, %v296_v50  ;;  %v6032_v7 = vpack.c.bf16 %v297_v38, %v297_v38  ;;  %v302_v58 = vld [vmem:[%s5659_s20 + $0xa0] sm:$0xff] }
  0x61   : > { %275 = vst.msk [vmem:[#allocation2 + $0xbc] sm:$0x1] %vm229_vm4, %v5552_v0 }
  0x62   : > { %278 = vst.msk [vmem:[#allocation2 + $0xc8] sm:$0x1] %vm229_vm4, %v5552_v0  ;;  %v469_v42 = vshrl.u32 %v6030_v5, 16 }
  0x63   : > { %281 = vst.msk [vmem:[#allocation2 + $0xd4] sm:$0x1] %vm229_vm4, %v5552_v0  ;;  %v299_v0 = vld [vmem:[%s5659_s20 + $0x88] sm:$0xff] }
  0x64   : > { %684 = vst [vmem:[#allocation2 + $0x18] sm:$0xf] %v683_v60  ;;  %v331_v30 = vpack.c.bf16 %v299_v0, %v299_v0  ;;  %v467_v60 = vrot.slane %v462_v15, 4  ;;  %v6042_v15 = vpack.c.bf16 %v301_v52, %v301_v52 }
  0x65   : > { %685 = vst.msk [vmem:[#allocation2 + $0x1c] sm:$0xf] %vm226_vm0, %v5846_v11  ;;  %v721_v11 = vld [vmem:[#allocation2 + $0x5c] sm:$0x1] }
  0x66   : > { %675 = vst [vmem:[#allocation2 + $0xc] sm:$0xf] %v674_v12  ;;  %v488_v12 = vrot.slane %v486_v32, 7  ;;  %v494_v33 = vshrl.u32 %v331_v30, 16  ;;  %v497_v45 = vshll.u32 %v331_v30, 16 }
  0x67   : > { %676 = vst.msk [vmem:[#allocation2 + $0x10] sm:$0xf] %vm226_vm0, %v364_v53  ;;  %v6022_v53 = vsel %vm5938_vm10, %v467_v60, %v721_v11 }
  0x68   : > { %691 = vst [vmem:[#allocation2 + $0x24] sm:$0xf] %v690_v19  ;;  %v6013_v9 = vor.u32 %v489_v34, %v488_v12  ;;  %v6015_v19 = vrot.slane %v494_v33, 7  ;;  %v492_v56 = vrot.slane %v488_v12, 4 }
  0x69   : > { %692 = vst.msk [vmem:[#allocation2 + $0x28] sm:$0xf] %vm226_vm0, %v398_v62  ;;  %v714_v62 = vld [vmem:[#allocation2 + $0x50] sm:$0x1] }
  0x6a   : > { %688 = vst [vmem:[#allocation2 + $0x20] sm:$0x1] %v687_v43  ;;  %v499_v4 = vor.u32 %v497_v45, %v6015_v19  ;;  %v732_v44 = vsel %vm5782_vm8, %v6013_v9, %v6001_v49  ;;  %v6046_v22 = vsel %vm5938_vm10, %v450_v55, %v714_v62  ;;  %v724_v9 = vld [vmem:[#allocation2 + $0x60] sm:$0xf] }
  0x6b   : > { %v857_v61 = vld [vmem:[#allocation2 + $0x18] sm:$0xf]  ;;  %681 = vst [vmem:[#allocation2 + $0x14] sm:$0x1] %v680_v48 }
  0x6c   : > { %v858_v13 = vld [vmem:[#allocation2 + $0x1c] sm:$0xf]  ;;  %v951_v14 = vshrl.u32 %v857_v61, 16  ;;  %v954_v6 = vshll.u32 %v857_v61, 16  ;;  %699 = vst.msk [vmem:[#allocation2 + $0x34] sm:$0xf] %vm226_vm0, %v5927_v2  ;;  %v6050_v0 = vsel %vm5810_vm9, %v492_v56, %v499_v4 }
  0x6d   : > { %v960_v17 = vshll.u32 %v858_v13, 16  ;;  %v964_v18 = vshrl.u32 %v858_v13, 16  ;;  %v854_v21 = vld [vmem:[#allocation2 + $0xc] sm:$0xf]  ;;  %702 = vst [vmem:[#allocation2 + $0x38] sm:$0x1] %v701_v36 }
  0x6e   : > { %v953_v2 = vrot.slane %v951_v14, 4  ;;  %v956_v24 = vrot.slane %v954_v6, 5  ;;  %v855_v26 = vld [vmem:[#allocation2 + $0x10] sm:$0xf]  ;;  %v927_v27 = vshrl.u32 %v854_v21, 16  ;;  %v930_v28 = vshll.u32 %v854_v21, 16 }
  0x6f   : > { %v962_v29 = vrot.slane %v960_v17, 5  ;;  %v966_v30 = vrot.slane %v964_v18, 4  ;;  %v936_v32 = vshll.u32 %v855_v26, 16  ;;  %v940_v34 = vshrl.u32 %v855_v26, 16  ;;  %v860_v43 = vld [vmem:[#allocation2 + $0x24] sm:$0xf] }
  0x70   : > { %v957_v48 = vor.u32 %v956_v24, %v953_v2  ;;  %v929_v60 = vrot.slane %v927_v27, 4  ;;  %v932_v11 = vrot.slane %v930_v28, 5  ;;  %v861_v12 = vld [vmem:[#allocation2 + $0x28] sm:$0xf]  ;;  %v975_v33 = vshrl.u32 %v860_v43, 16 }
  0x71   : > { %v938_v36 = vrot.slane %v936_v32, 5  ;;  %v942_v45 = vrot.slane %v940_v34, 4  ;;  %v978_v50 = vshll.u32 %v860_v43, 16  ;;  %v984_v38 = vshll.u32 %v861_v12, 16  ;;  %v859_v51 = vld [vmem:[#allocation2 + $0x20] sm:$0x1] }
  0x72   : > { %v958_v52 = vrot.slane %v957_v48, 4  ;;  %v933_v55 = vor.u32 %v932_v11, %v929_v60  ;;  %v977_v56 = vrot.slane %v975_v33, 4  ;;  %v988_v61 = vshrl.u32 %v861_v12, 16  ;;  %v856_v62 = vld [vmem:[#allocation2 + $0x14] sm:$0x1]  ;;  %v304_v60 = vld [vmem:[%s5659_s20 + $0xb0] sm:$0xff] }
  0x73   : > { %v980_v4 = vrot.slane %v978_v50, 5  ;;  %v986_v13 = vrot.slane %v984_v38, 5  ;;  %v967_v14 = vor.u32 %v966_v30, %v962_v29  ;;  %v970_v6 = vshll.u32 %v859_v51, 16  ;;  %v864_v17 = vld [vmem:[#allocation2 + $0x34] sm:$0xf] }
  0x74   : > { %v963_v18 = vsel %vm5697_vm3, %v958_v52, %v962_v29  ;;  %v934_v21 = vrot.slane %v933_v55, 4  ;;  %v943_v2 = vor.u32 %v942_v45, %v938_v36  ;;  %v946_v24 = vshll.u32 %v856_v62, 16  ;;  %v865_v26 = vld [vmem:[#allocation2 + $0x38] sm:$0x1]  ;;  %698 = vst [vmem:[#allocation2 + $0x30] sm:$0xf] %v697_v3 }
  0x75   : > { %1294 = vrot.lane.b32.xlu2 %v963_v18, %s5553_s17  ;;  %v981_v27 = vor.u32 %v980_v4, %v977_v56  ;;  %v968_v28 = vrot.slane %v967_v14, 4  ;;  %v972_v30 = vrot.slane %v970_v6, 5  ;;  %v1008_v32 = vshll.u32 %v864_v17, 16  ;;  %695 = vst [vmem:[#allocation2 + $0x2c] sm:$0x1] %v5976_v35 }
  0x76   : > { %v939_v29 = vsel %vm5697_vm3, %v934_v21, %v938_v36  ;;  %v944_v34 = vrot.slane %v943_v2, 4  ;;  %v948_v43 = vrot.slane %v946_v24, 5  ;;  %v1012_v48 = vshrl.u32 %v864_v17, 16  ;;  %712 = vst [vmem:[#allocation2 + $0x48] sm:$0xf] %v711_v20 }
  0x77   : > { %1290 = vrot.lane.b32.xlu1 %v939_v29, %s5553_s17  ;;  %v982_v39 = vrot.slane %v981_v27, 4  ;;  %v973_v41 = vsel %vm5697_vm3, %v968_v28, %v972_v30  ;;  %v6071_v3 = vrot.slane %v1008_v32, 5  ;;  %v1018_v35 = vshll.u32 %v865_v26, 16  ;;  %713 = vst.msk [vmem:[#allocation2 + $0x4c] sm:$0xf] %vm226_vm0, %v5980_v57 }
  0x78   : > { %v949_v11 = vsel %vm5697_vm3, %v944_v34, %v948_v43  ;;  %v1014_v12 = vrot.slane %v1012_v48, 4  ;;  %v990_v33 = vrot.slane %v988_v61, 4  ;;  %706 = vst.msk [vmem:[#allocation2 + $0x40] sm:$0xf] %vm226_vm0, %v5995_v37  ;;  %v477_v57 = vshrl.u32 %v6032_v7, 16 }
  0x79   : > { %v987_v20 = vsel %vm5697_vm3, %v982_v39, %v986_v13  ;;  %v1020_v36 = vrot.slane %v1018_v35, 5  ;;  %709 = vst [vmem:[#allocation2 + $0x44] sm:$0x1] %v6007_v63  ;;  %v480_v45 = vshll.u32 %v6032_v7, 16  ;;  %v6094_v37 = vrot.slane %v469_v42, 7 }
  0x7a   : > { %1298 = vrot.lane.b32.xlu0 %v987_v20, %s5553_s17  ;;  %v1015_v50 = vor.u32 %v1014_v12, %v6071_v3  ;;  %v991_v38 = vor.u32 %v990_v33, %v986_v13  ;;  %705 = vst [vmem:[#allocation2 + $0x3c] sm:$0xf] %v704_v40  ;;  %v472_v51 = vshll.u32 %v6030_v5, 16  ;;  %v6099_v7 = vrot.slane %v477_v57, 7 }
  0x7b   : > { %v863_v63 = vld [vmem:[#allocation2 + $0x30] sm:$0xf]  ;;  %720 = vst.msk [vmem:[#allocation2 + $0x58] sm:$0xf] %vm226_vm0, %v6011_v1  ;;  %v503_v52 = vshrl.u32 %v6034_v8, 16  ;;  %v6102_v55 = vpack.c.bf16 %v304_v60, %v304_v60  ;;  %v6104_v56 = vpack.c.bf16 %v305_v46, %v305_v46  ;;  %v475_v1 = vrot.slane %v6094_v37, 4 }
  0x7c   : > { %v1016_v61 = vrot.slane %v1015_v50, 4  ;;  %v999_v62 = vshrl.u32 %v863_v63, 16  ;;  %v1002_v23 = vshll.u32 %v863_v63, 16  ;;  %v862_v25 = vld [vmem:[#allocation2 + $0x2c] sm:$0x1]  ;;  %v992_v40 = vrot.slane %v991_v38, 4 }
  0x7d   : > { %1296 = vrot.lane.b32.xlu2 %v973_v41, %s5553_s17  ;;  %v994_v5 = vshll.u32 %v862_v25, 16  ;;  %v869_v4 = vld [vmem:[#allocation2 + $0x48] sm:$0xf]  ;;  %723 = vst [vmem:[#allocation2 + $0x5c] sm:$0x1] %v6022_v53  ;;  %v482_v13 = vor.u32 %v480_v45, %v6099_v7  ;;  %v6111_v14 = vor.u32 %v472_v51, %v6094_v37  ;;  %v484_v49 = vrot.slane %v6099_v7, 4 }
  0x7e   : > { %v1021_v6 = vsel %vm5697_vm3, %v1016_v61, %v1020_v36  ;;  %v1001_v17 = vrot.slane %v999_v62, 4  ;;  %v1004_v18 = vrot.slane %v1002_v23, 5  ;;  %v870_v21 = vld [vmem:[#allocation2 + $0x4c] sm:$0xf]  ;;  %v1047_v2 = vshrl.u32 %v869_v4, 16 }
  0x7f   : > { %1292 = vrot.lane.b32.xlu1 %v949_v11, %s5553_s17  ;;  %v996_v24 = vrot.slane %v994_v5, 5  ;;  %v1050_v26 = vshll.u32 %v869_v4, 16  ;;  %v1056_v27 = vshll.u32 %v870_v21, 16  ;;  %v1060_v53 = vshrl.u32 %v870_v21, 16  ;;  %v867_v28 = vld [vmem:[#allocation2 + $0x40] sm:$0xf] }
  0x80   : > { %v1005_v30 = vor.u32 %v1004_v18, %v1001_v17  ;;  %v1049_v32 = vrot.slane %v1047_v2, 4  ;;  %v868_v29 = vld [vmem:[#allocation2 + $0x44] sm:$0x1]  ;;  %v1032_v34 = vshll.u32 %v867_v28, 16  ;;  %v1036_v43 = vshrl.u32 %v867_v28, 16 }
  0x81   : > { %v997_v48 = vsel %vm5697_vm3, %v992_v40, %v996_v24  ;;  %v1052_v39 = vrot.slane %v1050_v26, 5  ;;  %v1058_v41 = vrot.slane %v1056_v27, 5  ;;  %v1042_v35 = vshll.u32 %v868_v29, 16  ;;  %v866_v60 = vld [vmem:[#allocation2 + $0x3c] sm:$0xf]  ;;  %v303_v5 = vld [vmem:[%s5659_s20 + $0xa8] sm:$0xff] }
  0x82   : > { %1304 = vrot.lane.b32.xlu0 %v1021_v6, %s5553_s17  ;;  %v1006_v11 = vrot.slane %v1005_v30, 4  ;;  %v6119_v12 = vrot.slane %v1032_v34, 5  ;;  %v1038_v33 = vrot.slane %v1036_v43, 4  ;;  %v1023_v42 = vshrl.u32 %v866_v60, 16  ;;  %v873_v46 = vld [vmem:[#allocation2 + $0x58] sm:$0xf] }
  0x83   : > { %v1053_v20 = vor.u32 %v1052_v39, %v1049_v32  ;;  %v1044_v36 = vrot.slane %v1042_v35, 5  ;;  %v1026_v57 = vshll.u32 %v866_v60, 16  ;;  %v1080_v45 = vshll.u32 %v873_v46, 16  ;;  %719 = vst [vmem:[#allocation2 + $0x54] sm:$0xf] %v718_v54 }
  0x84   : > { %v1011_v50 = vsel %vm5697_vm3, %v1006_v11, %v6071_v3  ;;  %v1039_v38 = vor.u32 %v1038_v33, %v6119_v12  ;;  %v1025_v37 = vrot.slane %v1023_v42, 4  ;;  %v874_v51 = vld [vmem:[#allocation2 + $0x5c] sm:$0x1]  ;;  %v1084_v63 = vshrl.u32 %v873_v46, 16  ;;  %716 = vst [vmem:[#allocation2 + $0x50] sm:$0x1] %v6046_v22 }
  0x85   : > { %v728_v61 = vld [vmem:[#allocation2 + $0x68] sm:$0x1]  ;;  %1302 = vrot.lane.b32.xlu2 %v1011_v50, %s5553_s17  ;;  %v1054_v62 = vrot.slane %v1053_v20, 4  ;;  %v1028_v23 = vrot.slane %v1026_v57, 5  ;;  %v6132_v25 = vrot.slane %v1080_v45, 5  ;;  %v1090_v31 = vshll.u32 %v874_v51, 16 }
  0x86   : > { %733 = vst [vmem:[#allocation2 + $0x6c] sm:$0xf] %v732_v44  ;;  %v1040_v54 = vrot.slane %v1039_v38, 4  ;;  %v1086_v3 = vrot.slane %v1084_v63, 4  ;;  %v1062_v40 = vrot.slane %v1060_v53, 4  ;;  %v483_v22 = vsel %vm5810_vm9, %v475_v1, %v482_v13 }
  0x87   : > { %734 = vst.msk [vmem:[#allocation2 + $0x70] sm:$0xf] %vm226_vm0, %v6050_v0  ;;  %1300 = vrot.lane.b32.xlu1 %v997_v48, %s5553_s17  ;;  %v1059_v4 = vsel %vm5697_vm3, %v1054_v62, %v1058_v41  ;;  %v1029_v6 = vor.u32 %v1028_v23, %v1025_v37  ;;  %v1092_v17 = vrot.slane %v1090_v31, 5  ;;  %v725_v1 = vsel %vm5782_vm8, %v6111_v14, %v724_v9  ;;  %v742_v23 = vld [vmem:[#allocation2 + $0x80] sm:$0x1] }
  0x88   : > { %727 = vst.msk [vmem:[#allocation2 + $0x64] sm:$0xf] %vm226_vm0, %v483_v22  ;;  %v1045_v44 = vsel %vm5697_vm3, %v1040_v54, %v1044_v36  ;;  %v1087_v0 = vor.u32 %v1086_v3, %v6132_v25  ;;  %v1063_v18 = vor.u32 %v1062_v40, %v1058_v41  ;;  %v729_v21 = vsel %vm5938_vm10, %v484_v49, %v728_v61 }
  0x89   : > { %v1030_v13 = vrot.slane %v1029_v6, 4  ;;  %726 = vst [vmem:[#allocation2 + $0x60] sm:$0xf] %v725_v1  ;;  %v6160_v7 = vrot.slane %v503_v52, 7  ;;  %v511_v2 = vshrl.u32 %v6042_v15, 16  ;;  %v6166_v53 = vpack.c.bf16 %v302_v58, %v302_v58 }
  0x8a   : > { %1310 = vrot.lane.b32.xlu0 %v1059_v4, %s5553_s17  ;;  %v1088_v24 = vrot.slane %v1087_v0, 4  ;;  %v872_v26 = vld [vmem:[#allocation2 + $0x54] sm:$0xf]  ;;  %v6164_v27 = vrot.slane %v1063_v18, 4  ;;  %730 = vst [vmem:[#allocation2 + $0x68] sm:$0x1] %v729_v21  ;;  %v6168_v14 = vpack.c.bf16 %v303_v5, %v303_v5 }
  0x8b   : > { %v1035_v28 = vsel %vm5697_vm3, %v1030_v13, %v6119_v12  ;;  %v1071_v30 = vshrl.u32 %v872_v26, 16  ;;  %v1074_v52 = vshll.u32 %v872_v26, 16  ;;  %v871_v32 = vld [vmem:[#allocation2 + $0x50] sm:$0x1]  ;;  %v509_v29 = vrot.slane %v6160_v7, 4 }
  0x8c   : > { %v1093_v34 = vsel %vm5697_vm3, %v1088_v24, %v1092_v17  ;;  %v1066_v43 = vshll.u32 %v871_v32, 16  ;;  %v513_v39 = vrot.slane %v511_v2, 7  ;;  %v514_v41 = vshll.u32 %v6042_v15, 16  ;;  %v738_v21 = vld [vmem:[#allocation2 + $0x78] sm:$0xf] }
  0x8d   : > { %v878_v48 = vld [vmem:[#allocation2 + $0x6c] sm:$0xf]  ;;  %1308 = vrot.lane.b32.xlu2 %v1045_v44, %s5553_s17  ;;  %v1073_v35 = vrot.slane %v1071_v30, 4  ;;  %v1076_v60 = vrot.slane %v1074_v52, 5  ;;  %v506_v44 = vshll.u32 %v6034_v8, 16  ;;  %v501_v8 = vrot.slane %v6015_v19, 4 }
  0x8e   : > { %v879_v11 = vld [vmem:[#allocation2 + $0x70] sm:$0xf]  ;;  %v1119_v33 = vshrl.u32 %v878_v48, 16  ;;  %v1122_v12 = vshll.u32 %v878_v48, 16  ;;  %v1068_v42 = vrot.slane %v1066_v43, 5  ;;  %v516_v57 = vor.u32 %v514_v41, %v513_v39  ;;  %v306_v32 = vld [vmem:[%s5659_s20 + $0xc0] sm:$0xff] }
  0x8f   : > { %v1128_v46 = vshll.u32 %v879_v11, 16  ;;  %v1132_v20 = vshrl.u32 %v879_v11, 16  ;;  %v876_v36 = vld [vmem:[#allocation2 + $0x64] sm:$0xf]  ;;  %1306 = vrot.lane.b32.xlu1 %v1035_v28, %s5553_s17  ;;  %v1077_v45 = vor.u32 %v1076_v60, %v1073_v35  ;;  %v518_v6 = vrot.slane %v513_v39, 4 }
  0x90   : > { %v1121_v50 = vrot.slane %v1119_v33, 4  ;;  %v1124_v38 = vrot.slane %v1122_v12, 5  ;;  %v1104_v37 = vshll.u32 %v876_v36, 16  ;;  %v1069_v15 = vsel %vm5697_vm3, %v6164_v27, %v1068_v42  ;;  %v875_v61 = vld [vmem:[#allocation2 + $0x60] sm:$0xf] }
  0x91   : > { %v1130_v51 = vrot.slane %v1128_v46, 5  ;;  %v1108_v63 = vshrl.u32 %v876_v36, 16  ;;  %v517_v62 = vsel %vm5810_vm9, %v509_v29, %v516_v57  ;;  %v1078_v31 = vrot.slane %v1077_v45, 4  ;;  %v877_v54 = vld [vmem:[#allocation2 + $0x68] sm:$0x1]  ;;  %v307_v29 = vld [vmem:[%s5659_s20 + $0xc8] sm:$0xff] }
  0x92   : > { %v1125_v58 = vor.u32 %v1124_v38, %v1121_v50  ;;  %v6184_v3 = vrot.slane %v1104_v37, 5  ;;  %v1095_v40 = vshrl.u32 %v875_v61, 16  ;;  %1316 = vrot.lane.b32.xlu0 %v1093_v34, %s5553_s17  ;;  %v1114_v5 = vshll.u32 %v877_v54, 16  ;;  %741 = vst.msk [vmem:[#allocation2 + $0x7c] sm:$0xf] %vm226_vm0, %v517_v62 }
  0x93   : > { %v1110_v22 = vrot.slane %v1108_v63, 4  ;;  %v1098_v4 = vshll.u32 %v875_v61, 16  ;;  %v1083_v17 = vsel %vm5697_vm3, %v1078_v31, %v6132_v25  ;;  %v743_v13 = vsel %vm5938_vm10, %v518_v6, %v742_v23  ;;  %v735_v2 = vld [vmem:[#allocation2 + $0x74] sm:$0x1]  ;;  %v752_v48 = vld [vmem:[#allocation2 + $0x90] sm:$0xf] }
  0x94   : > { %v1126_v49 = vrot.slane %v1125_v58, 4  ;;  %v1097_v9 = vrot.slane %v1095_v40, 4  ;;  %v1116_v18 = vrot.slane %v1114_v5, 5  ;;  %744 = vst [vmem:[#allocation2 + $0x80] sm:$0x1] %v743_v13  ;;  %v508_v24 = vor.u32 %v506_v44, %v6160_v7 }
  0x95   : > { %v1111_v0 = vor.u32 %v1110_v22, %v6184_v3  ;;  %v1100_v1 = vrot.slane %v1098_v4, 5  ;;  %1314 = vrot.lane.b32.xlu2 %v1083_v17, %s5553_s17  ;;  %v1134_v26 = vrot.slane %v1132_v20, 4  ;;  %v537_v30 = vshrl.u32 %v6102_v55, 16  ;;  %v749_v62 = vld [vmem:[#allocation2 + $0x8c] sm:$0x1] }
  0x96   : > { %v1131_v25 = vsel %vm5697_vm3, %v1126_v49, %v1130_v51  ;;  %v540_v52 = vshll.u32 %v6102_v55, 16  ;;  %v739_v34 = vsel %vm5782_vm8, %v508_v24, %v738_v21  ;;  %v736_v43 = vsel %vm5938_vm10, %v501_v8, %v735_v2 }
  0x97   : > { %v1112_v27 = vrot.slane %v1111_v0, 4  ;;  %v1101_v28 = vor.u32 %v1100_v1, %v1097_v9  ;;  %1312 = vrot.lane.b32.xlu1 %v1069_v15, %s5553_s17  ;;  %v1135_v7 = vor.u32 %v1134_v26, %v1130_v51  ;;  %v545_v19 = vshrl.u32 %v6104_v56, 16  ;;  %740 = vst [vmem:[#allocation2 + $0x78] sm:$0xf] %v739_v34  ;;  %v310_v34 = vld [vmem:[%s5659_s20 + $0xe0] sm:$0xff] }
  0x98   : > { %v539_v55 = vrot.slane %v537_v30, 7  ;;  %v548_v35 = vshll.u32 %v6104_v56, 16  ;;  %737 = vst [vmem:[#allocation2 + $0x74] sm:$0x1] %v736_v43  ;;  %v6217_v12 = vpack.c.bf16 %v306_v32, %v306_v32  ;;  %v6219_v42 = vpack.c.bf16 %v307_v29, %v307_v29  ;;  %v763_v29 = vld [vmem:[#allocation2 + $0xa4] sm:$0x1] }
  0x99   : > { %v1117_v39 = vsel %vm5697_vm3, %v1112_v27, %v1116_v18  ;;  %v1102_v41 = vrot.slane %v1101_v28, 4  ;;  %v882_v60 = vld [vmem:[#allocation2 + $0x7c] sm:$0xf]  ;;  %v6213_v11 = vrot.slane %v1135_v7, 4  ;;  %v6215_v33 = vrot.slane %v545_v19, 7 }
  0x9a   : > { %1322 = vrot.lane.b32.xlu0 %v1131_v25, %s5553_s17  ;;  %v1152_v20 = vshll.u32 %v882_v60, 16  ;;  %v1156_v36 = vshrl.u32 %v882_v60, 16  ;;  %v542_v57 = vor.u32 %v540_v52, %v539_v55  ;;  %v543_v56 = vrot.slane %v539_v55, 4 }
  0x9b   : > { %v1107_v46 = vsel %vm5697_vm3, %v1102_v41, %v6184_v3  ;;  %v550_v45 = vor.u32 %v548_v35, %v6215_v33  ;;  %v520_v50 = vshrl.u32 %v6166_v53, 16  ;;  %v528_v38 = vshrl.u32 %v6168_v14, 16  ;;  %v883_v37 = vld [vmem:[#allocation2 + $0x80] sm:$0x1]  ;;  %v745_v3 = vld [vmem:[#allocation2 + $0x84] sm:$0xf] }
  0x9c   : > { %v6228_v15 = vrot.slane %v1152_v20, 5  ;;  %v1158_v51 = vrot.slane %v1156_v36, 4  ;;  %v753_v63 = vsel %vm5782_vm8, %v542_v57, %v752_v48  ;;  %v531_v61 = vshll.u32 %v6168_v14, 16 }
  0x9d   : > { %1320 = vrot.lane.b32.xlu2 %v1117_v39, %s5553_s17  ;;  %v1162_v23 = vshll.u32 %v883_v37, 16  ;;  %v551_v31 = vsel %vm5810_vm9, %v543_v56, %v550_v45  ;;  %754 = vst [vmem:[#allocation2 + $0x90] sm:$0xf] %v753_v63  ;;  %v522_v58 = vrot.slane %v520_v50, 7  ;;  %v530_v54 = vrot.slane %v528_v38, 7  ;;  %v311_v50 = vld [vmem:[%s5659_s20 + $0xe8] sm:$0xff] }
  0x9e   : > { %v1159_v40 = vor.u32 %v1158_v51, %v6228_v15  ;;  %755 = vst.msk [vmem:[#allocation2 + $0x94] sm:$0xf] %vm226_vm0, %v551_v31  ;;  %v523_v22 = vshll.u32 %v6166_v53, 16  ;;  %v554_v5 = vshrl.u32 %v6217_v12, 16  ;;  %v562_v14 = vshrl.u32 %v6219_v42, 16  ;;  %v308_v38 = vld [vmem:[%s5659_s20 + $0xd0] sm:$0xff] }
  0x9f   : > { %1318 = vrot.lane.b32.xlu1 %v1107_v46, %s5553_s17  ;;  %v1164_v4 = vrot.slane %v1162_v23, 5  ;;  %v881_v6 = vld [vmem:[#allocation2 + $0x78] sm:$0xf]  ;;  %v526_v17 = vrot.slane %v522_v58, 4  ;;  %v533_v49 = vor.u32 %v531_v61, %v530_v54  ;;  %v535_v9 = vrot.slane %v530_v54, 4 }
  0xa0   : > { %v1160_v44 = vrot.slane %v1159_v40, 4  ;;  %v1143_v0 = vshrl.u32 %v881_v6, 16  ;;  %v1146_v18 = vshll.u32 %v881_v6, 16  ;;  %v880_v1 = vld [vmem:[#allocation2 + $0x74] sm:$0x1]  ;;  %v525_v13 = vor.u32 %v523_v22, %v522_v58 }
  0xa1   : > { %v1138_v21 = vshll.u32 %v880_v1, 16  ;;  %v534_v53 = vsel %vm5810_vm9, %v526_v17, %v533_v49  ;;  %v750_v2 = vsel %vm5938_vm10, %v535_v9, %v749_v62  ;;  %v556_v25 = vrot.slane %v554_v5, 7  ;;  %v759_v56 = vld [vmem:[#allocation2 + $0x9c] sm:$0xf]  ;;  %v309_v62 = vld [vmem:[%s5659_s20 + $0xd8] sm:$0xff] }
  0xa2   : > { %v1165_v24 = vsel %vm5697_vm3, %v1160_v44, %v1164_v4  ;;  %v1145_v8 = vrot.slane %v1143_v0, 4  ;;  %v1148_v26 = vrot.slane %v1146_v18, 5  ;;  %748 = vst.msk [vmem:[#allocation2 + $0x88] sm:$0xf] %vm226_vm0, %v534_v53  ;;  %v746_v27 = vsel %vm5782_vm8, %v525_v13, %v745_v3 }
  0xa3   : > { %1328 = vrot.lane.b32.xlu0 %v1165_v24, %s5553_s17  ;;  %v1140_v28 = vrot.slane %v1138_v21, 5  ;;  %751 = vst [vmem:[#allocation2 + $0x8c] sm:$0x1] %v750_v2  ;;  %v560_v30 = vrot.slane %v556_v25, 4  ;;  %v564_v52 = vrot.slane %v562_v14, 7  ;;  %v565_v32 = vshll.u32 %v6219_v42, 16 }
  0xa4   : > { %v1149_v43 = vor.u32 %v1148_v26, %v1145_v8  ;;  %v887_v7 = vld [vmem:[#allocation2 + $0x90] sm:$0xf]  ;;  %747 = vst [vmem:[#allocation2 + $0x84] sm:$0xf] %v746_v27  ;;  %v557_v19 = vshll.u32 %v6217_v12, 16  ;;  %v552_v48 = vrot.slane %v6215_v33, 4  ;;  %v342_v61 = vpack.c.bf16 %v310_v34, %v310_v34 }
  0xa5   : > { %v1141_v39 = vsel %vm5697_vm3, %v6213_v11, %v1140_v28  ;;  %v888_v41 = vld [vmem:[#allocation2 + $0x94] sm:$0xf]  ;;  %v1191_v55 = vshrl.u32 %v887_v7, 16  ;;  %v1194_v35 = vshll.u32 %v887_v7, 16  ;;  %v567_v60 = vor.u32 %v565_v32, %v564_v52  ;;  %v756_v42 = vld [vmem:[#allocation2 + $0x98] sm:$0x1] }
  0xa6   : > { %v1150_v46 = vrot.slane %v1149_v43, 4  ;;  %v1200_v20 = vshll.u32 %v888_v41, 16  ;;  %v1204_v36 = vshrl.u32 %v888_v41, 16  ;;  %v569_v57 = vrot.slane %v564_v52, 4  ;;  %v773_v32 = vld [vmem:[#allocation2 + $0xb4] sm:$0xf] }
  0xa7   : > { %1324 = vrot.lane.b32.xlu1 %v1141_v39, %s5553_s17  ;;  %v1193_v33 = vrot.slane %v1191_v55, 4  ;;  %v1196_v12 = vrot.slane %v1194_v35, 5  ;;  %v568_v11 = vsel %vm5810_vm9, %v560_v30, %v567_v60  ;;  %v559_v45 = vor.u32 %v557_v19, %v556_v25 }
  0xa8   : > { %v1155_v37 = vsel %vm5697_vm3, %v1150_v46, %v6228_v15  ;;  %762 = vst.msk [vmem:[#allocation2 + $0xa0] sm:$0xf] %vm226_vm0, %v568_v11  ;;  %v764_v51 = vsel %vm5938_vm10, %v569_v57, %v763_v29  ;;  %v757_v63 = vsel %vm5938_vm10, %v552_v48, %v756_v42  ;;  %v1202_v31 = vrot.slane %v1200_v20, 5 }
  0xa9   : > { %1326 = vrot.lane.b32.xlu2 %v1155_v37, %s5553_s17  ;;  %v1197_v23 = vor.u32 %v1196_v12, %v1193_v33  ;;  %v885_v58 = vld [vmem:[#allocation2 + $0x88] sm:$0xf]  ;;  %765 = vst [vmem:[#allocation2 + $0xa4] sm:$0x1] %v764_v51  ;;  %v760_v54 = vsel %vm5782_vm8, %v559_v45, %v759_v56  ;;  %v1206_v15 = vrot.slane %v1204_v36, 4  ;;  %v343_v5 = vpack.c.bf16 %v311_v50, %v311_v50 }
  0xaa   : > { %v886_v3 = vld [vmem:[#allocation2 + $0x8c] sm:$0x1]  ;;  %v1176_v40 = vshll.u32 %v885_v58, 16  ;;  %v1180_v22 = vshrl.u32 %v885_v58, 16  ;;  %761 = vst [vmem:[#allocation2 + $0x9c] sm:$0xf] %v760_v54  ;;  %v6276_v14 = vpack.c.bf16 %v308_v38, %v308_v38  ;;  %v6278_v9 = vpack.c.bf16 %v309_v62, %v309_v62 }
  0xab   : > { %v1198_v4 = vrot.slane %v1197_v23, 4  ;;  %v1186_v6 = vshll.u32 %v886_v3, 16  ;;  %v884_v17 = vld [vmem:[#allocation2 + $0x84] sm:$0xf]  ;;  %758 = vst [vmem:[#allocation2 + $0x98] sm:$0x1] %v757_v63  ;;  %v1207_v49 = vor.u32 %v1206_v15, %v1202_v31 }
  0xac   : > { %v1178_v44 = vrot.slane %v1176_v40, 5  ;;  %v1182_v0 = vrot.slane %v1180_v22, 4  ;;  %v1167_v18 = vshrl.u32 %v884_v17, 16  ;;  %v1170_v1 = vshll.u32 %v884_v17, 16  ;;  %v770_v17 = vld [vmem:[#allocation2 + $0xb0] sm:$0x1] }
  0xad   : > { %v1203_v13 = vsel %vm5697_vm3, %v1198_v4, %v1202_v31  ;;  %v1188_v21 = vrot.slane %v1186_v6, 5  ;;  %v6282_v53 = vrot.slane %v1207_v49, 4  ;;  %v588_v2 = vshrl.u32 %v342_v61, 16  ;;  %v766_v4 = vld [vmem:[#allocation2 + $0xa8] sm:$0xf] }
  0xae   : > { %1334 = vrot.lane.b32.xlu0 %v1203_v13, %s5553_s17  ;;  %v1183_v25 = vor.u32 %v1182_v0, %v1178_v44  ;;  %v1169_v24 = vrot.slane %v1167_v18, 4  ;;  %v1172_v8 = vrot.slane %v1170_v1, 5  ;;  %v591_v26 = vshll.u32 %v342_v61, 16 }
  0xaf   : > { %v891_v27 = vld [vmem:[#allocation2 + $0xa0] sm:$0xf]  ;;  %v590_v28 = vrot.slane %v588_v2, 7  ;;  %v596_v30 = vshrl.u32 %v343_v5, 16  ;;  %v599_v52 = vshll.u32 %v343_v5, 16  ;;  %v571_v29 = vshrl.u32 %v6276_v14, 16 }
  0xb0   : > { %v1184_v34 = vrot.slane %v1183_v25, 4  ;;  %v1173_v43 = vor.u32 %v1172_v8, %v1169_v24  ;;  %v892_v7 = vld [vmem:[#allocation2 + $0xa4] sm:$0x1]  ;;  %v1224_v19 = vshll.u32 %v891_v27, 16  ;;  %v1228_v48 = vshrl.u32 %v891_v27, 16 }
  0xb1   : > { %v1234_v39 = vshll.u32 %v892_v7, 16  ;;  %v890_v41 = vld [vmem:[#allocation2 + $0x9c] sm:$0xf]  ;;  %v593_v55 = vor.u32 %v591_v26, %v590_v28  ;;  %v594_v35 = vrot.slane %v590_v28, 4  ;;  %v598_v60 = vrot.slane %v596_v30, 7 }
  0xb2   : > { %v1189_v42 = vsel %vm5697_vm3, %v1184_v34, %v1188_v21  ;;  %v1174_v46 = vrot.slane %v1173_v43, 4  ;;  %v1226_v20 = vrot.slane %v1224_v19, 5  ;;  %v1230_v36 = vrot.slane %v1228_v48, 4  ;;  %v889_v57 = vld [vmem:[#allocation2 + $0x98] sm:$0x1] }
  0xb3   : > { %1332 = vrot.lane.b32.xlu2 %v1189_v42, %s5553_s17  ;;  %v1236_v56 = vrot.slane %v1234_v39, 5  ;;  %v1215_v33 = vshrl.u32 %v890_v41, 16  ;;  %v1218_v12 = vshll.u32 %v890_v41, 16  ;;  %v1210_v11 = vshll.u32 %v889_v57, 16  ;;  %v1417_v48 = vld [vmem:[#allocation2 + $0x8] sm:$0x1] }
  0xb4   : > { %v1179_v45 = vsel %vm5697_vm3, %v1174_v46, %v1178_v44  ;;  %v1231_v50 = vor.u32 %v1230_v36, %v1226_v20  ;;  %v601_v38 = vor.u32 %v599_v52, %v598_v60  ;;  %v774_v37 = vsel %vm5782_vm8, %v593_v55, %v773_v32  ;;  %v777_v44 = vld [vmem:[#allocation2 + $0xbc] sm:$0x1]  ;;  %v6319_v52 = vld [vmem:[#allocation2 + $0x4] sm:$0xf]  ;;  %v791_v32 = vld [vmem:[#allocation2 + $0x18] sm:$0xf] }
  0xb5   : > { %1330 = vrot.lane.b32.xlu1 %v1179_v45, %s5553_s17  ;;  %v1217_v51 = vrot.slane %v1215_v33, 4  ;;  %v1220_v63 = vrot.slane %v1218_v12, 5  ;;  %v1212_v61 = vrot.slane %v1210_v11, 5  ;;  %775 = vst [vmem:[#allocation2 + $0xb4] sm:$0xf] %v774_v37  ;;  %v573_v62 = vrot.slane %v571_v29, 7  ;;  %v1287_v37 = vpop.permute.xlu0 %1286 }
  0xb6   : > { %v1232_v23 = vrot.slane %v1231_v50, 4  ;;  %v602_v31 = vsel %vm5810_vm9, %v594_v35, %v601_v38  ;;  %v579_v58 = vshrl.u32 %v6278_v9, 16  ;;  %v582_v54 = vshll.u32 %v6278_v9, 16  ;;  %823 = vst.msk [vmem:[#allocation3 + $0x30] sm:$0xf] %vm226_vm0, %v791_v32 }
  0xb7   : > { %v1221_v15 = vor.u32 %v1220_v63, %v1217_v51  ;;  %776 = vst.msk [vmem:[#allocation2 + $0xb8] sm:$0xf] %vm226_vm0, %v602_v31  ;;  %v574_v3 = vshll.u32 %v6276_v14, 16  ;;  %v577_v22 = vrot.slane %v573_v62, 4  ;;  %v1213_v9 = vsel %vm5697_vm3, %v6282_v53, %v1212_v61  ;;  %v792_v61 = vld [vmem:[#allocation2 + $0x1c] sm:$0xf] }
  0xb8   : > { %v1237_v40 = vsel %vm5697_vm3, %v1232_v23, %v1236_v56  ;;  %v581_v5 = vrot.slane %v579_v58, 7  ;;  %v603_v1 = vrot.slane %v598_v60, 4  ;;  %v1516_v39 = vrot.slane %v6319_v52, 5  ;;  %824 = vst.msk [vmem:[#allocation3 + $0x3c] sm:$0xf] %vm226_vm0, %v792_v61 }
  0xb9   : > { %1340 = vrot.lane.b32.xlu0 %v1237_v40, %s5553_s17  ;;  %v1222_v6 = vrot.slane %v1221_v15, 4  ;;  %v576_v49 = vor.u32 %v574_v3, %v573_v62  ;;  %v1519_v50 = vrot.slane %v1417_v48, 5  ;;  %v787_v31 = vld [vmem:[#allocation2] sm:$0xf]  ;;  %v1426_v32 = vld [vmem:[#allocation2 + $0x2c] sm:$0x1] }
  0xba   : > { %v584_v0 = vor.u32 %v582_v54, %v581_v5  ;;  %v586_v18 = vrot.slane %v581_v5, 4  ;;  %v778_v53 = vsel %vm5938_vm10, %v603_v1, %v777_v44  ;;  %v1518_v45 = vrot.slane %v1516_v39, 4  ;;  %819 = vst.msk [vmem:[#allocation3] sm:$0xf] %vm226_vm0, %v787_v31  ;;  %v1415_v5 = vld [vmem:[#allocation2] sm:$0xe] }
  0xbb   : > { %v1227_v14 = vsel %vm5697_vm3, %v1222_v6, %v1226_v20  ;;  %v767_v13 = vsel %vm5782_vm8, %v576_v49, %v766_v4  ;;  %779 = vst [vmem:[#allocation2 + $0xbc] sm:$0x1] %v778_v53  ;;  %v1421_v4 = vld [vmem:[#allocation2 + $0x18] sm:$0xe]  ;;  %v1422_v6 = vld [vmem:[#allocation2 + $0x1c] sm:$0xf] }
  0xbc   : > { %1338 = vrot.lane.b32.xlu2 %v1227_v14, %s5553_s17  ;;  %v896_v21 = vld [vmem:[#allocation2 + $0xb4] sm:$0xf]  ;;  %v585_v2 = vsel %vm5810_vm9, %v577_v22, %v584_v0  ;;  %v771_v25 = vsel %vm5938_vm10, %v586_v18, %v770_v17  ;;  %768 = vst [vmem:[#allocation2 + $0xa8] sm:$0xf] %v767_v13  ;;  %v1520_v40 = vsel %vm6329_vm13, %v1518_v45, %v1519_v50  ;;  %v1419_v49 = vld [vmem:[#allocation2 + $0x10] sm:$0xf] }
  0xbd   : > { %1336 = vrot.lane.b32.xlu1 %v1213_v9, %s5553_s17  ;;  %v1263_v24 = vshrl.u32 %v896_v21, 16  ;;  %v1266_v8 = vshll.u32 %v896_v21, 16  ;;  %769 = vst.msk [vmem:[#allocation2 + $0xac] sm:$0xf] %vm226_vm0, %v585_v2  ;;  %v795_v0 = vld [vmem:[#allocation2 + $0x30] sm:$0xf] }
  0xbe   : > { %v897_v26 = vld [vmem:[#allocation2 + $0xb8] sm:$0xf]  ;;  %772 = vst [vmem:[#allocation2 + $0xb0] sm:$0x1] %v771_v25  ;;  %v788_v18 = vld [vmem:[#allocation2 + $0x4] sm:$0xf] }
  0xbf   : > { %v1265_v27 = vrot.slane %v1263_v24, 4  ;;  %v1268_v28 = vrot.slane %v1266_v8, 5  ;;  %v1272_v30 = vshll.u32 %v897_v26, 16  ;;  %v1276_v43 = vshrl.u32 %v897_v26, 16  ;;  %1383 = vst.msk [vmem:[#allocation3] sm:$0xf] %vm1382_vm14, %v1287_v37 }
  0xc0   : > { %v4834_v1 = vrot.slane %v1415_v5, 9  ;;  %v4836_v14 = vrot.slane %v1421_v4, 9  ;;  %v1530_v13 = vrot.slane %v1422_v6, 5  ;;  %827 = vst.msk [vmem:[#allocation3 + $0x60] sm:$0xf] %vm226_vm0, %v795_v0  ;;  %v1523_v8 = vrot.slane %v1419_v49, 5 }
  0xc1   : > { %v1269_v29 = vor.u32 %v1268_v28, %v1265_v27  ;;  %v1274_v34 = vrot.slane %v1272_v30, 5  ;;  %v1278_v33 = vrot.slane %v1276_v43, 4  ;;  %v1425_v2 = vld [vmem:[#allocation2 + $0x28] sm:$0xf]  ;;  %820 = vst.msk [vmem:[#allocation3 + $0xc] sm:$0xf] %vm226_vm0, %v788_v18 }
  0xc2   : > { %v898_v38 = vld [vmem:[#allocation2 + $0xbc] sm:$0x1]  ;;  %v1418_v24 = vld [vmem:[#allocation2 + $0xc] sm:$0xe]  ;;  %v1517_v26 = vsel %vm6329_vm13, %v4834_v1, %v1516_v39  ;;  %v1531_v27 = vsel %vm6329_vm13, %v4836_v14, %v1530_v13  ;;  %v1420_v28 = vld [vmem:[#allocation2 + $0x14] sm:$0x1] }
  0xc3   : > { %v1270_v7 = vrot.slane %v1269_v29, 4  ;;  %v893_v19 = vld [vmem:[#allocation2 + $0xa8] sm:$0xf]  ;;  %v1279_v54 = vor.u32 %v1278_v33, %v1274_v34  ;;  %v1282_v15 = vshll.u32 %v898_v38, 16  ;;  %v1537_v30 = vrot.slane %v1425_v2, 5 }
  0xc4   : > { %v894_v41 = vld [vmem:[#allocation2 + $0xac] sm:$0xf]  ;;  %v1239_v55 = vshrl.u32 %v893_v19, 16  ;;  %v1242_v35 = vshll.u32 %v893_v19, 16  ;;  %v4835_v29 = vrot.slane %v1418_v24, 9  ;;  %v1526_v43 = vrot.slane %v1420_v28, 5 }
  0xc5   : > { %v1275_v60 = vsel %vm5697_vm3, %v1270_v7, %v1274_v34  ;;  %v895_v42 = vld [vmem:[#allocation2 + $0xb0] sm:$0x1]  ;;  %v1248_v46 = vshll.u32 %v894_v41, 16  ;;  %v1252_v20 = vshrl.u32 %v894_v41, 16  ;;  %v1280_v44 = vrot.slane %v1279_v54, 4 }
  0xc6   : > { %1346 = vrot.lane.b32.xlu0 %v1275_v60, %s5553_s17  ;;  %v1258_v36 = vshll.u32 %v895_v42, 16  ;;  %v1241_v57 = vrot.slane %v1239_v55, 4  ;;  %v1244_v56 = vrot.slane %v1242_v35, 5  ;;  %v1284_v9 = vrot.slane %v1282_v15, 5  ;;  %v798_v7 = vld [vmem:[#allocation2 + $0x40] sm:$0xf] }
  0xc7   : > { %v1250_v12 = vrot.slane %v1248_v46, 5  ;;  %v1254_v11 = vrot.slane %v1252_v20, 4  ;;  %v1525_v34 = vrot.slane %v1523_v8, 4  ;;  %v789_v52 = vld [vmem:[#allocation2 + $0xc] sm:$0xf]  ;;  %v1539_v19 = vrot.slane %v1537_v30, 4 }
  0xc8   : > { %v1245_v51 = vor.u32 %v1244_v56, %v1241_v57  ;;  %v1260_v23 = vrot.slane %v1258_v36, 5  ;;  %v1285_v53 = vsel %vm5697_vm3, %v1280_v44, %v1284_v9  ;;  %v1540_v48 = vrot.slane %v1426_v32, 5  ;;  %830 = vst.msk [vmem:[#allocation3 + $0x84] sm:$0xf] %vm226_vm0, %v798_v7  ;;  %v793_v41 = vld [vmem:[#allocation2 + $0x24] sm:$0xf] }
  0xc9   : > { %v1255_v62 = vor.u32 %v1254_v11, %v1250_v12  ;;  %821 = vst.msk [vmem:[#allocation3 + $0x18] sm:$0xf] %vm226_vm0, %v789_v52  ;;  %v1524_v55 = vsel %vm6329_vm13, %v4835_v29, %v1523_v8  ;;  %v1527_v35 = vsel %vm6329_vm13, %v1525_v34, %v1526_v43  ;;  %v1423_v42 = vld [vmem:[#allocation2 + $0x20] sm:$0x1]  ;;  %v1424_v46 = vld [vmem:[#allocation2 + $0x24] sm:$0xe] }
  0xca   : > { %v1246_v58 = vrot.slane %v1245_v51, 4  ;;  %825 = vst.msk [vmem:[#allocation3 + $0x48] sm:$0xf] %vm226_vm0, %v793_v41  ;;  %v1541_v60 = vsel %vm6329_vm13, %v1539_v19, %v1540_v48  ;;  %v1430_v20 = vld [vmem:[#allocation2 + $0x3c] sm:$0xe]  ;;  %v1532_v57 = vrot.slane %v1530_v13, 4 }
  0xcb   : > { %v1256_v3 = vrot.slane %v1255_v62, 4  ;;  %v1431_v36 = vld [vmem:[#allocation2 + $0x40] sm:$0xf]  ;;  %v1533_v56 = vrot.slane %v1423_v42, 5  ;;  %v4837_v33 = vrot.slane %v1424_v46, 9  ;;  %v4839_v45 = vrot.slane %v1430_v20, 9 }
  0xcc   : > { %v1251_v22 = vsel %vm5697_vm3, %v1246_v58, %v1250_v12  ;;  %v801_v12 = vld [vmem:[#allocation2 + $0x54] sm:$0xf]  ;;  %v790_v11 = vld [vmem:[#allocation2 + $0x10] sm:$0xf]  ;;  %v1551_v50 = vrot.slane %v1431_v36, 5 }
  0xcd   : > { %v1261_v17 = vsel %vm5697_vm3, %v1256_v3, %v1260_v23  ;;  %1342 = vrot.lane.b32.xlu1 %v1251_v22, %s5553_s17  ;;  %833 = vst.msk [vmem:[#allocation3 + $0xa8] sm:$0xf] %vm226_vm0, %v801_v12  ;;  %v796_v37 = vld [vmem:[#allocation2 + $0x34] sm:$0xf]  ;;  %v1434_v61 = vld [vmem:[#allocation2 + $0x4c] sm:$0xf]  ;;  %v1534_v62 = vsel %vm6329_vm13, %v1532_v57, %v1533_v56  ;;  %v1538_v23 = vsel %vm6329_vm13, %v4837_v33, %v1537_v30 }
  0xce   : > { %1344 = vrot.lane.b32.xlu2 %v1261_v17, %s5553_s17  ;;  %1628 = vrot.lane.b32.xlu0 %v1520_v40, %s5554_s18  ;;  %v1428_v51 = vld [vmem:[#allocation2 + $0x34] sm:$0xf]  ;;  %822 = vst.msk [vmem:[#allocation3 + $0x24] sm:$0xf] %vm226_vm0, %v790_v11  ;;  %v1552_v31 = vsel %vm6329_vm13, %v4839_v45, %v1551_v50  ;;  %v1427_v58 = vld [vmem:[#allocation2 + $0x30] sm:$0xe] }
  0xcf   : > { %v1295_v21 = vpop.permute.xlu2 %1294  ;;  %828 = vst.msk [vmem:[#allocation3 + $0x6c] sm:$0xf] %vm226_vm0, %v796_v37  ;;  %v1544_v54 = vrot.slane %v1428_v51, 5  ;;  %v1558_v15 = vrot.slane %v1434_v61, 5  ;;  %v1429_v3 = vld [vmem:[#allocation2 + $0x38] sm:$0x1] }
  0xd0   : > { %1387 = vst.msk [vmem:[#allocation3 + $0x30] sm:$0xf] %vm1382_vm14, %v1295_v21  ;;  %v1435_v40 = vld [vmem:[#allocation2 + $0x50] sm:$0x1]  ;;  %v4838_v22 = vrot.slane %v1427_v58, 9  ;;  %v1547_v17 = vrot.slane %v1429_v3, 5 }
  0xd1   : > { %v1289_v25 = vpop.permute.xlu0 %1288  ;;  %v804_v5 = vld [vmem:[#allocation2 + $0x64] sm:$0xf]  ;;  %v794_v4 = vld [vmem:[#allocation2 + $0x28] sm:$0xf]  ;;  %v1546_v6 = vrot.slane %v1544_v54, 4  ;;  %v1560_v49 = vrot.slane %v1558_v15, 4 }
  0xd2   : > { %1384 = vst.msk [vmem:[#allocation3 + $0xc] sm:$0xf] %vm1382_vm14, %v1289_v25  ;;  %v1561_v44 = vrot.slane %v1435_v40, 5  ;;  %v799_v0 = vld [vmem:[#allocation2 + $0x48] sm:$0xf]  ;;  %v1545_v1 = vsel %vm6329_vm13, %v4838_v22, %v1544_v54  ;;  %v1553_v8 = vrot.slane %v1551_v50, 4 }
  0xd3   : > { %836 = vst.msk [vmem:[#allocation3 + $0xcc] sm:$0xf] %vm226_vm0, %v804_v5  ;;  %v1548_v14 = vsel %vm6329_vm13, %v1546_v6, %v1547_v17  ;;  %v1432_v21 = vld [vmem:[#allocation2 + $0x44] sm:$0x1]  ;;  %v1433_v2 = vld [vmem:[#allocation2 + $0x48] sm:$0xe] }
  0xd4   : > { %826 = vst.msk [vmem:[#allocation3 + $0x54] sm:$0xf] %vm226_vm0, %v794_v4  ;;  %v1562_v13 = vsel %vm6329_vm13, %v1560_v49, %v1561_v44  ;;  %v1439_v25 = vld [vmem:[#allocation2 + $0x60] sm:$0xe]  ;;  %v807_v28 = vld [vmem:[#allocation2 + $0x78] sm:$0xf] }
  0xd5   : > { %1348 = vrot.lane.b32.xlu1 %v1285_v53, %s5553_s17  ;;  %831 = vst.msk [vmem:[#allocation3 + $0x90] sm:$0xf] %vm226_vm0, %v799_v0  ;;  %v1440_v53 = vld [vmem:[#allocation2 + $0x64] sm:$0xf]  ;;  %v797_v30 = vld [vmem:[#allocation2 + $0x3c] sm:$0xf] }
  0xd6   : > { %1626 = vrot.lane.b32.xlu2 %v1517_v26, %s5554_s18  ;;  %1634 = vrot.lane.b32.xlu0 %v1531_v27, %s5554_s18  ;;  %v1554_v26 = vrot.slane %v1432_v21, 5  ;;  %v4840_v27 = vrot.slane %v1433_v2, 9  ;;  %v4842_v32 = vrot.slane %v1439_v25, 9  ;;  %v1572_v29 = vrot.slane %v1440_v53, 5  ;;  %v1437_v34 = vld [vmem:[#allocation2 + $0x58] sm:$0xf] }
  0xd7   : > { %v1297_v39 = vpop.permute.xlu2 %1296  ;;  %839 = vst.msk [vmem:[#allocation3 + $0xf0] sm:$0xf] %vm226_vm0, %v807_v28  ;;  %v6402_v7 = vld [vmem:[#allocation2 + $0x70] sm:$0xf]  ;;  %v802_v52 = vld [vmem:[#allocation2 + $0x58] sm:$0xf] }
  0xd8   : > { %1388 = vst.msk [vmem:[#allocation3 + $0x3c] sm:$0xf] %vm1382_vm14, %v1297_v39  ;;  %v1555_v48 = vsel %vm6329_vm13, %v1553_v8, %v1554_v26  ;;  %v1559_v39 = vsel %vm6329_vm13, %v4840_v27, %v1558_v15  ;;  %v1573_v41 = vsel %vm6329_vm13, %v4842_v32, %v1572_v29  ;;  %v1438_v42 = vld [vmem:[#allocation2 + $0x5c] sm:$0x1]  ;;  %v1444_v46 = vld [vmem:[#allocation2 + $0x74] sm:$0x1] }
  0xd9   : > { %829 = vst.msk [vmem:[#allocation3 + $0x78] sm:$0xf] %vm226_vm0, %v797_v30  ;;  %v810_v57 = vld [vmem:[#allocation2 + $0x88] sm:$0xf]  ;;  %v800_v56 = vld [vmem:[#allocation2 + $0x4c] sm:$0xf] }
  0xda   : > { %834 = vst.msk [vmem:[#allocation3 + $0xb4] sm:$0xf] %vm226_vm0, %v802_v52  ;;  %v1568_v12 = vrot.slane %v1438_v42, 5  ;;  %v1582_v45 = vrot.slane %v1444_v46, 5  ;;  %v1441_v61 = vld [vmem:[#allocation2 + $0x68] sm:$0x1] }
  0xdb   : > { %842 = vst.msk [vmem:[#allocation3 + $0x114] sm:$0xf] %vm226_vm0, %v810_v57  ;;  %v1448_v58 = vld [vmem:[#allocation2 + $0x84] sm:$0xe]  ;;  %v1449_v54 = vld [vmem:[#allocation2 + $0x88] sm:$0xf] }
  0xdc   : > { %832 = vst.msk [vmem:[#allocation3 + $0x9c] sm:$0xf] %vm226_vm0, %v800_v56  ;;  %v1574_v3 = vrot.slane %v1572_v29, 4  ;;  %v1575_v40 = vrot.slane %v1441_v61, 5  ;;  %v813_v5 = vld [vmem:[#allocation2 + $0x9c] sm:$0xf] }
  0xdd   : > { %1630 = vrot.lane.b32.xlu1 %v1524_v55, %s5554_s18  ;;  %v1436_v55 = vld [vmem:[#allocation2 + $0x54] sm:$0xe]  ;;  %v803_v4 = vld [vmem:[#allocation2 + $0x60] sm:$0xf]  ;;  %v808_v6 = vld [vmem:[#allocation2 + $0x7c] sm:$0xf] }
  0xde   : > { %1632 = vrot.lane.b32.xlu2 %v1527_v35, %s5554_s18  ;;  %1640 = vrot.lane.b32.xlu0 %v1541_v60, %s5554_s18  ;;  %v1565_v35 = vrot.slane %v1437_v34, 5  ;;  %v1579_v60 = vrot.slane %v6402_v7, 5  ;;  %v4841_v36 = vrot.slane %v1436_v55, 9  ;;  %v4845_v17 = vrot.slane %v1448_v58, 9  ;;  %v1446_v44 = vld [vmem:[#allocation2 + $0x7c] sm:$0xf] }
  0xdf   : > { %v1303_v38 = vpop.permute.xlu2 %1302  ;;  %v1593_v49 = vrot.slane %v1449_v54, 5  ;;  %845 = vst.msk [vmem:[#allocation3 + $0x138] sm:$0xf] %vm226_vm0, %v813_v5  ;;  %v1445_v21 = vld [vmem:[#allocation2 + $0x78] sm:$0xe] }
  0xe0   : > { %1391 = vst.msk [vmem:[#allocation3 + $0x60] sm:$0xf] %vm1382_vm14, %v1303_v38  ;;  %v1567_v33 = vrot.slane %v1565_v35, 4  ;;  %v1581_v11 = vrot.slane %v1579_v60, 4  ;;  %v805_v38 = vld [vmem:[#allocation2 + $0x6c] sm:$0xf]  ;;  %v1566_v51 = vsel %vm6329_vm13, %v4841_v36, %v1565_v35 }
  0xe1   : > { %837 = vst.msk [vmem:[#allocation3 + $0xd8] sm:$0xf] %vm226_vm0, %v805_v38  ;;  %v1447_v2 = vld [vmem:[#allocation2 + $0x80] sm:$0x1]  ;;  %v4844_v26 = vrot.slane %v1445_v21, 9  ;;  %v1595_v46 = vrot.slane %v1593_v49, 4 }
  0xe2   : > { %835 = vst.msk [vmem:[#allocation3 + $0xc0] sm:$0xf] %vm226_vm0, %v803_v4  ;;  %v1589_v28 = vrot.slane %v1447_v2, 5  ;;  %v816_v30 = vld [vmem:[#allocation2 + $0xac] sm:$0xf] }
  0xe3   : > { %840 = vst.msk [vmem:[#allocation3 + $0xfc] sm:$0xf] %vm226_vm0, %v808_v6  ;;  %v806_v34 = vld [vmem:[#allocation2 + $0x70] sm:$0xf]  ;;  %v1457_v55 = vld [vmem:[#allocation2 + $0xa8] sm:$0xe] }
  0xe4   : > { %848 = vst.msk [vmem:[#allocation3 + $0x15c] sm:$0xf] %vm226_vm0, %v816_v30  ;;  %v811_v7 = vld [vmem:[#allocation2 + $0x90] sm:$0xf]  ;;  %v1458_v35 = vld [vmem:[#allocation2 + $0xac] sm:$0xf] }
  0xe5   : > { %1636 = vrot.lane.b32.xlu1 %v1534_v62, %s5554_s18  ;;  %v1442_v62 = vld [vmem:[#allocation2 + $0x6c] sm:$0xe]  ;;  %838 = vst.msk [vmem:[#allocation3 + $0xe4] sm:$0xf] %vm226_vm0, %v806_v34  ;;  %v809_v36 = vld [vmem:[#allocation2 + $0x84] sm:$0xf] }
  0xe6   : > { %1638 = vrot.lane.b32.xlu2 %v1538_v23, %s5554_s18  ;;  %1646 = vrot.lane.b32.xlu0 %v1552_v31, %s5554_s18  ;;  %v1569_v23 = vsel %vm6329_vm13, %v1567_v33, %v1568_v12  ;;  %v1583_v31 = vsel %vm6329_vm13, %v1581_v11, %v1582_v45  ;;  %v4843_v22 = vrot.slane %v1442_v62, 9  ;;  %843 = vst.msk [vmem:[#allocation3 + $0x120] sm:$0xf] %vm226_vm0, %v811_v7  ;;  %v4848_v56 = vrot.slane %v1457_v55, 9  ;;  %v1455_v12 = vld [vmem:[#allocation2 + $0xa0] sm:$0xf] }
  0xe7   : > { %v1309_v9 = vpop.permute.xlu2 %1308  ;;  %v1614_v33 = vrot.slane %v1458_v35, 5  ;;  %841 = vst.msk [vmem:[#allocation3 + $0x108] sm:$0xf] %vm226_vm0, %v809_v36  ;;  %v1461_v11 = vld [vmem:[#allocation2 + $0xb8] sm:$0xf]  ;;  %v1607_v62 = vrot.slane %v1455_v12, 5 }
  0xe8   : > { %1394 = vst.msk [vmem:[#allocation3 + $0x84] sm:$0xf] %vm1382_vm14, %v1309_v9  ;;  %v1452_v9 = vld [vmem:[#allocation2 + $0x94] sm:$0xf]  ;;  %v1454_v61 = vld [vmem:[#allocation2 + $0x9c] sm:$0xe] }
  0xe9   : > { %v1291_v18 = vpop.permute.xlu1 %1290  ;;  %v1600_v25 = vrot.slane %v1452_v9, 5  ;;  %v1462_v58 = vld [vmem:[#allocation2 + $0xbc] sm:$0x1]  ;;  %v815_v21 = vld [vmem:[#allocation2 + $0xa8] sm:$0xf] }
  0xea   : > { %1385 = vst.msk [vmem:[#allocation3 + $0x18] sm:$0xf] %vm1382_vm14, %v1291_v18  ;;  %v1576_v18 = vsel %vm6329_vm13, %v1574_v3, %v1575_v40  ;;  %v812_v40 = vld [vmem:[#allocation2 + $0x94] sm:$0xf]  ;;  %v1624_v6 = vrot.slane %v1462_v58, 5 }
  0xeb   : > { %v1602_v32 = vrot.slane %v1600_v25, 4  ;;  %844 = vst.msk [vmem:[#allocation3 + $0x12c] sm:$0xf] %vm226_vm0, %v812_v40  ;;  %v1756_v7 = vld [vmem:[#allocation2 + $0x10] sm:$0xf] }
  0xec   : > { %v1299_v24 = vpop.permute.xlu0 %1298  ;;  %847 = vst.msk [vmem:[#allocation3 + $0x150] sm:$0xf] %vm226_vm0, %v815_v21  ;;  %v2974_v55 = vld [vmem:[#allocation2 + $0x1c] sm:$0xf]  ;;  %v2446_v36 = vld [vmem:[#allocation2 + $0x14] sm:$0x1] }
  0xed   : > { %1642 = vrot.lane.b32.xlu1 %v1545_v1, %s5554_s18  ;;  %1389 = vst.msk [vmem:[#allocation3 + $0x48] sm:$0xf] %vm1382_vm14, %v1299_v24  ;;  %v1586_v1 = vrot.slane %v1446_v44, 5  ;;  %v1453_v24 = vld [vmem:[#allocation2 + $0x98] sm:$0x1] }
  0xee   : > { %1644 = vrot.lane.b32.xlu2 %v1548_v14, %s5554_s18  ;;  %1652 = vrot.lane.b32.xlu0 %v1562_v13, %s5554_s18  ;;  %v1580_v14 = vsel %vm6329_vm13, %v4843_v22, %v1579_v60  ;;  %v1594_v13 = vsel %vm6329_vm13, %v4845_v17, %v1593_v49  ;;  %v1603_v29 = vrot.slane %v1453_v24, 5  ;;  %v1609_v22 = vrot.slane %v1607_v62, 4  ;;  %v817_v49 = vld [vmem:[#allocation2 + $0xb4] sm:$0xf]  ;;  %v1758_v35 = vld [vmem:[#allocation2 + $0x1c] sm:$0xf] }
  0xef   : > { %v1315_v43 = vpop.permute.xlu2 %1314  ;;  %v1588_v27 = vrot.slane %v1586_v1, 4  ;;  %v1587_v52 = vsel %vm6329_vm13, %v4844_v26, %v1586_v1  ;;  %849 = vst.msk [vmem:[#allocation3 + $0x168] sm:$0xf] %vm226_vm0, %v817_v49  ;;  %v1460_v1 = vld [vmem:[#allocation2 + $0xb4] sm:$0xe] }
  0xf0   : > { %1397 = vst.msk [vmem:[#allocation3 + $0xa8] sm:$0xf] %vm1382_vm14, %v1315_v43  ;;  %v4849_v2 = vrot.slane %v1460_v1, 9  ;;  %v2444_v26 = vld [vmem:[#allocation2 + $0xc] sm:$0xe] }
  0xf1   : > { %v1293_v19 = vpop.permute.xlu1 %1292  ;;  %v4850_v30 = vrot.slane %v2444_v26, 9  ;;  %v2448_v12 = vld [vmem:[#allocation2 + $0x1c] sm:$0xf]  ;;  %v2975_v58 = vld [vmem:[#allocation2 + $0x20] sm:$0x1] }
  0xf2   : > { %1386 = vst.msk [vmem:[#allocation3 + $0x24] sm:$0xf] %vm1382_vm14, %v1293_v19  ;;  %v1590_v19 = vsel %vm6329_vm13, %v1588_v27, %v1589_v28  ;;  %v2445_v27 = vld [vmem:[#allocation2 + $0x10] sm:$0xf]  ;;  %v818_v28 = vld [vmem:[#allocation2 + $0xb8] sm:$0xf] }
  0xf3   : > { %850 = vst.msk [vmem:[#allocation3 + $0x174] sm:$0xf] %vm226_vm0, %v818_v28 }
  0xf4   : > { %v1305_v20 = vpop.permute.xlu0 %1304 }
  0xf5   : > { %1648 = vrot.lane.b32.xlu1 %v1555_v48, %s5554_s18  ;;  %1392 = vst.msk [vmem:[#allocation3 + $0x6c] sm:$0xf] %vm1382_vm14, %v1305_v20  ;;  %v1604_v48 = vsel %vm6329_vm13, %v1602_v32, %v1603_v29  ;;  %v2542_v32 = vrot.slane %v2445_v27, 5 }
  0xf6   : > { %1650 = vrot.lane.b32.xlu2 %v1559_v39, %s5554_s18  ;;  %1658 = vrot.lane.b32.xlu0 %v1573_v41, %s5554_s18  ;;  %v1450_v39 = vld [vmem:[#allocation2 + $0x8c] sm:$0x1]  ;;  %v1451_v41 = vld [vmem:[#allocation2 + $0x90] sm:$0xe] }
  0xf7   : > { %v1321_v50 = vpop.permute.xlu2 %1320  ;;  %v1596_v20 = vrot.slane %v1450_v39, 5  ;;  %v4846_v57 = vrot.slane %v1451_v41, 9  ;;  %v2973_v39 = vld [vmem:[#allocation2 + $0x18] sm:$0xf] }
  0xf8   : > { %1400 = vst.msk [vmem:[#allocation3 + $0xcc] sm:$0xf] %vm1382_vm14, %v1321_v50  ;;  %v814_v50 = vld [vmem:[#allocation2 + $0xa0] sm:$0xf] }
  0xf9   : > { %v1301_v37 = vpop.permute.xlu1 %1300  ;;  %v1597_v38 = vsel %vm6329_vm13, %v1595_v46, %v1596_v20  ;;  %846 = vst.msk [vmem:[#allocation3 + $0x144] sm:$0xf] %vm226_vm0, %v814_v50  ;;  %v3025_v46 = vshll.u32 %v2973_v39, 16  ;;  %v2782_v20 = vld [vmem:[#allocation2 + $0x1c] sm:$0xf] }
  0xfa   : > { %1390 = vst.msk [vmem:[#allocation3 + $0x54] sm:$0xf] %vm1382_vm14, %v1301_v37  ;;  %v1601_v37 = vsel %vm6329_vm13, %v4846_v57, %v1600_v25  ;;  %v3031_v57 = vshll.u32 %v2974_v55, 16 }
  0xfc   : > { %v1311_v15 = vpop.permute.xlu0 %1310 }
  0xfd   : > { %1654 = vrot.lane.b32.xlu1 %v1566_v51, %s5554_s18  ;;  %1395 = vst.msk [vmem:[#allocation3 + $0x90] sm:$0xf] %vm1382_vm14, %v1311_v15  ;;  %v1615_v51 = vsel %vm6329_vm13, %v4848_v56, %v1614_v33  ;;  %v4847_v15 = vrot.slane %v1454_v61, 9  ;;  %v3035_v56 = vshrl.u32 %v2974_v55, 16  ;;  %v3033_v61 = vrot.slane %v3031_v57, 5 }
  0xfe   : > { %1656 = vrot.lane.b32.xlu2 %v1569_v23, %s5554_s18  ;;  %1664 = vrot.lane.b32.xlu0 %v1583_v31, %s5554_s18  ;;  %v1621_v23 = vrot.slane %v1461_v11, 5  ;;  %v1456_v31 = vld [vmem:[#allocation2 + $0xa4] sm:$0x1]  ;;  %v2544_v11 = vrot.slane %v2542_v32, 4 }
  0xff   : > { %v1610_v5 = vrot.slane %v1456_v31, 5  ;;  %v1608_v44 = vsel %vm6329_vm13, %v4847_v15, %v1607_v62  ;;  %v3037_v62 = vrot.slane %v3035_v56, 4 }
 0x100   : > { %v1623_v4 = vrot.slane %v1621_v23, 4  ;;  %v1622_v24 = vsel %vm6329_vm13, %v4849_v2, %v1621_v23  ;;  %v2784_v2 = vld [vmem:[#allocation2 + $0x28] sm:$0xf] }
 0x101   : > { %v1307_v0 = vpop.permute.xlu1 %1306  ;;  %v1611_v9 = vsel %vm6329_vm13, %v1609_v22, %v1610_v5  ;;  %v3038_v22 = vor.u32 %v3037_v62, %v3033_v61  ;;  %v3041_v5 = vshll.u32 %v2975_v58, 16  ;;  %v1780_v62 = vld [vmem:[#allocation2 + $0xa0] sm:$0xf] }
 0x102   : > { %1393 = vst.msk [vmem:[#allocation3 + $0x78] sm:$0xf] %vm1382_vm14, %v1307_v0  ;;  %v1625_v0 = vsel %vm6329_vm13, %v1623_v4, %v1624_v6 }
 0x103   : > { %v1327_v53 = vpop.permute.xlu2 %1326  ;;  %v3043_v49 = vrot.slane %v3041_v5, 5 }
 0x104   : > { %1403 = vst.msk [vmem:[#allocation3 + $0xf0] sm:$0xf] %vm1382_vm14, %v1327_v53  ;;  %v1317_v8 = vpop.permute.xlu0 %1316 }
 0x105   : > { %1660 = vrot.lane.b32.xlu1 %v1576_v18, %s5554_s18  ;;  %1398 = vst.msk [vmem:[#allocation3 + $0xb4] sm:$0xf] %vm1382_vm14, %v1317_v8  ;;  %v1459_v18 = vld [vmem:[#allocation2 + $0xb0] sm:$0x1]  ;;  %v1757_v8 = vld [vmem:[#allocation2 + $0x18] sm:$0xf] }
 0x106   : > { %1662 = vrot.lane.b32.xlu2 %v1580_v14, %s5554_s18  ;;  %1670 = vrot.lane.b32.xlu0 %v1594_v13, %s5554_s18  ;;  %v1616_v14 = vrot.slane %v1614_v33, 4  ;;  %v1617_v13 = vrot.slane %v1459_v18, 5  ;;  %v2447_v33 = vld [vmem:[#allocation2 + $0x18] sm:$0xe]  ;;  %v2977_v18 = vld [vmem:[#allocation2 + $0x28] sm:$0xf] }
 0x108   : > { %v1618_v53 = vsel %vm6329_vm13, %v1616_v14, %v1617_v13 }
 0x109   : > { %v1313_v43 = vpop.permute.xlu1 %1312 }
 0x10a   : > { %1396 = vst.msk [vmem:[#allocation3 + $0x9c] sm:$0xf] %vm1382_vm14, %v1313_v43  ;;  %v1755_v43 = vld [vmem:[#allocation2 + $0xc] sm:$0xf] }
 0x10c   : > { %v1323_v60 = vpop.permute.xlu0 %1322 }
 0x10d   : > { %1666 = vrot.lane.b32.xlu1 %v1587_v52, %s5554_s18  ;;  %v1333_v42 = vpop.permute.xlu2 %1332  ;;  %1401 = vst.msk [vmem:[#allocation3 + $0xd8] sm:$0xf] %vm1382_vm14, %v1323_v60  ;;  %v2543_v52 = vsel %vm6329_vm13, %v4850_v30, %v2542_v32  ;;  %v1759_v60 = vld [vmem:[#allocation2 + $0x24] sm:$0xf] }
 0x10e   : > { %1668 = vrot.lane.b32.xlu2 %v1590_v19, %s5554_s18  ;;  %1676 = vrot.lane.b32.xlu0 %v1604_v48, %s5554_s18  ;;  %1406 = vst.msk [vmem:[#allocation3 + $0x114] sm:$0xf] %vm1382_vm14, %v1333_v42  ;;  %v3022_v42 = vshrl.u32 %v2973_v39, 16  ;;  %v1779_v39 = vld [vmem:[#allocation2 + $0x9c] sm:$0xf] }
 0x110   : > { %v3024_v50 = vrot.slane %v3022_v42, 4 }
 0x111   : > { %v1319_v45 = vpop.permute.xlu1 %1318 }
 0x112   : > { %1399 = vst.msk [vmem:[#allocation3 + $0xc0] sm:$0xf] %vm1382_vm14, %v1319_v45  ;;  %v2545_v45 = vrot.slane %v2446_v36, 5 }
 0x115   : > { %1672 = vrot.lane.b32.xlu1 %v1597_v38, %s5554_s18  ;;  %v1329_v54 = vpop.permute.xlu0 %1328  ;;  %v3027_v38 = vrot.slane %v3025_v46, 5 }
 0x116   : > { %1674 = vrot.lane.b32.xlu2 %v1601_v37, %s5554_s18  ;;  %1682 = vrot.lane.b32.xlu0 %v1615_v51, %s5554_s18  ;;  %v1339_v3 = vpop.permute.xlu2 %1338  ;;  %1404 = vst.msk [vmem:[#allocation3 + $0xfc] sm:$0xf] %vm1382_vm14, %v1329_v54  ;;  %v4851_v37 = vrot.slane %v2447_v33, 9  ;;  %v2549_v51 = vrot.slane %v2448_v12, 5  ;;  %v2546_v54 = vsel %vm6329_vm13, %v2544_v11, %v2545_v45 }
 0x117   : > { %1409 = vst.msk [vmem:[#allocation3 + $0x138] sm:$0xf] %vm1382_vm14, %v1339_v3  ;;  %v3028_v15 = vor.u32 %v3027_v38, %v3024_v50  ;;  %v2781_v3 = vld [vmem:[#allocation2 + $0x18] sm:$0xf] }
 0x118   : > { %v2550_v40 = vsel %vm6329_vm13, %v4851_v37, %v2549_v51  ;;  %v2979_v37 = vld [vmem:[#allocation2 + $0x30] sm:$0xf] }
 0x119   : > { %v1325_v17 = vpop.permute.xlu1 %1324  ;;  %v3029_v4 = vrot.slane %v3028_v15, 4  ;;  %v3070_v58 = vshrl.u32 %v2979_v37, 16 }
 0x11a   : > { %1402 = vst.msk [vmem:[#allocation3 + $0xe4] sm:$0xf] %vm1382_vm14, %v1325_v17  ;;  %v3039_v17 = vrot.slane %v3038_v22, 4 }
 0x11b   : > { %v3034_v1 = vsel %vm5697_vm3, %v3029_v4, %v3033_v61 }
 0x11c   : > { %v3044_v21 = vsel %vm5697_vm3, %v3039_v17, %v3043_v49  ;;  %v3072_v17 = vrot.slane %v3070_v58, 4 }
 0x11d   : > { %1678 = vrot.lane.b32.xlu1 %v1608_v44, %s5554_s18  ;;  %v2976_v44 = vld [vmem:[#allocation2 + $0x24] sm:$0xf] }
 0x11e   : > { %1680 = vrot.lane.b32.xlu2 %v1611_v9, %s5554_s18  ;;  %1688 = vrot.lane.b32.xlu0 %v1625_v0, %s5554_s18  ;;  %v3046_v14 = vshrl.u32 %v2976_v44, 16  ;;  %v3049_v13 = vshll.u32 %v2976_v44, 16 }
 0x120   : > { %v1335_v25 = vpop.permute.xlu0 %1334  ;;  %v3048_v27 = vrot.slane %v3046_v14, 4  ;;  %v3051_v28 = vrot.slane %v3049_v13, 5  ;;  %v3535_v14 = vld [vmem:[#allocation2 + $0x20] sm:$0x1] }
 0x121   : > { %1407 = vst.msk [vmem:[#allocation3 + $0x120] sm:$0xf] %vm1382_vm14, %v1335_v25  ;;  %v2449_v25 = vld [vmem:[#allocation2 + $0x20] sm:$0x1] }
 0x122   : > { %v2552_v26 = vrot.slane %v2449_v25, 5 }
 0x125   : > { %1684 = vrot.lane.b32.xlu1 %v1618_v53, %s5554_s18  ;;  %v3055_v53 = vshll.u32 %v2977_v18, 16 }
 0x126   : > { %1686 = vrot.lane.b32.xlu2 %v1622_v24, %s5554_s18  ;;  %1823 = vrot.lane.b32.xlu0 %v1757_v8, %s5555_s22  ;;  %v3059_v24 = vshrl.u32 %v2977_v18, 16  ;;  %v2551_v8 = vrot.slane %v2549_v51, 4  ;;  %v2981_v18 = vld [vmem:[#allocation2 + $0x38] sm:$0x1] }
 0x127   : > { %v1331_v29 = vpop.permute.xlu1 %1330  ;;  %v3057_v32 = vrot.slane %v3055_v53, 5  ;;  %v3634_v53 = vrot.slane %v3535_v14, 5 }
 0x128   : > { %v1345_v34 = vpop.permute.xlu2 %1344  ;;  %1405 = vst.msk [vmem:[#allocation3 + $0x108] sm:$0xf] %vm1382_vm14, %v1331_v29  ;;  %v3061_v29 = vrot.slane %v3059_v24, 4 }
 0x129   : > { %1412 = vst.msk [vmem:[#allocation3 + $0x15c] sm:$0xf] %vm1382_vm14, %v1345_v34 }
 0x12b   : > { %v1341_v19 = vpop.permute.xlu0 %1340 }
 0x12c   : > { %1410 = vst.msk [vmem:[#allocation3 + $0x144] sm:$0xf] %vm1382_vm14, %v1341_v19  ;;  %v3052_v19 = vor.u32 %v3051_v28, %v3048_v27  ;;  %v5230_v28 = vld [vmem:[#allocation6 + $0x88] sm:$0xff] }
 0x12d   : > { %1819 = vrot.lane.b32.xlu1 %v1755_v43, %s5555_s22  ;;  %4490 = vmatpush.bf16.msra.mxu2 %v5230_v28 }
 0x12e   : > { %1821 = vrot.lane.b32.xlu2 %v1756_v7, %s5555_s22  ;;  %2652 = vrot.lane.b32.xlu0 %v2543_v52, %s5553_s17  ;;  %v2978_v7 = vld [vmem:[#allocation2 + $0x2c] sm:$0x1]  ;;  %v2553_v52 = vsel %vm6329_vm13, %v2551_v8, %v2552_v26  ;;  %v3053_v42 = vrot.slane %v3052_v19, 4  ;;  %v1781_v26 = vld [vmem:[#allocation2 + $0xa8] sm:$0xf] }
 0x12f   : > { %v1337_v48 = vpop.permute.xlu1 %1336  ;;  %v3065_v55 = vshll.u32 %v2978_v7, 16 }
 0x130   : > { %v1627_v41 = vpop.permute.xlu2 %1626  ;;  %1408 = vst.msk [vmem:[#allocation3 + $0x12c] sm:$0xf] %vm1382_vm14, %v1337_v48  ;;  %v2783_v48 = vld [vmem:[#allocation2 + $0x24] sm:$0xf]  ;;  %v3058_v11 = vsel %vm5697_vm3, %v3053_v42, %v3057_v32 }
 0x131   : > { %1723 = vst.msk [vmem:[#allocation3] sm:$0xf] %vm1722_vm15, %v1627_v41  ;;  %v3062_v41 = vor.u32 %v3061_v29, %v3057_v32  ;;  %v3067_v36 = vrot.slane %v3065_v55, 5  ;;  %v2785_v29 = vld [vmem:[#allocation2 + $0x30] sm:$0xf] }
 0x135   : > { %1825 = vrot.lane.b32.xlu1 %v1758_v35, %s5555_s22  ;;  %v2450_v35 = vld [vmem:[#allocation2 + $0x24] sm:$0xe] }
 0x136   : > { %1827 = vrot.lane.b32.xlu2 %v1759_v60, %s5555_s22  ;;  %2847 = vrot.lane.b32.xlu0 %v2782_v20, %s5554_s18  ;;  %v2451_v60 = vld [vmem:[#allocation2 + $0x28] sm:$0xf]  ;;  %v3063_v20 = vrot.slane %v3062_v41, 4  ;;  %v4852_v57 = vrot.slane %v2450_v35, 9  ;;  %v5229_v35 = vld [vmem:[#allocation6 + $0x80] sm:$0xff] }
 0x137   : > { %v2556_v56 = vrot.slane %v2451_v60, 5  ;;  %4491 = vmatpush.bf16.msra.mxu2 %v5229_v35 }
 0x138   : > { %v1633_v23 = vpop.permute.xlu2 %1632  ;;  %v1347_v31 = vpop.permute.xlu0 %1346  ;;  %v3068_v45 = vsel %vm5697_vm3, %v3063_v20, %v3067_v36  ;;  %v1762_v36 = vld [vmem:[#allocation2 + $0x34] sm:$0xf] }
 0x139   : > { %1726 = vst.msk [vmem:[#allocation3 + $0x24] sm:$0xf] %vm1722_vm15, %v1633_v23  ;;  %v2557_v50 = vsel %vm6329_vm13, %v4852_v57, %v2556_v56  ;;  %v2452_v23 = vld [vmem:[#allocation2 + $0x2c] sm:$0x1]  ;;  %v2558_v22 = vrot.slane %v2556_v56, 4 }
 0x13a   : > { %1413 = vst.msk [vmem:[#allocation3 + $0x168] sm:$0xf] %vm1382_vm14, %v1347_v31  ;;  %v2980_v31 = vld [vmem:[#allocation2 + $0x34] sm:$0xf]  ;;  %v2559_v5 = vrot.slane %v2452_v23, 5 }
 0x13b   : > { %v3083_v15 = vshrl.u32 %v2980_v31, 16  ;;  %v3079_v4 = vshll.u32 %v2980_v31, 16  ;;  %v3536_v31 = vld [vmem:[#allocation2 + $0x24] sm:$0xe] }
 0x13c   : > { %v2560_v8 = vsel %vm6329_vm13, %v2558_v22, %v2559_v5  ;;  %v3538_v22 = vld [vmem:[#allocation2 + $0x2c] sm:$0x1] }
 0x13d   : > { %2654 = vrot.lane.b32.xlu1 %v2546_v54, %s5553_s17  ;;  %v3073_v54 = vshll.u32 %v2979_v37, 16  ;;  %v3085_v44 = vrot.slane %v3083_v15, 4  ;;  %v3081_v24 = vrot.slane %v3079_v4, 5  ;;  %v2982_v37 = vld [vmem:[#allocation2 + $0x3c] sm:$0xf] }
 0x13e   : > { %2845 = vrot.lane.b32.xlu2 %v2781_v3, %s5554_s18  ;;  %2656 = vrot.lane.b32.xlu0 %v2550_v40, %s5553_s17  ;;  %v1760_v3 = vld [vmem:[#allocation2 + $0x28] sm:$0xf]  ;;  %v2786_v40 = vld [vmem:[#allocation2 + $0x34] sm:$0xf] }
 0x13f   : > { %v1343_v6 = vpop.permute.xlu1 %1342  ;;  %v3075_v49 = vrot.slane %v3073_v54, 5 }
 0x140   : > { %1411 = vst.msk [vmem:[#allocation3 + $0x150] sm:$0xf] %vm1382_vm14, %v1343_v6  ;;  %v1639_v9 = vpop.permute.xlu2 %1638  ;;  %v1629_v0 = vpop.permute.xlu0 %1628  ;;  %v3534_v6 = vld [vmem:[#allocation2 + $0x1c] sm:$0xf] }
 0x141   : > { %1729 = vst.msk [vmem:[#allocation3 + $0x48] sm:$0xf] %vm1722_vm15, %v1639_v9  ;;  %v3631_v9 = vrot.slane %v3534_v6, 5  ;;  %v3076_v27 = vor.u32 %v3075_v49, %v3072_v17  ;;  %v2787_v6 = vld [vmem:[#allocation2 + $0x3c] sm:$0xf]  ;;  %v3094_v49 = vshrl.u32 %v2982_v37, 16 }
 0x142   : > { %1724 = vst.msk [vmem:[#allocation3 + $0xc] sm:$0xf] %vm1722_vm15, %v1629_v0  ;;  %v2454_v17 = vld [vmem:[#allocation2 + $0x34] sm:$0xf] }
 0x143   : > { %v3633_v25 = vrot.slane %v3631_v9, 4  ;;  %v3077_v7 = vrot.slane %v3076_v27, 4  ;;  %v2563_v27 = vrot.slane %v2454_v17, 5  ;;  %v3096_v28 = vrot.slane %v3094_v49, 4 }
 0x145   : > { %3405 = vrot.lane.b32.xlu1 %v3034_v1, %s5555_s22  ;;  %v3533_v1 = vld [vmem:[#allocation2 + $0x18] sm:$0xe]  ;;  %v3635_v32 = vsel %vm6329_vm13, %v3633_v25, %v3634_v53  ;;  %v3082_v60 = vsel %vm5697_vm3, %v3077_v7, %v3081_v24  ;;  %v3641_v25 = vrot.slane %v3538_v22, 5  ;;  %v1763_v22 = vld [vmem:[#allocation2 + $0x3c] sm:$0xf] }
 0x146   : > { %3407 = vrot.lane.b32.xlu2 %v3044_v21, %s5555_s22  ;;  %2851 = vrot.lane.b32.xlu0 %v2784_v2, %s5554_s18  ;;  %v4866_v2 = vrot.slane %v3533_v1, 9  ;;  %3774 = vst.msk [vmem:[#allocation3 + $0x14] sm:$0xf] %vm226_vm0, %v3635_v32 }
 0x147   : > { %v1349_v30 = vpop.permute.xlu1 %1348 }
 0x148   : > { %1414 = vst.msk [vmem:[#allocation3 + $0x174] sm:$0xf] %vm1382_vm14, %v1349_v30  ;;  %v1645_v34 = vpop.permute.xlu2 %1644  ;;  %v1635_v43 = vpop.permute.xlu0 %1634  ;;  %v3632_v30 = vsel %vm6329_vm13, %v4866_v2, %v3631_v9  ;;  %v5218_v9 = vld [vmem:[#allocation6 + $0x28] sm:$0xff] }
 0x149   : > { %1732 = vst.msk [vmem:[#allocation3 + $0x6c] sm:$0xf] %vm1722_vm15, %v1645_v34  ;;  %v3086_v34 = vor.u32 %v3085_v44, %v3081_v24  ;;  %v4867_v44 = vrot.slane %v3536_v31, 9 }
 0x14a   : > { %1727 = vst.msk [vmem:[#allocation3 + $0x30] sm:$0xf] %vm1722_vm15, %v1635_v43  ;;  %v3089_v43 = vshll.u32 %v2981_v18, 16 }
 0x14b   : > { %3773 = vst.msk [vmem:[#allocation3 + $0x8] sm:$0xf] %vm226_vm0, %v3632_v30  ;;  %v3087_v19 = vrot.slane %v3086_v34, 4 }
 0x14d   : > { %2658 = vrot.lane.b32.xlu1 %v2553_v52, %s5553_s17 }
 0x14e   : > { %2849 = vrot.lane.b32.xlu2 %v2783_v48, %s5554_s18  ;;  %1867 = vrot.lane.b32.xlu0 %v1779_v39, %s5555_s22  ;;  %v3091_v48 = vrot.slane %v3089_v43, 5  ;;  %v2983_v39 = vld [vmem:[#allocation2 + $0x40] sm:$0xf] }
 0x14f   : > { %v1631_v46 = vpop.permute.xlu1 %1630  ;;  %v3103_v42 = vshll.u32 %v2983_v39, 16  ;;  %v3107_v56 = vshrl.u32 %v2983_v39, 16 }
 0x150   : > { %1725 = vst.msk [vmem:[#allocation3 + $0x18] sm:$0xf] %vm1722_vm15, %v1631_v46  ;;  %v1651_v33 = vpop.permute.xlu2 %1650  ;;  %v1641_v12 = vpop.permute.xlu0 %1640  ;;  %v5220_v46 = vld [vmem:[#allocation6 + $0x38] sm:$0xff]  ;;  %v3092_v57 = vsel %vm5697_vm3, %v3087_v19, %v3091_v48  ;;  %v2565_v48 = vrot.slane %v2563_v27, 4 }
 0x151   : > { %1735 = vst.msk [vmem:[#allocation3 + $0x90] sm:$0xf] %vm1722_vm15, %v1651_v33  ;;  %v5167_v33 = vld [vmem:[#allocation3 + $0x10] sm:$0xf0]  ;;  %4306 = vmatpush.bf16.msra.mxu0 %v5220_v46  ;;  %5326 = vmatpush.bf16.msra.mxu3 %v5220_v46  ;;  %v3109_v23 = vrot.slane %v3107_v56, 4 }
 0x152   : > { %1730 = vst.msk [vmem:[#allocation3 + $0x54] sm:$0xf] %vm1722_vm15, %v1641_v12  ;;  %v4892_v20 = vld [vmem:[#allocation3 + $0x8] sm:$0xf] }
 0x153   : > { %v4893_v12 = vor.u32 %v5167_v33, %v4892_v20 }
 0x155   : > { %3409 = vrot.lane.b32.xlu1 %v3058_v11, %s5555_s22  ;;  %v312_v11 = vld [vmem:[%s5659_s20 + $0xf0] sm:$0xff]  ;;  %5146 = vmatmul.msk.bf16.vlgmr.msra.gmra.mxu2 %vm4257_vm1, %v4893_v12  ;;  %v6621_v12 = vld [vmem:[#allocation2 + $0x40] sm:$0xf] }
 0x156   : > { %3411 = vrot.lane.b32.xlu2 %v3068_v45, %s5555_s22  ;;  %2660 = vrot.lane.b32.xlu0 %v2557_v50, %s5553_s17  ;;  %v313_v45 = vld [vmem:[%s5659_s20 + $0xf8] sm:$0xff]  ;;  %v6584_v50 = vrot.slane %v3103_v42, 5  ;;  %v6588_v5 = vpack.c.bf16 %v312_v11, %v312_v11 }
 0x157   : > { %v1637_v38 = vpop.permute.xlu1 %1636  ;;  %v345_v4 = vpack.c.bf16 %v313_v45, %v313_v45  ;;  %v5216_v42 = vld [vmem:[#allocation6 + $0x18] sm:$0xff]  ;;  %v2985_v45 = vld [vmem:[#allocation2 + $0x48] sm:$0xf] }
 0x158   : > { %1728 = vst.msk [vmem:[#allocation3 + $0x3c] sm:$0xf] %vm1722_vm15, %v1637_v38  ;;  %v1657_v51 = vpop.permute.xlu2 %1656  ;;  %v1647_v61 = vpop.permute.xlu0 %1646  ;;  %v5219_v38 = vld [vmem:[#allocation6 + $0x30] sm:$0xff]  ;;  %v3110_v1 = vor.u32 %v3109_v23, %v6584_v50  ;;  %v605_v53 = vshrl.u32 %v6588_v5, 16  ;;  %v3540_v23 = vld [vmem:[#allocation2 + $0x34] sm:$0xf] }
 0x159   : > { %1738 = vst.msk [vmem:[#allocation3 + $0xb4] sm:$0xf] %vm1722_vm15, %v1657_v51  ;;  %v3537_v51 = vld [vmem:[#allocation2 + $0x28] sm:$0xf]  ;;  %4307 = vmatpush.bf16.msra.mxu0 %v5219_v38  ;;  %5327 = vmatpush.bf16.msra.mxu3 %v5219_v38  ;;  %v613_v24 = vshrl.u32 %v345_v4, 16 }
 0x15a   : > { %1733 = vst.msk [vmem:[#allocation3 + $0x78] sm:$0xf] %vm1722_vm15, %v1647_v61  ;;  %v3638_v58 = vrot.slane %v3537_v51, 5  ;;  %v6603_v34 = vrot.slane %v605_v53, 7 }
 0x15b   : > { %v6605_v43 = vrot.slane %v613_v24, 7 }
 0x15c   : > { %v3640_v18 = vrot.slane %v3638_v58, 4  ;;  %v3639_v2 = vsel %vm6329_vm13, %v4867_v44, %v3638_v58  ;;  %v611_v35 = vrot.slane %v6603_v34, 4  ;;  %v3121_v44 = vshll.u32 %v2985_v45, 16 }
 0x15d   : > { %1869 = vrot.lane.b32.xlu1 %v1780_v62, %s5555_s22  ;;  %v2984_v62 = vld [vmem:[#allocation2 + $0x44] sm:$0x1]  ;;  %4308 = vmatpush.bf16.msra.mxu0 %v5218_v9  ;;  %3775 = vst.msk [vmem:[#allocation3 + $0x20] sm:$0xf] %vm226_vm0, %v3639_v2 }
 0x15e   : > { %1829 = vrot.lane.b32.xlu2 %v1760_v3, %s5555_s22  ;;  %2855 = vrot.lane.b32.xlu0 %v2786_v40, %s5554_s18  ;;  %v1782_v3 = vld [vmem:[#allocation2 + $0xac] sm:$0xf]  ;;  %v2453_v40 = vld [vmem:[#allocation2 + $0x30] sm:$0xe]  ;;  %v3113_v14 = vshll.u32 %v2984_v62, 16  ;;  %v3642_v30 = vsel %vm6329_vm13, %v3640_v18, %v3641_v25  ;;  %v3645_v18 = vrot.slane %v3540_v23, 5 }
 0x15f   : > { %v1643_v0 = vpop.permute.xlu1 %1642  ;;  %5328 = vmatpush.bf16.msra.mxu3 %v5218_v9  ;;  %3776 = vst.msk [vmem:[#allocation3 + $0x2c] sm:$0xf] %vm226_vm0, %v3642_v30  ;;  %v3539_v62 = vld [vmem:[#allocation2 + $0x30] sm:$0xe]  ;;  %v5214_v9 = vld [vmem:[#allocation6 + $0x8] sm:$0xff] }
 0x160   : > { %1731 = vst.msk [vmem:[#allocation3 + $0x60] sm:$0xf] %vm1722_vm15, %v1643_v0  ;;  %v1663_v13 = vpop.permute.xlu2 %1662  ;;  %v1653_v21 = vpop.permute.xlu0 %1652  ;;  %v3097_v0 = vshll.u32 %v2982_v37, 16  ;;  %v3115_v19 = vrot.slane %v3113_v14, 5  ;;  %v5215_v37 = vld [vmem:[#allocation6 + $0x10] sm:$0xff]  ;;  %v4868_v2 = vrot.slane %v3539_v62, 9 }
 0x161   : > { %1741 = vst.msk [vmem:[#allocation3 + $0xd8] sm:$0xf] %vm1722_vm15, %v1663_v13  ;;  %v1761_v13 = vld [vmem:[#allocation2 + $0x30] sm:$0xf]  ;;  %v3647_v30 = vrot.slane %v3645_v18, 4 }
 0x162   : > { %1736 = vst.msk [vmem:[#allocation3 + $0x9c] sm:$0xf] %vm1722_vm15, %v1653_v21  ;;  %v2455_v21 = vld [vmem:[#allocation2 + $0x38] sm:$0x1]  ;;  %v3099_v32 = vrot.slane %v3097_v0, 5  ;;  %v5228_v0 = vld [vmem:[#allocation6 + $0x78] sm:$0xff] }
 0x163   : > { %v2566_v39 = vrot.slane %v2455_v21, 5  ;;  %v3541_v21 = vld [vmem:[#allocation2 + $0x38] sm:$0x1]  ;;  %4395 = vmatpush.bf16.msra.mxu1 %v5228_v0 }
 0x164   : > { %v3100_v20 = vor.u32 %v3099_v32, %v3096_v28  ;;  %v4904_v33 = vld [vmem:[#allocation3 + $0x20] sm:$0xf]  ;;  %v5227_v28 = vld [vmem:[#allocation6 + $0x70] sm:$0xff]  ;;  %v3648_v32 = vrot.slane %v3541_v21, 5 }
 0x165   : > { %2662 = vrot.lane.b32.xlu1 %v2560_v8, %s5553_s17  ;;  %v616_v8 = vshll.u32 %v345_v4, 16  ;;  %v2567_v56 = vsel %vm6329_vm13, %v2565_v48, %v2566_v39  ;;  %v3118_v4 = vshrl.u32 %v2985_v45, 16 }
 0x166   : > { %1871 = vrot.lane.b32.xlu0 %v1781_v26, %s5555_s22  ;;  %2853 = vrot.lane.b32.xlu2 %v2785_v29, %s5554_s18  ;;  %v4853_v26 = vrot.slane %v2453_v40, 9  ;;  %v5217_v29 = vld [vmem:[#allocation6 + $0x20] sm:$0xff]  ;;  %v5170_v11 = vld [vmem:[#allocation3 + $0x28] sm:$0xf0]  ;;  %v3101_v59 = vrot.slane %v3100_v20, 4 }
 0x167   : > { %v1649_v52 = vpop.permute.xlu1 %1648  ;;  %4309 = vmatpush.bf16.msra.mxu0 %v5217_v29  ;;  %5329 = vmatpush.bf16.msra.mxu3 %v5217_v29  ;;  %v4905_v38 = vor.u32 %v5170_v11, %v4904_v33  ;;  %v1949_v40 = vld [vmem:[#allocation2 + $0x10] sm:$0xf]  ;;  %v2456_v11 = vld [vmem:[#allocation2 + $0x3c] sm:$0xe] }
 0x168   : > { %1734 = vst.msk [vmem:[#allocation3 + $0x84] sm:$0xf] %vm1722_vm15, %v1649_v52  ;;  %v1669_v41 = vpop.permute.xlu2 %1668  ;;  %v1659_v55 = vpop.permute.xlu0 %1658  ;;  %v3111_v52 = vrot.slane %v3110_v1, 4  ;;  %v2564_v46 = vsel %vm6329_vm13, %v4853_v26, %v2563_v27  ;;  %v3106_v49 = vsel %vm5697_vm3, %v3101_v59, %v6584_v50  ;;  %v2010_v24 = vshrl.u32 %v1949_v40, 16  ;;  %v6644_v26 = vld [vmem:[#allocation2 + $0x4c] sm:$0xf]  ;;  %4396 = vmatpush.bf16.msra.mxu1 %v5227_v28 }
 0x169   : > { %1744 = vst.msk [vmem:[#allocation3 + $0xfc] sm:$0xf] %vm1722_vm15, %v1669_v41  ;;  %5147 = vmatmul.msk.bf16.gmra.mxu2 %vm4257_vm1, %v4905_v38  ;;  %v5213_v27 = vld [vmem:[#allocation6] sm:$0xff]  ;;  %v3127_v20 = vshll.u32 %v6644_v26, 16  ;;  %v1950_v59 = vld [vmem:[#allocation2 + $0x14] sm:$0x1] }
 0x16a   : > { %1739 = vst.msk [vmem:[#allocation3 + $0xc0] sm:$0xf] %vm1722_vm15, %v1659_v55 }
 0x16b   : > { %4310 = vmatpush.bf16.msra.mxu0 %v5216_v42  ;;  %5330 = vmatpush.bf16.msra.mxu3 %v5216_v42  ;;  %v2012_v42 = vrot.slane %v2010_v24, 4 }
 0x16d   : > { %3413 = vrot.lane.b32.xlu1 %v3082_v60, %s5555_s22  ;;  %v618_v60 = vor.u32 %v616_v8, %v6605_v43  ;;  %v3646_v8 = vsel %vm6329_vm13, %v4868_v2, %v3645_v18 }
 0x16e   : > { %1833 = vrot.lane.b32.xlu0 %v1762_v36, %s5555_s22  ;;  %3415 = vrot.lane.b32.xlu2 %v3092_v57, %s5555_s22  ;;  %v3116_v57 = vsel %vm5697_vm3, %v3111_v52, %v3115_v19  ;;  %v3123_v52 = vrot.slane %v3121_v44, 5  ;;  %3777 = vst.msk [vmem:[#allocation3 + $0x38] sm:$0xf] %vm226_vm0, %v3646_v8  ;;  %v5224_v8 = vld [vmem:[#allocation6 + $0x58] sm:$0xff] }
 0x16f   : > { %v1655_v61 = vpop.permute.xlu1 %1654  ;;  %v619_v36 = vsel %vm5810_vm9, %v611_v35, %v618_v60  ;;  %4311 = vmatpush.bf16.msra.mxu0 %v5215_v37  ;;  %5331 = vmatpush.bf16.msra.mxu3 %v5215_v37  ;;  %v3649_v60 = vsel %vm6329_vm13, %v3647_v30, %v3648_v32  ;;  %v780_v37 = vld [vmem:[#allocation2 + $0xc0] sm:$0xf] }
 0x170   : > { %1737 = vst.msk [vmem:[#allocation3 + $0xa8] sm:$0xf] %vm1722_vm15, %v1655_v61  ;;  %v1675_v54 = vpop.permute.xlu2 %1674  ;;  %v1665_v15 = vpop.permute.xlu0 %1664  ;;  %v2570_v61 = vrot.slane %v6621_v12, 5 }
 0x171   : > { %1747 = vst.msk [vmem:[#allocation3 + $0x120] sm:$0xf] %vm1722_vm15, %v1675_v54  ;;  %v2788_v54 = vld [vmem:[#allocation2 + $0x40] sm:$0xf] }
 0x172   : > { %1742 = vst.msk [vmem:[#allocation3 + $0xe4] sm:$0xf] %vm1722_vm15, %v1665_v15  ;;  %v6628_v15 = vld [vmem:[#allocation2 + $0x44] sm:$0x1]  ;;  %v2572_v25 = vrot.slane %v2570_v61, 4 }
 0x173   : > { %783 = vst.msk [vmem:[#allocation2 + $0xc4] sm:$0xf] %vm226_vm0, %v619_v36  ;;  %4312 = vmatpush.bf16.msra.mxu0 %v5214_v9  ;;  %v2573_v53 = vrot.slane %v6628_v15, 5  ;;  %5332 = vmatpush.bf16.msra.mxu3 %v5214_v9  ;;  %v1784_v36 = vld [vmem:[#allocation2 + $0xb8] sm:$0xf] }
 0x174   : > { %3778 = vst.msk [vmem:[#allocation3 + $0x44] sm:$0xf] %vm226_vm0, %v3649_v60 }
 0x175   : > { %1873 = vrot.lane.b32.xlu1 %v1782_v3, %s5555_s22  ;;  %v1948_v3 = vld [vmem:[#allocation2 + $0xc] sm:$0xf] }
 0x176   : > { %2857 = vrot.lane.b32.xlu0 %v2787_v6, %s5554_s18  ;;  %1831 = vrot.lane.b32.xlu2 %v1761_v13, %s5555_s22  ;;  %v1997_v6 = vshrl.u32 %v1948_v3, 16  ;;  %v2000_v17 = vshll.u32 %v1948_v3, 16  ;;  %v2006_v13 = vshll.u32 %v1949_v40, 16  ;;  %v4854_v3 = vrot.slane %v2456_v11, 9  ;;  %v3542_v40 = vld [vmem:[#allocation2 + $0x3c] sm:$0xe] }
 0x177   : > { %v1661_v7 = vpop.permute.xlu1 %1660  ;;  %4313 = vmatpush.bf16.msra.mxu0 %v5213_v27  ;;  %5333 = vmatpush.bf16.msra.mxu3 %v5213_v27  ;;  %v4869_v44 = vrot.slane %v3542_v40, 9  ;;  %v5222_v11 = vld [vmem:[#allocation6 + $0x48] sm:$0xff] }
 0x178   : > { %1740 = vst.msk [vmem:[#allocation3 + $0xcc] sm:$0xf] %vm1722_vm15, %v1661_v7  ;;  %v1681_v41 = vpop.permute.xlu2 %1680  ;;  %v1671_v55 = vpop.permute.xlu0 %1670  ;;  %v1999_v1 = vrot.slane %v1997_v6, 4  ;;  %v2002_v14 = vrot.slane %v2000_v17, 5  ;;  %v3120_v7 = vrot.slane %v3118_v4, 4  ;;  %v2008_v48 = vrot.slane %v2006_v13, 5 }
 0x179   : > { %1750 = vst.msk [vmem:[#allocation3 + $0x144] sm:$0xf] %vm1722_vm15, %v1681_v41  ;;  %v1764_v6 = vld [vmem:[#allocation2 + $0x40] sm:$0xf]  ;;  %v4916_v17 = vld [vmem:[#allocation3 + $0x38] sm:$0xf]  ;;  %v2571_v21 = vsel %vm6329_vm13, %v4854_v3, %v2570_v61 }
 0x17a   : > { %1745 = vst.msk [vmem:[#allocation3 + $0x108] sm:$0xf] %vm1722_vm15, %v1671_v55  ;;  %v2003_v50 = vor.u32 %v2002_v14, %v1999_v1  ;;  %v1783_v55 = vld [vmem:[#allocation2 + $0xb4] sm:$0xf]  ;;  %v3124_v33 = vor.u32 %v3123_v52, %v3120_v7  ;;  %v2013_v45 = vor.u32 %v2012_v42, %v2008_v48  ;;  %v1951_v1 = vld [vmem:[#allocation2 + $0x18] sm:$0xf] }
 0x17b   : > { %5334 = vmatpush.bf16.msrb.mxu3 %v5228_v0  ;;  %v3544_v0 = vld [vmem:[#allocation2 + $0x44] sm:$0x1]  ;;  %v1952_v14 = vld [vmem:[#allocation2 + $0x1c] sm:$0xf]  ;;  %v2987_v61 = vld [vmem:[#allocation2 + $0x50] sm:$0x1] }
 0x17c   : > { %v2004_v19 = vrot.slane %v2003_v50, 4  ;;  %v2014_v62 = vrot.slane %v2013_v45, 4  ;;  %v3125_v15 = vrot.slane %v3124_v33, 4  ;;  %v5173_v2 = vld [vmem:[#allocation3 + $0x40] sm:$0xf0]  ;;  %v2030_v24 = vshll.u32 %v1952_v14, 16 }
 0x17d   : > { %2664 = vrot.lane.b32.xlu1 %v2564_v46, %s5553_s17  ;;  %v608_v46 = vshll.u32 %v6588_v5, 16  ;;  %v2016_v5 = vshll.u32 %v1950_v59, 16  ;;  %v4917_v50 = vor.u32 %v5173_v2, %v4916_v17  ;;  %v3655_v27 = vrot.slane %v3544_v0, 5  ;;  %v1953_v59 = vld [vmem:[#allocation2 + $0x20] sm:$0x1] }
 0x17e   : > { %3419 = vrot.lane.b32.xlu0 %v3116_v57, %s5555_s22  ;;  %2666 = vrot.lane.b32.xlu2 %v2567_v56, %s5553_s17  ;;  %v2009_v35 = vsel %vm5697_vm3, %v2004_v19, %v2008_v48  ;;  %v5226_v57 = vld [vmem:[#allocation6 + $0x68] sm:$0xff]  ;;  %v2574_v56 = vsel %vm6329_vm13, %v2572_v25, %v2573_v53  ;;  %v2021_v25 = vshrl.u32 %v1951_v1, 16  ;;  %v2024_v53 = vshll.u32 %v1951_v1, 16  ;;  %v5223_v19 = vld [vmem:[#allocation6 + $0x50] sm:$0xff]  ;;  %v3547_v3 = vld [vmem:[#allocation2 + $0x50] sm:$0x1] }
 0x17f   : > { %v1667_v51 = vpop.permute.xlu1 %1666  ;;  %2412 = vst.msk [vmem:[#allocation3 + $0x4] sm:$0xf] %vm226_vm0, %v2009_v35  ;;  %v610_v38 = vor.u32 %v608_v46, %v6603_v34  ;;  %4397 = vmatpush.bf16.msra.mxu1 %v5226_v57  ;;  %v5225_v34 = vld [vmem:[#allocation6 + $0x60] sm:$0xff]  ;;  %5335 = vmatpush.bf16.msrb.mxu3 %v5227_v28  ;;  %v2034_v30 = vshrl.u32 %v1952_v14, 16  ;;  %v2032_v52 = vrot.slane %v2030_v24, 5  ;;  %v3137_v42 = vshll.u32 %v2987_v61, 16 }
 0x180   : > { %1743 = vst.msk [vmem:[#allocation3 + $0xf0] sm:$0xf] %vm1722_vm15, %v1667_v51  ;;  %v1687_v31 = vpop.permute.xlu2 %1686  ;;  %v1677_v58 = vpop.permute.xlu0 %1676  ;;  %v3131_v51 = vshrl.u32 %v6644_v26, 16  ;;  %v2023_v28 = vrot.slane %v2021_v25, 4  ;;  %v2026_v12 = vrot.slane %v2024_v53, 5  ;;  %5148 = vmatmul.msk.bf16.gmra.mxu2 %vm4257_vm1, %v4917_v50 }
 0x181   : > { %1753 = vst.msk [vmem:[#allocation3 + $0x168] sm:$0xf] %vm1722_vm15, %v1687_v31  ;;  %v781_v23 = vsel %vm5782_vm8, %v610_v38, %v780_v37  ;;  %v6666_v31 = vrot.slane %v3127_v20, 5  ;;  %v1786_v35 = vld [vmem:[#allocation2 + $0xc4] sm:$0xf]  ;;  %v2036_v20 = vrot.slane %v2034_v30, 4 }
 0x182   : > { %1748 = vst.msk [vmem:[#allocation3 + $0x12c] sm:$0xf] %vm1722_vm15, %v1677_v58  ;;  %v2018_v58 = vrot.slane %v2016_v5, 5  ;;  %v3133_v9 = vrot.slane %v3131_v51, 4  ;;  %v2027_v7 = vor.u32 %v2026_v12, %v2023_v28  ;;  %v2040_v38 = vshll.u32 %v1953_v59, 16 }
 0x183   : > { %782 = vst [vmem:[#allocation2 + $0xc0] sm:$0xf] %v781_v23  ;;  %4398 = vmatpush.bf16.msra.mxu1 %v5225_v34  ;;  %v3130_v13 = vsel %vm5697_vm3, %v3125_v15, %v6666_v31  ;;  %5336 = vmatpush.bf16.msrb.mxu3 %v5226_v57  ;;  %v6694_v57 = vld [vmem:[#allocation2 + $0x4c] sm:$0xf]  ;;  %v2037_v45 = vor.u32 %v2036_v20, %v2032_v52  ;;  %v3139_v51 = vrot.slane %v3137_v42, 5 }
 0x184   : > { %v3134_v60 = vor.u32 %v3133_v9, %v6666_v31  ;;  %v2028_v46 = vrot.slane %v2027_v7, 4  ;;  %v2577_v23 = vrot.slane %v6694_v57, 5  ;;  %v5221_v31 = vld [vmem:[#allocation6 + $0x40] sm:$0xff]  ;;  %v3546_v15 = vld [vmem:[#allocation2 + $0x4c] sm:$0xf] }
 0x185   : > { %2859 = vrot.lane.b32.xlu1 %v2788_v54, %s5554_s18  ;;  %v2038_v37 = vrot.slane %v2037_v45, 4  ;;  %v3659_v17 = vrot.slane %v3546_v15, 5  ;;  %v2988_v50 = vld [vmem:[#allocation2 + $0x54] sm:$0xf]  ;;  %v2989_v24 = vld [vmem:[#allocation2 + $0x58] sm:$0xf] }
 0x186   : > { %1835 = vrot.lane.b32.xlu0 %v1763_v22, %s5555_s22  ;;  %3417 = vrot.lane.b32.xlu2 %v3106_v49, %s5555_s22  ;;  %v3543_v22 = vld [vmem:[#allocation2 + $0x40] sm:$0xf]  ;;  %v2019_v49 = vsel %vm5697_vm3, %v2014_v62, %v2018_v58  ;;  %v2033_v33 = vsel %vm5697_vm3, %v2028_v46, %v2032_v52  ;;  %v3135_v5 = vrot.slane %v3134_v60, 4  ;;  %v1765_v28 = vld [vmem:[#allocation2 + $0x48] sm:$0xf]  ;;  %v2579_v46 = vrot.slane %v2577_v23, 4 }
 0x187   : > { %v1673_v29 = vpop.permute.xlu1 %1672  ;;  %v3652_v18 = vrot.slane %v3543_v22, 5  ;;  %2413 = vst.msk [vmem:[#allocation3 + $0x10] sm:$0xf] %vm226_vm0, %v2019_v49  ;;  %4399 = vmatpush.bf16.msra.mxu1 %v5224_v8  ;;  %5337 = vmatpush.bf16.msrb.mxu3 %v5225_v34  ;;  %v2042_v34 = vrot.slane %v2040_v38, 5  ;;  %v2461_v12 = vld [vmem:[#allocation2 + $0x50] sm:$0x1] }
 0x188   : > { %1746 = vst.msk [vmem:[#allocation3 + $0x114] sm:$0xf] %vm1722_vm15, %v1673_v29  ;;  %v1822_v39 = vpop.permute.xlu2 %1821  ;;  %v1683_v41 = vpop.permute.xlu0 %1682  ;;  %v3140_v9 = vsel %vm5697_vm3, %v3135_v5, %v3139_v51  ;;  %v1954_v30 = vld [vmem:[#allocation2 + $0x24] sm:$0xf]  ;;  %v1955_v61 = vld [vmem:[#allocation2 + $0x28] sm:$0xf] }
 0x189   : > { %1917 = vst.msk [vmem:[#allocation3 + $0xc] sm:$0xf] %vm1915_vm2, %v1822_v39  ;;  %v3653_v26 = vsel %vm6329_vm13, %v4869_v44, %v3652_v18  ;;  %v3654_v32 = vrot.slane %v3652_v18, 4  ;;  %v3662_v44 = vrot.slane %v3547_v3, 5  ;;  %v3661_v18 = vrot.slane %v3659_v17, 4 }
 0x18a   : > { %1751 = vst.msk [vmem:[#allocation3 + $0x150] sm:$0xf] %vm1722_vm15, %v1683_v41  ;;  %v2789_v41 = vld [vmem:[#allocation2 + $0x48] sm:$0xf]  ;;  %v1785_v14 = vld [vmem:[#allocation2 + $0xc0] sm:$0xf] }
 0x18b   : > { %3779 = vst.msk [vmem:[#allocation3 + $0x50] sm:$0xf] %vm226_vm0, %v3653_v26  ;;  %4400 = vmatpush.bf16.msra.mxu1 %v5223_v19  ;;  %5338 = vmatpush.bf16.msrb.mxu3 %v5224_v8  ;;  %v2048_v7 = vshll.u32 %v1954_v30, 16  ;;  %v6729_v52 = vld [vmem:[#allocation2 + $0xa0] sm:$0xf]  ;;  %v2054_v20 = vshll.u32 %v1955_v61, 16 }
 0x18c   : > { %2414 = vst.msk [vmem:[#allocation3 + $0x1c] sm:$0xf] %vm226_vm0, %v2033_v33  ;;  %v2626_v33 = vrot.slane %v6729_v52, 5 }
 0x18d   : > { %1875 = vrot.lane.b32.xlu1 %v1783_v55, %s5555_s22  ;;  %v3656_v55 = vsel %vm6329_vm13, %v3654_v32, %v3655_v27  ;;  %v2480_v32 = vld [vmem:[#allocation2 + $0x9c] sm:$0xe]  ;;  %v2050_v42 = vrot.slane %v2048_v7, 5 }
 0x18e   : > { %2670 = vrot.lane.b32.xlu0 %v2574_v56, %s5553_s17  ;;  %1877 = vrot.lane.b32.xlu2 %v1784_v36, %s5555_s22  ;;  %v2459_v36 = vld [vmem:[#allocation2 + $0x48] sm:$0xe]  ;;  %3780 = vst.msk [vmem:[#allocation3 + $0x5c] sm:$0xf] %vm226_vm0, %v3656_v55  ;;  %v2790_v56 = vld [vmem:[#allocation2 + $0x4c] sm:$0xf] }
 0x18f   : > { %v1679_v54 = vpop.permute.xlu1 %1678  ;;  %v4855_v62 = vrot.slane %v2459_v36, 9  ;;  %4401 = vmatpush.bf16.msra.mxu1 %v5222_v11  ;;  %5339 = vmatpush.bf16.msrb.mxu3 %v5223_v19  ;;  %v3142_v19 = vshrl.u32 %v2988_v50, 16  ;;  %v2792_v55 = vld [vmem:[#allocation2 + $0x58] sm:$0xf]  ;;  %v2580_v36 = vrot.slane %v2461_v12, 5 }
 0x190   : > { %1749 = vst.msk [vmem:[#allocation3 + $0x138] sm:$0xf] %vm1722_vm15, %v1679_v54  ;;  %v1828_v4 = vpop.permute.xlu2 %1827  ;;  %v1689_v47 = vpop.permute.xlu0 %1688  ;;  %v3545_v54 = vld [vmem:[#allocation2 + $0x48] sm:$0xe]  ;;  %v5166_v2 = vld [vmem:[#allocation3 + $0x8] sm:$0xf0] }
 0x191   : > { %1920 = vst.msk [vmem:[#allocation3 + $0x30] sm:$0xf] %vm1915_vm2, %v1828_v4  ;;  %v2578_v1 = vsel %vm6329_vm13, %v4855_v62, %v2577_v23  ;;  %v3144_v59 = vrot.slane %v3142_v19, 4  ;;  %v2058_v62 = vshrl.u32 %v1955_v61, 16  ;;  %v3010_v19 = vld [vmem:[#allocation2 + $0xac] sm:$0xf] }
 0x192   : > { %1754 = vst.msk [vmem:[#allocation3 + $0x174] sm:$0xf] %vm1722_vm15, %v1689_v47  ;;  %v4928_v4 = vld [vmem:[#allocation3 + $0x50] sm:$0xf]  ;;  %v2043_v47 = vsel %vm5697_vm3, %v2038_v37, %v2042_v34  ;;  %v3549_v37 = vld [vmem:[#allocation2 + $0x58] sm:$0xf] }
 0x193   : > { %4402 = vmatpush.bf16.msra.mxu1 %v5221_v31  ;;  %2415 = vst.msk [vmem:[#allocation3 + $0x28] sm:$0xf] %vm226_vm0, %v2043_v47  ;;  %5340 = vmatpush.bf16.msrb.mxu3 %v5222_v11  ;;  %v3666_v3 = vrot.slane %v3549_v37, 5  ;;  %v2991_v37 = vld [vmem:[#allocation2 + $0x60] sm:$0xf] }
 0x195   : > { %1837 = vrot.lane.b32.xlu1 %v1764_v6, %s5555_s22  ;;  %v4870_v6 = vrot.slane %v3545_v54, 9  ;;  %v5176_v49 = vld [vmem:[#allocation3 + $0x58] sm:$0xf0]  ;;  %v2056_v54 = vrot.slane %v2054_v20, 5  ;;  %v3323_v20 = vshrl.u32 %v3010_v19, 16 }
 0x196   : > { %3421 = vrot.lane.b32.xlu0 %v3130_v13, %s5555_s22  ;;  %2668 = vrot.lane.b32.xlu2 %v2571_v21, %s5553_s17  ;;  %v4929_v13 = vor.u32 %v5176_v49, %v4928_v4  ;;  %v3663_v21 = vsel %vm6329_vm13, %v3661_v18, %v3662_v44  ;;  %v3548_v4 = vld [vmem:[#allocation2 + $0x54] sm:$0xe] }
 0x197   : > { %v1685_v29 = vpop.permute.xlu1 %1684  ;;  %v3660_v0 = vsel %vm6329_vm13, %v4870_v6, %v3659_v17  ;;  %3782 = vst.msk [vmem:[#allocation3 + $0x74] sm:$0xf] %vm226_vm0, %v3663_v21  ;;  %5341 = vmatpush.bf16.msrb.mxu3 %v5221_v31  ;;  %v2990_v31 = vld [vmem:[#allocation2 + $0x5c] sm:$0x1]  ;;  %v2791_v17 = vld [vmem:[#allocation2 + $0x54] sm:$0xf] }
 0x198   : > { %1752 = vst.msk [vmem:[#allocation3 + $0x15c] sm:$0xf] %vm1722_vm15, %v1685_v29  ;;  %v2846_v48 = vpop.permute.xlu2 %2845  ;;  %v1824_v39 = vpop.permute.xlu0 %1823  ;;  %5149 = vmatmul.msk.bf16.gmra.mxu2 %vm4257_vm1, %v4929_v13  ;;  %v2045_v29 = vshrl.u32 %v1954_v30, 16  ;;  %v3550_v13 = vld [vmem:[#allocation2 + $0x5c] sm:$0x1]  ;;  %v4871_v21 = vrot.slane %v3548_v4, 9 }
 0x199   : > { %1918 = vst.msk [vmem:[#allocation3 + $0x18] sm:$0xf] %vm1915_vm2, %v1824_v39  ;;  %v3151_v39 = vshll.u32 %v2989_v24, 16  ;;  %v2464_v4 = vld [vmem:[#allocation2 + $0x5c] sm:$0x1] }
 0x19a   : > { %3781 = vst.msk [vmem:[#allocation3 + $0x68] sm:$0xf] %vm226_vm0, %v3660_v0  ;;  %v2047_v60 = vrot.slane %v2045_v29, 4 }
 0x19b   : > { %v6736_v38 = vrot.slane %v3151_v39, 5 }
 0x19c   : > { %v2051_v11 = vor.u32 %v2050_v42, %v2047_v60  ;;  %v2806_v60 = vld [vmem:[#allocation2 + $0xac] sm:$0xf]  ;;  %v2482_v42 = vld [vmem:[#allocation2 + $0xa4] sm:$0x1] }
 0x19d   : > { %2861 = vrot.lane.b32.xlu1 %v2789_v41, %s5554_s18  ;;  %v3155_v41 = vshrl.u32 %v2989_v24, 16 }
 0x19e   : > { %1881 = vrot.lane.b32.xlu0 %v1786_v35, %s5555_s22  ;;  %2863 = vrot.lane.b32.xlu2 %v2790_v56, %s5554_s18  ;;  %v1766_v35 = vld [vmem:[#allocation2 + $0x4c] sm:$0xf]  ;;  %v4862_v56 = vrot.slane %v2480_v32, 9  ;;  %v2052_v51 = vrot.slane %v2051_v11, 4 }
 0x19f   : > { %v1820_v58 = vpop.permute.xlu1 %1819  ;;  %v3157_v5 = vrot.slane %v3155_v41, 4  ;;  %v5179_v15 = vld [vmem:[#allocation3 + $0x70] sm:$0xf0] }
 0x1a0   : > { %1916 = vst.msk [vmem:[#allocation3] sm:$0xf] %vm1915_vm2, %v1820_v58  ;;  %v6705_v40 = vpop.permute.xlu2 %3407  ;;  %v2653_v22 = vpop.permute.xlu0 %2652  ;;  %v2627_v47 = vsel %vm6329_vm13, %v4862_v56, %v2626_v33  ;;  %v2057_v49 = vsel %vm5697_vm3, %v2052_v51, %v2056_v54  ;;  %v4896_v0 = vld [vmem:[#allocation3 + $0x18] sm:$0xf] }
 0x1a1   : > { %2748 = vst.msk [vmem:[#allocation3 + $0x4] sm:$0xf] %vm1382_vm14, %v2653_v22  ;;  %v4940_v23 = vld [vmem:[#allocation3 + $0x68] sm:$0xf]  ;;  %v2581_v22 = vsel %vm6329_vm13, %v2579_v46, %v2580_v36  ;;  %v3158_v44 = vor.u32 %v3157_v5, %v6736_v38  ;;  %v3319_v46 = vshll.u32 %v3010_v19, 16 }
 0x1a2   : > { %2941 = vst.msk [vmem:[#allocation3 + $0x4] sm:$0xf] %vm1722_vm15, %v2846_v48  ;;  %v3145_v48 = vshll.u32 %v2988_v50, 16  ;;  %v4941_v18 = vor.u32 %v5179_v15, %v4940_v23  ;;  %v6782_v5 = vld [vmem:[#allocation2 + $0x58] sm:$0xf]  ;;  %v3325_v23 = vrot.slane %v3323_v20, 4 }
 0x1a3   : > { %2416 = vst.msk [vmem:[#allocation3 + $0x34] sm:$0xf] %vm226_vm0, %v2057_v49  ;;  %v3159_v12 = vrot.slane %v3158_v44, 4  ;;  %v3169_v49 = vshll.u32 %v2991_v37, 16  ;;  %v1957_v19 = vld [vmem:[#allocation2 + $0x30] sm:$0xf] }
 0x1a4   : > { %v3147_v45 = vrot.slane %v3145_v48, 5 }
 0x1a5   : > { %3423 = vrot.lane.b32.xlu1 %v3140_v9, %s5555_s22  ;;  %v1956_v9 = vld [vmem:[#allocation2 + $0x2c] sm:$0x1] }
 0x1a6   : > { %2672 = vrot.lane.b32.xlu0 %v2578_v1, %s5553_s17  ;;  %1879 = vrot.lane.b32.xlu2 %v1785_v14, %s5555_s22  ;;  %v3148_v6 = vor.u32 %v3147_v45, %v3144_v59  ;;  %v3161_v1 = vshll.u32 %v2990_v31, 16  ;;  %v2060_v14 = vrot.slane %v2058_v62, 4  ;;  %v2628_v45 = vrot.slane %v2626_v33, 4  ;;  %v3552_v31 = vld [vmem:[#allocation2 + $0x64] sm:$0xf] }
 0x1a7   : > { %v1826_v25 = vpop.permute.xlu1 %1825  ;;  %v4884_v53 = vld [vmem:[#allocation3] sm:$0xf]  ;;  %v6784_v62 = vrot.slane %v3319_v46, 5  ;;  %v3011_v33 = vld [vmem:[#allocation2 + $0xb0] sm:$0x1] }
 0x1a8   : > { %1919 = vst.msk [vmem:[#allocation3 + $0x24] sm:$0xf] %vm1915_vm2, %v1826_v25  ;;  %v2850_v8 = vpop.permute.xlu2 %2849  ;;  %v2848_v26 = vpop.permute.xlu0 %2847  ;;  %v4885_v27 = vor.u32 %v5166_v2, %v4884_v53  ;;  %v3668_v2 = vrot.slane %v3666_v3, 4  ;;  %v3009_v53 = vld [vmem:[#allocation2 + $0xa8] sm:$0xf]  ;;  %v2061_v50 = vor.u32 %v2060_v14, %v2056_v54  ;;  %v3149_v24 = vrot.slane %v3148_v6, 4  ;;  %5150 = vmatmul.msk.bf16.gmra.mxu2 %vm4257_vm1, %v4941_v18 }
 0x1a9   : > { %v3163_v30 = vrot.slane %v3161_v1, 5  ;;  %v3310_v48 = vshrl.u32 %v3009_v53, 16  ;;  %v3313_v39 = vshll.u32 %v3009_v53, 16  ;;  %v3166_v6 = vshrl.u32 %v2991_v37, 16 }
 0x1aa   : > { %4314 = vmatmul.bf16.vlgmr.msra.gmra.mxu0 %v4885_v27  ;;  %v3667_v27 = vsel %vm6329_vm13, %v4871_v21, %v3666_v3  ;;  %v2062_v32 = vrot.slane %v2061_v50, 4  ;;  %v3326_v1 = vor.u32 %v3325_v23, %v6784_v62  ;;  %v3329_v14 = vshll.u32 %v3011_v33, 16  ;;  %v3551_v21 = vld [vmem:[#allocation2 + $0x60] sm:$0xe]  ;;  %v6798_v50 = vld [vmem:[#allocation2 + $0x64] sm:$0xf] }
 0x1ab   : > { %3783 = vst.msk [vmem:[#allocation3 + $0x80] sm:$0xf] %vm226_vm0, %v3667_v27  ;;  %v3164_v36 = vsel %vm5697_vm3, %v3159_v12, %v3163_v30  ;;  %v3312_v56 = vrot.slane %v3310_v48, 4  ;;  %v3315_v11 = vrot.slane %v3313_v39, 5  ;;  %v3171_v27 = vrot.slane %v3169_v49, 5 }
 0x1ac   : > { %v2462_v23 = vld [vmem:[#allocation2 + $0x54] sm:$0xe]  ;;  %v6827_v33 = vld [vmem:[#allocation2 + $0xac] sm:$0xf] }
 0x1ad   : > { %1839 = vrot.lane.b32.xlu1 %v1765_v28, %s5555_s22  ;;  %v3316_v15 = vor.u32 %v3315_v11, %v3312_v56 }
 0x1ae   : > { %2867 = vrot.lane.b32.xlu0 %v2792_v55, %s5554_s18  ;;  %1841 = vrot.lane.b32.xlu2 %v1766_v35, %s5555_s22  ;;  %v3154_v35 = vsel %vm5697_vm3, %v3149_v24, %v6736_v38  ;;  %v2629_v38 = vrot.slane %v2482_v42, 5  ;;  %v4872_v24 = vrot.slane %v3551_v21, 9  ;;  %v2072_v42 = vshll.u32 %v1957_v19, 16 }
 0x1af   : > { %v2655_v57 = vpop.permute.xlu1 %2654  ;;  %v5169_v25 = vld [vmem:[#allocation3 + $0x20] sm:$0xf0]  ;;  %v2633_v21 = vrot.slane %v6827_v33, 5 }
 0x1b0   : > { %2749 = vst.msk [vmem:[#allocation3 + $0x10] sm:$0xf] %vm1382_vm14, %v2655_v57  ;;  %v6740_v34 = vpop.permute.xlu2 %3411  ;;  %v2657_v58 = vpop.permute.xlu0 %2656  ;;  %v4897_v7 = vor.u32 %v5169_v25, %v4896_v0  ;;  %v2805_v0 = vld [vmem:[#allocation2 + $0xa8] sm:$0xf] }
 0x1b1   : > { %2942 = vst.msk [vmem:[#allocation3 + $0x10] sm:$0xf] %vm1722_vm15, %v2848_v26 }
 0x1b2   : > { %3502 = vst.msk [vmem:[#allocation3 + $0x10] sm:$0xf] %vm1915_vm2, %v6705_v40  ;;  %v2064_v40 = vshll.u32 %v1956_v9, 16  ;;  %v4952_v52 = vld [vmem:[#allocation3 + $0x80] sm:$0xf]  ;;  %v3673_v9 = vrot.slane %v3552_v31, 5 }
 0x1b3   : > { %2750 = vst.msk [vmem:[#allocation3 + $0x1c] sm:$0xf] %vm1382_vm14, %v2657_v58 }
 0x1b4   : > { %2943 = vst.msk [vmem:[#allocation3 + $0x1c] sm:$0xf] %vm1722_vm15, %v2850_v8  ;;  %v2066_v26 = vrot.slane %v2064_v40, 5  ;;  %v3669_v8 = vrot.slane %v3550_v13, 5  ;;  %v3317_v40 = vrot.slane %v3316_v15, 4  ;;  %v2587_v13 = vrot.slane %v2464_v4, 5 }
 0x1b5   : > { %2674 = vrot.lane.b32.xlu1 %v2581_v22, %s5553_s17  ;;  %v1767_v22 = vld [vmem:[#allocation2 + $0x54] sm:$0xf] }
 0x1b6   : > { %2700 = vrot.lane.b32.xlu0 %v2627_v47, %s5553_s17  ;;  %2865 = vrot.lane.b32.xlu2 %v2791_v17, %s5554_s18  ;;  %v3670_v41 = vsel %vm6329_vm13, %v3668_v2, %v3669_v8  ;;  %v2067_v55 = vsel %vm5697_vm3, %v2062_v32, %v2066_v26  ;;  %v2584_v47 = vrot.slane %v6782_v5, 5  ;;  %v2630_v17 = vsel %vm6329_vm13, %v2628_v45, %v2629_v38  ;;  %v3553_v2 = vld [vmem:[#allocation2 + $0x68] sm:$0x1]  ;;  %v1958_v8 = vld [vmem:[#allocation2 + $0x34] sm:$0xf] }
 0x1b7   : > { %v3406_v28 = vpop.permute.xlu1 %3405  ;;  %2417 = vst.msk [vmem:[#allocation3 + $0x40] sm:$0xf] %vm226_vm0, %v2067_v55  ;;  %v3168_v26 = vrot.slane %v3166_v6, 4  ;;  %v3676_v12 = vrot.slane %v3553_v2, 5  ;;  %v3327_v32 = vrot.slane %v3326_v1, 4  ;;  %v3322_v46 = vsel %vm5697_vm3, %v3317_v40, %v6784_v62 }
 0x1b8   : > { %3501 = vst.msk [vmem:[#allocation3 + $0x4] sm:$0xf] %vm1915_vm2, %v3406_v28  ;;  %v1830_v61 = vpop.permute.xlu2 %1829  ;;  %v2852_v29 = vpop.permute.xlu0 %2851  ;;  %v2586_v53 = vrot.slane %v2584_v47, 4  ;;  %v3675_v28 = vrot.slane %v3673_v9, 4  ;;  %v1959_v55 = vld [vmem:[#allocation2 + $0x38] sm:$0x1] }
 0x1b9   : > { %1921 = vst.msk [vmem:[#allocation3 + $0x3c] sm:$0xf] %vm1915_vm2, %v1830_v61  ;;  %v4886_v59 = vld [vmem:[#allocation3 + $0xc] sm:$0xf0]  ;;  %v3331_v61 = vrot.slane %v3329_v14, 5  ;;  %v3172_v11 = vor.u32 %v3171_v27, %v3168_v26  ;;  %v2088_v45 = vshll.u32 %v1959_v55, 16 }
 0x1ba   : > { %4319 = vmatmul.bf16.gmra.mxu0 %v4897_v7  ;;  %3784 = vst.msk [vmem:[#allocation3 + $0x8c] sm:$0xf] %vm226_vm0, %v3670_v41  ;;  %v2082_v7 = vshrl.u32 %v1958_v8, 16  ;;  %v3677_v56 = vsel %vm6329_vm13, %v3675_v28, %v3676_v12  ;;  %v2588_v37 = vsel %vm6329_vm13, %v2586_v53, %v2587_v13  ;;  %v2074_v62 = vrot.slane %v2072_v42, 5  ;;  %v1768_v1 = vld [vmem:[#allocation2 + $0x58] sm:$0xf] }
 0x1bb   : > { %v2090_v31 = vrot.slane %v2088_v45, 5  ;;  %3786 = vst.msk [vmem:[#allocation3 + $0xa4] sm:$0xf] %vm226_vm0, %v3677_v56  ;;  %v3179_v14 = vshrl.u32 %v6798_v50, 16  ;;  %v2485_v40 = vld [vmem:[#allocation2 + $0xb0] sm:$0x1] }
 0x1bc   : > { %v3556_v28 = vld [vmem:[#allocation2 + $0x74] sm:$0x1]  ;;  %v2793_v56 = vld [vmem:[#allocation2 + $0x60] sm:$0xf] }
 0x1bd   : > { %3425 = vrot.lane.b32.xlu1 %v3154_v35, %s5555_s22  ;;  %v3674_v35 = vsel %vm6329_vm13, %v4872_v24, %v3673_v9  ;;  %v3554_v9 = vld [vmem:[#allocation2 + $0x6c] sm:$0xe] }
 0x1be   : > { %2895 = vrot.lane.b32.xlu0 %v2806_v60, %s5554_s18  ;;  %3427 = vrot.lane.b32.xlu2 %v3164_v36, %s5555_s22  ;;  %v2069_v60 = vshrl.u32 %v1957_v19, 16  ;;  %v2084_v36 = vrot.slane %v2082_v7, 4  ;;  %3785 = vst.msk [vmem:[#allocation3 + $0x98] sm:$0xf] %vm226_vm0, %v3674_v35  ;;  %v4873_v26 = vrot.slane %v3554_v9, 9  ;;  %v3181_v7 = vrot.slane %v3179_v14, 4 }
 0x1bf   : > { %v2659_v57 = vpop.permute.xlu1 %2658  ;;  %v5165_v51 = vld [vmem:[#allocation3 + $0x4] sm:$0xf] }
 0x1c0   : > { %2751 = vst.msk [vmem:[#allocation3 + $0x28] sm:$0xf] %vm1382_vm14, %v2659_v57  ;;  %v1868_v58 = vpop.permute.xlu0 %1867  ;;  %v4889_v54 = vor.u32 %v5165_v51, %v4886_v59  ;;  %v2854_v3 = vpop.permute.xlu2 %2853  ;;  %v5172_v25 = vld [vmem:[#allocation3 + $0x38] sm:$0xf0]  ;;  %v3175_v59 = vshll.u32 %v6798_v50, 16  ;;  %v2071_v38 = vrot.slane %v2069_v60, 4  ;;  %v3332_v57 = vsel %vm5697_vm3, %v3327_v32, %v3331_v61 }
 0x1c1   : > { %2944 = vst.msk [vmem:[#allocation3 + $0x28] sm:$0xf] %vm1722_vm15, %v2852_v29  ;;  %v5182_v44 = vld [vmem:[#allocation3 + $0x88] sm:$0xf0]  ;;  %v2078_v29 = vshll.u32 %v1958_v8, 16  ;;  %v2635_v61 = vrot.slane %v2633_v21, 4 }
 0x1c2   : > { %3504 = vst.msk [vmem:[#allocation3 + $0x28] sm:$0xf] %vm1915_vm2, %v6740_v34  ;;  %4403 = vmatmul.bf16.vlgmr.msra.gmra.mxu1 %v4889_v54  ;;  %v4953_v18 = vor.u32 %v5182_v44, %v4952_v52  ;;  %v4908_v34 = vld [vmem:[#allocation3 + $0x30] sm:$0xf]  ;;  %v2075_v15 = vor.u32 %v2074_v62, %v2071_v38  ;;  %v6824_v52 = vrot.slane %v3175_v59, 5  ;;  %v5413_v62 = vld [vmem:[#allocation6 + $0x88] sm:$0xff] }
 0x1c3   : > { %1940 = vst.msk [vmem:[#allocation3 + $0x120] sm:$0xf] %vm1915_vm2, %v1868_v58  ;;  %v4909_v39 = vor.u32 %v5172_v25, %v4908_v34  ;;  %v2080_v20 = vrot.slane %v2078_v29, 5  ;;  %v3555_v25 = vld [vmem:[#allocation2 + $0x70] sm:$0xf]  ;;  %v2636_v29 = vrot.slane %v2485_v40, 5 }
 0x1c4   : > { %5151 = vmatmul.msk.bf16.gmra.mxu2 %vm4257_vm1, %v4953_v18  ;;  %v2076_v44 = vrot.slane %v2075_v15, 4  ;;  %v5185_v8 = vld [vmem:[#allocation3 + $0xa0] sm:$0xf0]  ;;  %v2993_v60 = vld [vmem:[#allocation2 + $0x68] sm:$0x1] }
 0x1c5   : > { %2702 = vrot.lane.b32.xlu1 %v2630_v17, %s5553_s17  ;;  %v2085_v51 = vor.u32 %v2084_v36, %v2080_v20  ;;  %v4856_v17 = vrot.slane %v2462_v23, 9  ;;  %v4964_v24 = vld [vmem:[#allocation3 + $0x98] sm:$0xf]  ;;  %v3185_v59 = vshll.u32 %v2993_v60, 16  ;;  %v1960_v15 = vld [vmem:[#allocation2 + $0x3c] sm:$0xf] }
 0x1c6   : > { %1843 = vrot.lane.b32.xlu0 %v1767_v22, %s5555_s22  ;;  %2893 = vrot.lane.b32.xlu2 %v2805_v0, %s5554_s18  ;;  %v3012_v22 = vld [vmem:[#allocation2 + $0xb4] sm:$0xf]  ;;  %v2081_v34 = vsel %vm5697_vm3, %v2076_v44, %v2080_v20  ;;  %v4965_v12 = vor.u32 %v5185_v8, %v4964_v24  ;;  %v3013_v20 = vld [vmem:[#allocation2 + $0xb8] sm:$0xf] }
 0x1c7   : > { %v3410_v30 = vpop.permute.xlu1 %3409  ;;  %v2086_v54 = vrot.slane %v2085_v51, 4  ;;  %v3334_v2 = vshrl.u32 %v3012_v22, 16  ;;  %v3337_v53 = vshll.u32 %v3012_v22, 16  ;;  %v2585_v27 = vsel %vm6329_vm13, %v4856_v17, %v2584_v47  ;;  %2418 = vst.msk [vmem:[#allocation3 + $0x4c] sm:$0xf] %vm226_vm0, %v2081_v34  ;;  %v5414_v17 = vld [vmem:[#allocation6 + $0x80] sm:$0xff] }
 0x1c8   : > { %3503 = vst.msk [vmem:[#allocation3 + $0x1c] sm:$0xf] %vm1915_vm2, %v3410_v30  ;;  %v2661_v48 = vpop.permute.xlu0 %2660  ;;  %v6804_v41 = vpop.permute.xlu2 %3415  ;;  %v3680_v30 = vrot.slane %v3555_v25, 5  ;;  %v2794_v51 = vld [vmem:[#allocation2 + $0x64] sm:$0xf] }
 0x1c9   : > { %2752 = vst.msk [vmem:[#allocation3 + $0x34] sm:$0xf] %vm1382_vm14, %v2661_v48  ;;  %v4898_v58 = vld [vmem:[#allocation3 + $0x24] sm:$0xf0]  ;;  %v2091_v49 = vsel %vm5697_vm3, %v2086_v54, %v2090_v31  ;;  %v3336_v19 = vrot.slane %v3334_v2, 4  ;;  %v3339_v5 = vrot.slane %v3337_v53, 5 }
 0x1ca   : > { %4324 = vmatmul.bf16.gmra.mxu0 %v4909_v39  ;;  %2945 = vst.msk [vmem:[#allocation3 + $0x34] sm:$0xf] %vm1722_vm15, %v2854_v3  ;;  %v3173_v3 = vrot.slane %v3172_v11, 4  ;;  %v5028_v32 = vld [vmem:[#allocation3 + $0x120] sm:$0xf]  ;;  %v3681_v47 = vsel %vm6329_vm13, %v4873_v26, %v3680_v30  ;;  %v3682_v48 = vrot.slane %v3680_v30, 4  ;;  %v3182_v11 = vor.u32 %v3181_v7, %v6824_v52 }
 0x1cb   : > { %2419 = vst.msk [vmem:[#allocation3 + $0x58] sm:$0xf] %vm226_vm0, %v2091_v49  ;;  %v3683_v39 = vrot.slane %v3556_v28, 5  ;;  %v3340_v45 = vor.u32 %v3339_v5, %v3336_v19  ;;  %v3187_v31 = vrot.slane %v3185_v59, 5  ;;  %v3347_v54 = vshrl.u32 %v3013_v20, 16 }
 0x1cc   : > { %v3178_v50 = vsel %vm5697_vm3, %v3173_v3, %v6824_v52  ;;  %3787 = vst.msk [vmem:[#allocation3 + $0xb0] sm:$0xf] %vm226_vm0, %v3681_v47  ;;  %v3183_v23 = vrot.slane %v3182_v11, 4  ;;  %v3557_v40 = vld [vmem:[#allocation2 + $0x78] sm:$0xe] }
 0x1cd   : > { %3453 = vrot.lane.b32.xlu1 %v3322_v46, %s5555_s22  ;;  %v3684_v38 = vsel %vm6329_vm13, %v3682_v48, %v3683_v39  ;;  %v3558_v53 = vld [vmem:[#allocation2 + $0x7c] sm:$0xf]  ;;  %v3349_v26 = vrot.slane %v3347_v54, 4  ;;  %v4874_v7 = vrot.slane %v3557_v40, 9  ;;  %v620_v39 = vrot.slane %v6605_v43, 4 }
 0x1ce   : > { %2678 = vrot.lane.b32.xlu0 %v2588_v37, %s5553_s17  ;;  %3455 = vrot.lane.b32.xlu2 %v3332_v57, %s5555_s22  ;;  %v2637_v37 = vsel %vm6329_vm13, %v2635_v61, %v2636_v29  ;;  %v3343_v57 = vshll.u32 %v3013_v20, 16  ;;  %3788 = vst.msk [vmem:[#allocation3 + $0xbc] sm:$0xf] %vm226_vm0, %v3684_v38  ;;  %v3559_v29 = vld [vmem:[#allocation2 + $0x80] sm:$0x1]  ;;  %v3687_v19 = vrot.slane %v3558_v53, 5 }
 0x1cf   : > { %v1870_v4 = vpop.permute.xlu1 %1869  ;;  %v5168_v6 = vld [vmem:[#allocation3 + $0x1c] sm:$0xf]  ;;  %v3014_v47 = vld [vmem:[#allocation2 + $0xbc] sm:$0x1]  ;;  %v3690_v48 = vrot.slane %v3559_v29, 5 }
 0x1d0   : > { %1941 = vst.msk [vmem:[#allocation3 + $0x12c] sm:$0xf] %vm1915_vm2, %v1870_v4  ;;  %v2856_v0 = vpop.permute.xlu0 %2855  ;;  %v4901_v18 = vor.u32 %v5168_v6, %v4898_v58  ;;  %v1832_v13 = vpop.permute.xlu2 %1831  ;;  %v3341_v58 = vrot.slane %v3340_v45, 4  ;;  %v6870_v52 = vrot.slane %v3343_v57, 5  ;;  %v2093_v4 = vshrl.u32 %v1960_v15, 16 }
 0x1d1   : > { %1922 = vst.msk [vmem:[#allocation3 + $0x48] sm:$0xf] %vm1915_vm2, %v1832_v13  ;;  %v2096_v6 = vshll.u32 %v1960_v15, 16  ;;  %v3188_v13 = vsel %vm5697_vm3, %v3183_v23, %v3187_v31  ;;  %v3353_v43 = vshll.u32 %v3014_v47, 16  ;;  %v784_v57 = vld [vmem:[#allocation2 + $0xc8] sm:$0x1] }
 0x1d2   : > { %4408 = vmatmul.bf16.gmra.mxu1 %v4901_v18  ;;  %v1962_v18 = vld [vmem:[#allocation2 + $0x44] sm:$0x1]  ;;  %v3346_v24 = vsel %vm5697_vm3, %v3341_v58, %v6870_v52  ;;  %v3350_v38 = vor.u32 %v3349_v26, %v6870_v52  ;;  %v2808_v54 = vld [vmem:[#allocation2 + $0xb8] sm:$0xf]  ;;  %v785_v15 = vsel %vm5938_vm10, %v620_v39, %v784_v57 }
 0x1d3   : > { %v4976_v9 = vld [vmem:[#allocation3 + $0xb0] sm:$0xf]  ;;  %v2098_v14 = vrot.slane %v2096_v6, 5  ;;  %v2112_v25 = vshll.u32 %v1962_v18, 16  ;;  %v1770_v58 = vld [vmem:[#allocation2 + $0x64] sm:$0xf] }
 0x1d4   : > { %5152 = vmatmul.msk.bf16.gmra.mxu2 %vm4257_vm1, %v4965_v12  ;;  %v3351_v52 = vrot.slane %v3350_v38, 4  ;;  %786 = vst [vmem:[#allocation2 + $0xc8] sm:$0x1] %v785_v15 }
 0x1d5   : > { %1845 = vrot.lane.b32.xlu1 %v1768_v1, %s5555_s22  ;;  %v2095_v1 = vrot.slane %v2093_v4, 4  ;;  %v5188_v28 = vld [vmem:[#allocation3 + $0xb8] sm:$0xf0] }
 0x1d6   : > { %3429 = vrot.lane.b32.xlu0 %v3178_v50, %s5555_s22  ;;  %2676 = vrot.lane.b32.xlu2 %v2585_v27, %s5553_s17 }
 0x1d7   : > { %v2663_v55 = vpop.permute.xlu1 %2662  ;;  %v5202_v35 = vld [vmem:[#allocation3 + $0x128] sm:$0xf0]  ;;  %v2099_v27 = vor.u32 %v2098_v14, %v2095_v1  ;;  %v2465_v1 = vld [vmem:[#allocation2 + $0x60] sm:$0xe] }
 0x1d8   : > { %2753 = vst.msk [vmem:[#allocation3 + $0x40] sm:$0xf] %vm1382_vm14, %v2663_v55  ;;  %v1872_v42 = vpop.permute.xlu0 %1871  ;;  %v5029_v46 = vor.u32 %v5202_v35, %v5028_v32  ;;  %v2667_v36 = vpop.permute.xlu2 %2666  ;;  %v4977_v32 = vor.u32 %v5188_v28, %v4976_v9  ;;  %v4920_v5 = vld [vmem:[#allocation3 + $0x48] sm:$0xf]  ;;  %v2996_v9 = vld [vmem:[#allocation2 + $0x74] sm:$0x1] }
 0x1d9   : > { %2946 = vst.msk [vmem:[#allocation3 + $0x40] sm:$0xf] %vm1722_vm15, %v2856_v0  ;;  %v1961_v0 = vld [vmem:[#allocation2 + $0x40] sm:$0xf]  ;;  %v2100_v61 = vrot.slane %v2099_v27, 4  ;;  %v6919_v26 = vpop.f32.mrf.mxu2 }
 0x1da   : > { %3506 = vst.msk [vmem:[#allocation3 + $0x40] sm:$0xf] %vm1915_vm2, %v6804_v41  ;;  %4374 = vmatmul.bf16.vlgmr.msra.gmra.mxu3 %v5029_v46  ;;  %v2483_v41 = vld [vmem:[#allocation2 + $0xa8] sm:$0xe]  ;;  %v2102_v2 = vshll.u32 %v1961_v0, 16  ;;  %v2106_v34 = vshrl.u32 %v1961_v0, 16 }
 0x1db   : > { %1942 = vst.msk [vmem:[#allocation3 + $0x138] sm:$0xf] %vm1915_vm2, %v1872_v42  ;;  %5342 = vmatpush.bf16.msra.mxu3 %v5413_v62  ;;  %v4863_v22 = vrot.slane %v2483_v41, 9  ;;  %v2995_v42 = vld [vmem:[#allocation2 + $0x70] sm:$0xf]  ;;  %v3689_v46 = vrot.slane %v3687_v19, 4 }
 0x1dc   : > { %2755 = vst.msk [vmem:[#allocation3 + $0x58] sm:$0xf] %vm1382_vm14, %v2667_v36  ;;  %v2104_v12 = vrot.slane %v2102_v2, 5  ;;  %v2108_v30 = vrot.slane %v2106_v34, 4  ;;  %v3199_v41 = vshll.u32 %v2995_v42, 16  ;;  %v3203_v23 = vshrl.u32 %v2995_v42, 16 }
 0x1dd   : > { %2869 = vrot.lane.b32.xlu1 %v2793_v56, %s5554_s18  ;;  %v2634_v50 = vsel %vm6329_vm13, %v4863_v22, %v2633_v21  ;;  %v2114_v21 = vrot.slane %v2112_v25, 5  ;;  %v3691_v31 = vsel %vm6329_vm13, %v3689_v46, %v3690_v48  ;;  %v3355_v22 = vrot.slane %v3353_v43, 5  ;;  %v2466_v14 = vld [vmem:[#allocation2 + $0x64] sm:$0xf]  ;;  %v2795_v2 = vld [vmem:[#allocation2 + $0x6c] sm:$0xf] }
 0x1de   : > { %2706 = vrot.lane.b32.xlu0 %v2637_v37, %s5553_s17  ;;  %2871 = vrot.lane.b32.xlu2 %v2794_v51, %s5554_s18  ;;  %v2109_v33 = vor.u32 %v2108_v30, %v2104_v12  ;;  %v2105_v60 = vsel %vm5697_vm3, %v2100_v61, %v2104_v12  ;;  %v3688_v37 = vsel %vm6329_vm13, %v4874_v7, %v3687_v19  ;;  %v2807_v51 = vld [vmem:[#allocation2 + $0xb4] sm:$0xf]  ;;  %v6910_v4 = vrot.slane %v3199_v41, 5  ;;  %v3560_v34 = vld [vmem:[#allocation2 + $0x84] sm:$0xe] }
 0x1df   : > { %v3414_v3 = vpop.permute.xlu1 %3413  ;;  %5343 = vmatpush.bf16.msra.mxu3 %v5414_v17  ;;  %2420 = vst.msk [vmem:[#allocation3 + $0x64] sm:$0xf] %vm226_vm0, %v2105_v60  ;;  %v3205_v6 = vrot.slane %v3203_v23, 4  ;;  %v3561_v17 = vld [vmem:[#allocation2 + $0x88] sm:$0xf]  ;;  %v3356_v25 = vsel %vm5697_vm3, %v3351_v52, %v3355_v22  ;;  %v4875_v27 = vrot.slane %v3560_v34, 9 }
 0x1e0   : > { %3505 = vst.msk [vmem:[#allocation3 + $0x34] sm:$0xf] %vm1915_vm2, %v3414_v3  ;;  %v1834_v49 = vpop.permute.xlu0 %1833  ;;  %v6873_v44 = vpop.permute.xlu2 %3417  ;;  %v2110_v59 = vrot.slane %v2109_v33, 4  ;;  %v2467_v30 = vld [vmem:[#allocation2 + $0x68] sm:$0x1]  ;;  %v4857_v61 = vrot.slane %v2465_v1, 9 }
 0x1e1   : > { %1923 = vst.msk [vmem:[#allocation3 + $0x54] sm:$0xf] %vm1915_vm2, %v1834_v49  ;;  %v4910_v8 = vld [vmem:[#allocation3 + $0x3c] sm:$0xf0]  ;;  %v3206_v53 = vor.u32 %v3205_v6, %v6910_v4  ;;  %v2591_v29 = vrot.slane %v2466_v14, 5 }
 0x1e2   : > { %v2115_v62 = vsel %vm5697_vm3, %v2110_v59, %v2114_v21  ;;  %3789 = vst.msk [vmem:[#allocation3 + $0xc8] sm:$0xf] %vm226_vm0, %v3688_v37  ;;  %v5040_v3 = vld [vmem:[#allocation3 + $0x138] sm:$0xf]  ;;  %v3016_v33 = vld [vmem:[#allocation2 + $0xc4] sm:$0xf] }
 0x1e3   : > { %2421 = vst.msk [vmem:[#allocation3 + $0x70] sm:$0xf] %vm226_vm0, %v2115_v62  ;;  %v2994_v21 = vld [vmem:[#allocation2 + $0x6c] sm:$0xf]  ;;  %v2593_v39 = vrot.slane %v2591_v29, 4 }
 0x1e4   : > { %5153 = vmatmul.msk.bf16.gmra.mxu2 %vm4257_vm1, %v4977_v32  ;;  %3790 = vst.msk [vmem:[#allocation3 + $0xd4] sm:$0xf] %vm226_vm0, %v3691_v31  ;;  %v3193_v60 = vshll.u32 %v2994_v21, 16  ;;  %v1964_v59 = vld [vmem:[#allocation2 + $0x4c] sm:$0xf] }
 0x1e5   : > { %3431 = vrot.lane.b32.xlu1 %v3188_v13, %s5555_s22  ;;  %v3694_v13 = vrot.slane %v3561_v17, 5  ;;  %v6947_v22 = vld [vmem:[#allocation2 + $0xb4] sm:$0xe]  ;;  %v3017_v6 = vld [vmem:[#allocation2 + $0xc8] sm:$0x1] }
 0x1e6   : > { %3457 = vrot.lane.b32.xlu0 %v3346_v24, %s5555_s22  ;;  %2704 = vrot.lane.b32.xlu2 %v2634_v50, %s5553_s17  ;;  %v3209_v24 = vshll.u32 %v2996_v9, 16  ;;  %v3562_v50 = vld [vmem:[#allocation2 + $0x8c] sm:$0x1]  ;;  %v3195_v41 = vrot.slane %v3193_v60, 5  ;;  %v2796_v14 = vld [vmem:[#allocation2 + $0x70] sm:$0xf] }
 0x1e7   : > { %v1874_v55 = vpop.permute.xlu1 %1873  ;;  %v5171_v35 = vld [vmem:[#allocation3 + $0x34] sm:$0xf]  ;;  %v3696_v32 = vrot.slane %v3694_v13, 4  ;;  %v3697_v19 = vrot.slane %v3562_v50, 5 }
 0x1e8   : > { %1943 = vst.msk [vmem:[#allocation3 + $0x144] sm:$0xf] %vm1915_vm2, %v1874_v55  ;;  %v2858_v20 = vpop.permute.xlu0 %2857  ;;  %v5175_v36 = vld [vmem:[#allocation3 + $0x50] sm:$0xf0]  ;;  %v4913_v56 = vor.u32 %v5171_v35, %v4910_v8  ;;  %v1878_v11 = vpop.permute.xlu2 %1877  ;;  %v1769_v8 = vld [vmem:[#allocation2 + $0x60] sm:$0xf] }
 0x1e9   : > { %v4921_v45 = vor.u32 %v5175_v36, %v4920_v5  ;;  %1945 = vst.msk [vmem:[#allocation3 + $0x15c] sm:$0xf] %vm1915_vm2, %v1878_v11  ;;  %v4988_v28 = vld [vmem:[#allocation3 + $0xc8] sm:$0xf]  ;;  %v3207_v5 = vrot.slane %v3206_v53, 4  ;;  %v3211_v47 = vrot.slane %v3209_v24, 5  ;;  %v3698_v36 = vsel %vm6329_vm13, %v3696_v32, %v3697_v19 }
 0x1ea   : > { %4413 = vmatmul.bf16.gmra.mxu1 %v4913_v56  ;;  %v2594_v55 = vrot.slane %v2467_v30, 5  ;;  %v3190_v35 = vshrl.u32 %v2994_v21, 16  ;;  %v3367_v56 = vshll.u32 %v3016_v33, 16  ;;  %v3371_v11 = vshrl.u32 %v3016_v33, 16  ;;  %3792 = vst.msk [vmem:[#allocation3 + $0xec] sm:$0xf] %vm226_vm0, %v3698_v36 }
 0x1eb   : > { %4329 = vmatmul.bf16.gmra.mxu0 %v4921_v45  ;;  %v5191_v12 = vld [vmem:[#allocation3 + $0xd0] sm:$0xf0]  ;;  %v2592_v45 = vsel %vm6329_vm13, %v4857_v61, %v2591_v29  ;;  %v3212_v37 = vsel %vm5697_vm3, %v3207_v5, %v3211_v47  ;;  %v4864_v53 = vrot.slane %v6947_v22, 9  ;;  %v2809_v24 = vld [vmem:[#allocation2 + $0xc0] sm:$0xf] }
 0x1ec   : > { %v4989_v7 = vor.u32 %v5191_v12, %v4988_v28  ;;  %v2595_v57 = vsel %vm6329_vm13, %v2593_v39, %v2594_v55  ;;  %v3192_v62 = vrot.slane %v3190_v35, 4  ;;  %v3373_v15 = vrot.slane %v3371_v11, 4  ;;  %v3563_v29 = vld [vmem:[#allocation2 + $0x90] sm:$0xe]  ;;  %v1965_v19 = vld [vmem:[#allocation2 + $0x50] sm:$0x1] }
 0x1ed   : > { %2897 = vrot.lane.b32.xlu1 %v2807_v51, %s5554_s18  ;;  %v6940_v51 = vpop.f32.mrf.mxu2  ;;  %v3565_v39 = vld [vmem:[#allocation2 + $0x98] sm:$0x1] }
 0x1ee   : > { %1849 = vrot.lane.b32.xlu0 %v1770_v58, %s5555_s22  ;;  %2899 = vrot.lane.b32.xlu2 %v2808_v54, %s5554_s18  ;;  %v2126_v58 = vshll.u32 %v1964_v59, 16  ;;  %v6944_v54 = vrot.slane %v3367_v56, 5  ;;  %v3704_v60 = vrot.slane %v3565_v39, 5 }
 0x1ef   : > { %v2665_v16 = vpop.permute.xlu1 %2664  ;;  %v5205_v49 = vld [vmem:[#allocation3 + $0x140] sm:$0xf0] }
 0x1f0   : > { %2754 = vst.msk [vmem:[#allocation3 + $0x4c] sm:$0xf] %vm1382_vm14, %v2665_v16  ;;  %v3420_v0 = vpop.permute.xlu0 %3419  ;;  %v5041_v18 = vor.u32 %v5205_v49, %v5040_v3  ;;  %v2669_v40 = vpop.permute.xlu2 %2668  ;;  %v3196_v3 = vor.u32 %v3195_v41, %v3192_v62  ;;  %v2128_v34 = vrot.slane %v2126_v58, 5  ;;  %v3374_v50 = vor.u32 %v3373_v15, %v6944_v54  ;;  %v2468_v41 = vld [vmem:[#allocation2 + $0x6c] sm:$0xe] }
 0x1f1   : > { %2947 = vst.msk [vmem:[#allocation3 + $0x4c] sm:$0xf] %vm1722_vm15, %v2858_v20  ;;  %v1963_v20 = vld [vmem:[#allocation2 + $0x48] sm:$0xf]  ;;  %v5194_v12 = vld [vmem:[#allocation3 + $0xe8] sm:$0xf0] }
 0x1f2   : > { %3507 = vst.msk [vmem:[#allocation3 + $0x4c] sm:$0xf] %vm1915_vm2, %v6873_v44  ;;  %4379 = vmatmul.bf16.gmra.mxu3 %v5041_v18  ;;  %v3695_v44 = vsel %vm6329_vm13, %v4875_v27, %v3694_v13  ;;  %v2117_v38 = vshrl.u32 %v1963_v20, 16  ;;  %v2120_v43 = vshll.u32 %v1963_v20, 16  ;;  %v3197_v9 = vrot.slane %v3196_v3, 4 }
 0x1f3   : > { %2756 = vst.msk [vmem:[#allocation3 + $0x64] sm:$0xf] %vm1382_vm14, %v2669_v40  ;;  %v2487_v40 = vld [vmem:[#allocation2 + $0xb8] sm:$0xf]  ;;  %v2130_v27 = vshrl.u32 %v1964_v59, 16  ;;  %v3375_v47 = vrot.slane %v3374_v50, 4 }
 0x1f4   : > { %3791 = vst.msk [vmem:[#allocation3 + $0xe0] sm:$0xf] %vm226_vm0, %v3695_v44  ;;  %5154 = vmatmul.msk.bf16.gmra.mxu2 %vm4257_vm1, %v4989_v7  ;;  %v2119_v23 = vrot.slane %v2117_v38, 4  ;;  %v2122_v31 = vrot.slane %v2120_v43, 5  ;;  %v5208_v44 = vld [vmem:[#allocation3 + $0x158] sm:$0xf0]  ;;  %v3202_v61 = vsel %vm5697_vm3, %v3197_v9, %v6910_v4 }
 0x1f5   : > { %3459 = vrot.lane.b32.xlu1 %v3356_v25, %s5555_s22  ;;  %v2488_v7 = vld [vmem:[#allocation2 + $0xbc] sm:$0x1]  ;;  %v2640_v5 = vrot.slane %v2487_v40, 5  ;;  %v6963_v33 = vpop.f32.mrf.mxu2  ;;  %v2132_v21 = vrot.slane %v2130_v27, 4  ;;  %v4876_v4 = vrot.slane %v3563_v29, 9 }
 0x1f6   : > { %2873 = vrot.lane.b32.xlu0 %v2795_v2, %s5554_s18  ;;  %1847 = vrot.lane.b32.xlu2 %v1769_v8, %s5555_s22  ;;  %v2123_v17 = vor.u32 %v2122_v31, %v2119_v23  ;;  %v3377_v8 = vshll.u32 %v3017_v6, 16  ;;  %v2643_v36 = vrot.slane %v2488_v7, 5  ;;  %v1984_v23 = vld [vmem:[#allocation2 + $0x9c] sm:$0xf]  ;;  %v1985_v31 = vld [vmem:[#allocation2 + $0xa0] sm:$0xf] }
 0x1f7   : > { %v2860_v48 = vpop.permute.xlu1 %2859  ;;  %v2642_v20 = vrot.slane %v2640_v5, 4  ;;  %v2133_v56 = vor.u32 %v2132_v21, %v2128_v34  ;;  %v3015_v15 = vld [vmem:[#allocation2 + $0xc0] sm:$0xf]  ;;  %v6978_v3 = vld [vmem:[#allocation2 + $0x70] sm:$0xf]  ;;  %v2285_v6 = vshrl.u32 %v1984_v23, 16 }
 0x1f8   : > { %2948 = vst.msk [vmem:[#allocation3 + $0x58] sm:$0xf] %vm1722_vm15, %v2860_v48  ;;  %v1836_v42 = vpop.permute.xlu0 %1835  ;;  %v2864_v46 = vpop.permute.xlu2 %2863  ;;  %v2124_v2 = vrot.slane %v2123_v17, 4  ;;  %v2136_v48 = vshll.u32 %v1965_v19, 16  ;;  %v3379_v55 = vrot.slane %v3377_v8, 5  ;;  %v2288_v17 = vshll.u32 %v1984_v23, 16 }
 0x1f9   : > { %3508 = vst.msk [vmem:[#allocation3 + $0x58] sm:$0xf] %vm1915_vm2, %v3420_v0  ;;  %v5174_v52 = vld [vmem:[#allocation3 + $0x4c] sm:$0xf]  ;;  %v3564_v0 = vld [vmem:[#allocation2 + $0x94] sm:$0xf] }
 0x1fa   : > { %1924 = vst.msk [vmem:[#allocation3 + $0x60] sm:$0xf] %vm1915_vm2, %v1836_v42  ;;  %v2129_v28 = vsel %vm5697_vm3, %v2124_v2, %v2128_v34  ;;  %v3701_v30 = vrot.slane %v3564_v0, 5  ;;  %v2138_v11 = vrot.slane %v2136_v48, 5  ;;  %v3380_v62 = vsel %vm5697_vm3, %v3375_v47, %v3379_v55  ;;  %v1986_v47 = vld [vmem:[#allocation2 + $0xa4] sm:$0x1] }
 0x1fb   : > { %v5000_v49 = vld [vmem:[#allocation3 + $0xe0] sm:$0xf]  ;;  %2422 = vst.msk [vmem:[#allocation3 + $0x7c] sm:$0xf] %vm226_vm0, %v2129_v28  ;;  %v2287_v9 = vrot.slane %v2285_v6, 4  ;;  %v2290_v0 = vrot.slane %v2288_v17, 5 }
 0x1fc   : > { %v5001_v32 = vor.u32 %v5194_v12, %v5000_v49  ;;  %v3703_v35 = vrot.slane %v3701_v30, 4  ;;  %v3702_v43 = vsel %vm6329_vm13, %v4876_v4, %v3701_v30  ;;  %v2294_v49 = vshll.u32 %v1985_v31, 16  ;;  %v2810_v30 = vld [vmem:[#allocation2 + $0xc4] sm:$0xf]  ;;  %v3566_v21 = vld [vmem:[#allocation2 + $0x9c] sm:$0xe] }
 0x1fd   : > { %2680 = vrot.lane.b32.xlu1 %v2592_v45, %s5553_s17  ;;  %3793 = vst.msk [vmem:[#allocation3 + $0xf8] sm:$0xf] %vm226_vm0, %v3702_v43  ;;  %v4858_v2 = vrot.slane %v2468_v41, 9  ;;  %v2598_v34 = vrot.slane %v6978_v3, 5  ;;  %v3567_v48 = vld [vmem:[#allocation2 + $0xa0] sm:$0xf] }
 0x1fe   : > { %3435 = vrot.lane.b32.xlu0 %v3212_v37, %s5555_s22  ;;  %2682 = vrot.lane.b32.xlu2 %v2595_v57, %s5553_s17  ;;  %v2134_v37 = vrot.slane %v2133_v56, 4  ;;  %v2641_v57 = vsel %vm6329_vm13, %v4864_v53, %v2640_v5  ;;  %v3705_v58 = vsel %vm6329_vm13, %v3703_v35, %v3704_v60  ;;  %v2291_v53 = vor.u32 %v2290_v0, %v2287_v9  ;;  %v1771_v41 = vld [vmem:[#allocation2 + $0x6c] sm:$0xf]  ;;  %v2798_v6 = vld [vmem:[#allocation2 + $0x7c] sm:$0xf] }
 0x1ff   : > { %v1876_v16 = vpop.permute.xlu1 %1875  ;;  %3794 = vst.msk [vmem:[#allocation3 + $0x104] sm:$0xf] %vm226_vm0, %v3705_v58  ;;  %v2296_v28 = vrot.slane %v2294_v49, 5  ;;  %v2599_v19 = vsel %vm6329_vm13, %v4858_v2, %v2598_v34  ;;  %v2304_v35 = vshll.u32 %v1986_v47, 16  ;;  %v2600_v23 = vrot.slane %v2598_v34, 4 }
 0x200   : > { %1944 = vst.msk [vmem:[#allocation3 + $0x150] sm:$0xf] %vm1915_vm2, %v1876_v16  ;;  %v2671_v18 = vpop.permute.xlu0 %2670  ;;  %v4922_v1 = vld [vmem:[#allocation3 + $0x54] sm:$0xf0]  ;;  %v1880_v13 = vpop.permute.xlu2 %1879  ;;  %v2139_v22 = vsel %vm5697_vm3, %v2134_v37, %v2138_v11  ;;  %v4877_v11 = vrot.slane %v3566_v21, 9  ;;  %v3708_v37 = vrot.slane %v3567_v48, 5 }
 0x201   : > { %2757 = vst.msk [vmem:[#allocation3 + $0x70] sm:$0xf] %vm1382_vm14, %v2671_v18  ;;  %v4925_v25 = vor.u32 %v5174_v52, %v4922_v1  ;;  %v2644_v52 = vsel %vm6329_vm13, %v2642_v20, %v2643_v36  ;;  %v4932_v16 = vld [vmem:[#allocation3 + $0x60] sm:$0xf]  ;;  %v3358_v18 = vshrl.u32 %v3015_v15, 16  ;;  %v2298_v1 = vshrl.u32 %v1985_v31, 16 }
 0x202   : > { %2950 = vst.msk [vmem:[#allocation3 + $0x70] sm:$0xf] %vm1722_vm15, %v2864_v46  ;;  %v2306_v56 = vrot.slane %v2304_v35, 5  ;;  %v3709_v3 = vsel %vm6329_vm13, %v4877_v11, %v3708_v37  ;;  %v2998_v17 = vld [vmem:[#allocation2 + $0x7c] sm:$0xf] }
 0x203   : > { %4418 = vmatmul.bf16.gmra.mxu1 %v4925_v25  ;;  %1946 = vst.msk [vmem:[#allocation3 + $0x168] sm:$0xf] %vm1915_vm2, %v1880_v13  ;;  %v6991_v25 = vpop.f32.mrf.mxu2  ;;  %v2300_v7 = vrot.slane %v2298_v1, 4  ;;  %v2489_v0 = vld [vmem:[#allocation2 + $0xc0] sm:$0xe]  ;;  %v3227_v2 = vshrl.u32 %v2998_v17, 16 }
 0x204   : > { %5155 = vmatmul.msk.bf16.gmra.mxu2 %vm4257_vm1, %v5001_v32  ;;  %2423 = vst.msk [vmem:[#allocation3 + $0x88] sm:$0xf] %vm226_vm0, %v2139_v22  ;;  %v5012_v32 = vld [vmem:[#allocation3 + $0xf8] sm:$0xf]  ;;  %v7022_v1 = vld [vmem:[#allocation2 + $0xc4] sm:$0xf] }
 0x205   : > { %2875 = vrot.lane.b32.xlu1 %v2796_v14, %s5554_s18  ;;  %v3361_v14 = vshll.u32 %v3015_v15, 16  ;;  %v2301_v4 = vor.u32 %v2300_v7, %v2296_v28  ;;  %3795 = vst.msk [vmem:[#allocation3 + $0x110] sm:$0xf] %vm226_vm0, %v3709_v3 }
 0x206   : > { %2901 = vrot.lane.b32.xlu0 %v2809_v24, %s5554_s18  ;;  %3433 = vrot.lane.b32.xlu2 %v3202_v61, %s5555_s22  ;;  %v3360_v24 = vrot.slane %v3358_v18, 4  ;;  %v2997_v61 = vld [vmem:[#allocation2 + $0x78] sm:$0xf]  ;;  %v5197_v39 = vld [vmem:[#allocation3 + $0x100] sm:$0xf0] }
 0x207   : > { %v1838_v42 = vpop.permute.xlu1 %1837  ;;  %v5052_v46 = vld [vmem:[#allocation3 + $0x150] sm:$0xf]  ;;  %v3363_v12 = vrot.slane %v3361_v14, 5  ;;  %v5013_v60 = vor.u32 %v5197_v39, %v5012_v32  ;;  %v2302_v36 = vrot.slane %v2301_v4, 4  ;;  %v3217_v43 = vshll.u32 %v2997_v61, 16 }
 0x208   : > { %1925 = vst.msk [vmem:[#allocation3 + $0x6c] sm:$0xf] %vm1915_vm2, %v1838_v42  ;;  %v3422_v59 = vpop.permute.xlu0 %3421  ;;  %v5053_v45 = vor.u32 %v5208_v44, %v5052_v46  ;;  %v1842_v38 = vpop.permute.xlu2 %1841  ;;  %v2292_v44 = vrot.slane %v2291_v53, 4  ;;  %v3568_v42 = vld [vmem:[#allocation2 + $0xa4] sm:$0x1] }
 0x209   : > { %1927 = vst.msk [vmem:[#allocation3 + $0x84] sm:$0xf] %vm1915_vm2, %v1842_v38  ;;  %v3364_v29 = vor.u32 %v3363_v12, %v3360_v24  ;;  %v2470_v46 = vld [vmem:[#allocation2 + $0x74] sm:$0x1]  ;;  %v3214_v38 = vshrl.u32 %v2997_v61, 16  ;;  %v3219_v9 = vrot.slane %v3217_v43, 5 }
 0x20a   : > { %4384 = vmatmul.bf16.gmra.mxu3 %v5053_v45  ;;  %v2297_v5 = vsel %vm5697_vm3, %v2292_v44, %v2296_v28  ;;  %v5064_v45 = vld [vmem:[#allocation3 + $0x168] sm:$0xf]  ;;  %v2601_v15 = vrot.slane %v2470_v46, 5  ;;  %v1772_v14 = vld [vmem:[#allocation2 + $0x70] sm:$0xf]  ;;  %v4865_v24 = vrot.slane %v2489_v0, 9 }
 0x20b   : > { %2436 = vst.msk [vmem:[#allocation3 + $0x124] sm:$0xf] %vm226_vm0, %v2297_v5  ;;  %v3365_v55 = vrot.slane %v3364_v29, 4  ;;  %v3216_v49 = vrot.slane %v3214_v38, 4  ;;  %v3229_v5 = vrot.slane %v3227_v2, 4 }
 0x20c   : > { %v2602_v61 = vsel %vm6329_vm13, %v2600_v23, %v2601_v15  ;;  %v5024_v35 = vld [vmem:[#allocation3 + $0x110] sm:$0xf]  ;;  %v2797_v46 = vld [vmem:[#allocation2 + $0x78] sm:$0xf]  ;;  %v3571_v0 = vld [vmem:[#allocation2 + $0xb0] sm:$0x1] }
 0x20d   : > { %2708 = vrot.lane.b32.xlu1 %v2641_v57, %s5553_s17  ;;  %v3370_v20 = vsel %vm5697_vm3, %v3365_v55, %v6944_v54  ;;  %v3711_v57 = vrot.slane %v3568_v42, 5  ;;  %v2307_v54 = vsel %vm5697_vm3, %v2302_v36, %v2306_v56  ;;  %v3220_v29 = vor.u32 %v3219_v9, %v3216_v49  ;;  %v3570_v56 = vld [vmem:[#allocation2 + $0xac] sm:$0xf]  ;;  %v3569_v38 = vld [vmem:[#allocation2 + $0xa8] sm:$0xe] }
 0x20e   : > { %3463 = vrot.lane.b32.xlu0 %v3380_v62, %s5555_s22  ;;  %2710 = vrot.lane.b32.xlu2 %v2644_v52, %s5553_s17  ;;  %v3710_v52 = vrot.slane %v3708_v37, 4  ;;  %2437 = vst.msk [vmem:[#allocation3 + $0x130] sm:$0xf] %vm226_vm0, %v2307_v54 }
 0x20f   : > { %v2862_v40 = vpop.permute.xlu1 %2861  ;;  %v5178_v13 = vld [vmem:[#allocation3 + $0x68] sm:$0xf0]  ;;  %v3221_v43 = vrot.slane %v3220_v29, 4 }
 0x210   : > { %2949 = vst.msk [vmem:[#allocation3 + $0x64] sm:$0xf] %vm1722_vm15, %v2862_v40  ;;  %v1882_v50 = vpop.permute.xlu0 %1881  ;;  %v4933_v27 = vor.u32 %v5178_v13, %v4932_v16  ;;  %v2866_v8 = vpop.permute.xlu2 %2865  ;;  %v3712_v18 = vsel %vm6329_vm13, %v3710_v52, %v3711_v57  ;;  %v3223_v13 = vshll.u32 %v2998_v17, 16  ;;  %v5181_v11 = vld [vmem:[#allocation3 + $0x80] sm:$0xf0]  ;;  %v3715_v52 = vrot.slane %v3570_v56, 5 }
 0x211   : > { %3509 = vst.msk [vmem:[#allocation3 + $0x64] sm:$0xf] %vm1915_vm2, %v3422_v59  ;;  %v7017_v16 = vpop.f32.mrf.mxu2 }
 0x212   : > { %1947 = vst.msk [vmem:[#allocation3 + $0x174] sm:$0xf] %vm1915_vm2, %v1882_v50  ;;  %4334 = vmatmul.bf16.gmra.mxu0 %v4933_v27  ;;  %v2647_v50 = vrot.slane %v7022_v1, 5  ;;  %v1966_v27 = vld [vmem:[#allocation2 + $0x54] sm:$0xf]  ;;  %v7035_v7 = vrot.slane %v3223_v13, 5 }
 0x213   : > { %3796 = vst.msk [vmem:[#allocation3 + $0x11c] sm:$0xf] %vm226_vm0, %v3712_v18  ;;  %v2141_v44 = vshrl.u32 %v1966_v27, 16  ;;  %v2144_v32 = vshll.u32 %v1966_v27, 16  ;;  %v4878_v18 = vrot.slane %v3569_v38, 9 }
 0x214   : > { %5156 = vmatmul.msk.bf16.gmra.mxu2 %vm4257_vm1, %v5013_v60  ;;  %v2648_v4 = vsel %vm6329_vm13, %v4865_v24, %v2647_v50  ;;  %v3230_v36 = vor.u32 %v3229_v5, %v7035_v7  ;;  %v3226_v2 = vsel %vm5697_vm3, %v3221_v43, %v7035_v7  ;;  %v3000_v7 = vld [vmem:[#allocation2 + $0x84] sm:$0xf] }
 0x215   : > { %2903 = vrot.lane.b32.xlu1 %v2810_v30, %s5554_s18  ;;  %v1967_v30 = vld [vmem:[#allocation2 + $0x58] sm:$0xf]  ;;  %v2143_v21 = vrot.slane %v2141_v44, 4  ;;  %v2146_v48 = vrot.slane %v2144_v32, 5  ;;  %v3716_v44 = vsel %vm6329_vm13, %v4878_v18, %v3715_v52  ;;  %v3019_v32 = vld [vmem:[#allocation2 + $0xd0] sm:$0xf] }
 0x216   : > { %2684 = vrot.lane.b32.xlu0 %v2599_v19, %s5553_s17  ;;  %3461 = vrot.lane.b32.xlu2 %v3370_v20, %s5555_s22  ;;  %v2999_v19 = vld [vmem:[#allocation2 + $0x80] sm:$0x1]  ;;  %v2150_v39 = vshll.u32 %v1967_v30, 16  ;;  %v2154_v55 = vshrl.u32 %v1967_v30, 16  ;;  %v3231_v9 = vrot.slane %v3230_v36, 4  ;;  %v3718_v30 = vrot.slane %v3571_v0, 5 }
 0x217   : > { %v3424_v59 = vpop.permute.xlu1 %3423  ;;  %v3233_v60 = vshll.u32 %v2999_v19, 16  ;;  %v2147_v20 = vor.u32 %v2146_v48, %v2143_v21  ;;  %3797 = vst.msk [vmem:[#allocation3 + $0x128] sm:$0xf] %vm226_vm0, %v3716_v44  ;;  %v1987_v21 = vld [vmem:[#allocation2 + $0xa8] sm:$0xf]  ;;  %v3238_v56 = vshrl.u32 %v3000_v7, 16 }
 0x218   : > { %3510 = vst.msk [vmem:[#allocation3 + $0x70] sm:$0xf] %vm1915_vm2, %v3424_v59  ;;  %v2673_v62 = vpop.permute.xlu0 %2672  ;;  %v7009_v31 = vpop.permute.xlu2 %3427  ;;  %v5177_v40 = vld [vmem:[#allocation3 + $0x64] sm:$0xf]  ;;  %v2152_v57 = vrot.slane %v2150_v39, 5  ;;  %v3391_v39 = vshll.u32 %v3019_v32, 16 }
 0x219   : > { %2758 = vst.msk [vmem:[#allocation3 + $0x7c] sm:$0xf] %vm1382_vm14, %v2673_v62  ;;  %v5211_v58 = vld [vmem:[#allocation3 + $0x170] sm:$0xf0]  ;;  %v7037_v47 = vpop.f32.mrf.mxu2  ;;  %v2148_v37 = vrot.slane %v2147_v20, 4  ;;  %v3235_v3 = vrot.slane %v3233_v60, 5 }
 0x21a   : > { %v5065_v22 = vor.u32 %v5211_v58, %v5064_v45  ;;  %2951 = vst.msk [vmem:[#allocation3 + $0x7c] sm:$0xf] %vm1722_vm15, %v2866_v8  ;;  %v5200_v42 = vld [vmem:[#allocation3 + $0x118] sm:$0xf0]  ;;  %v3018_v45 = vld [vmem:[#allocation2 + $0xcc] sm:$0xf] }
 0x21b   : > { %v5025_v59 = vor.u32 %v5200_v42, %v5024_v35  ;;  %v1968_v62 = vld [vmem:[#allocation2 + $0x5c] sm:$0x1]  ;;  %v7046_v58 = vld [vmem:[#allocation2 + $0xc8] sm:$0x1]  ;;  %v2153_v24 = vsel %vm5697_vm3, %v2148_v37, %v2152_v57  ;;  %v2309_v35 = vshrl.u32 %v1987_v21, 16  ;;  %v2312_v60 = vshll.u32 %v1987_v21, 16 }
 0x21c   : > { %4389 = vmatmul.bf16.gmra.mxu3 %v5065_v22  ;;  %v2160_v15 = vshll.u32 %v1968_v62, 16  ;;  %2424 = vst.msk [vmem:[#allocation3 + $0x94] sm:$0xf] %vm226_vm0, %v2153_v24  ;;  %v2473_v20 = vld [vmem:[#allocation2 + $0x80] sm:$0x1]  ;;  %v3241_v37 = vshll.u32 %v3000_v7, 16 }
 0x21d   : > { %1851 = vrot.lane.b32.xlu1 %v1771_v41, %s5555_s22  ;;  %v2156_v41 = vrot.slane %v2154_v55, 4  ;;  %v3395_v55 = vshrl.u32 %v3019_v32, 16  ;;  %v2311_v38 = vrot.slane %v2309_v35, 4  ;;  %v2314_v43 = vrot.slane %v2312_v60, 5 }
 0x21e   : > { %2879 = vrot.lane.b32.xlu0 %v2798_v6, %s5554_s18  ;;  %1853 = vrot.lane.b32.xlu2 %v1772_v14, %s5555_s22  ;;  %v3382_v14 = vshrl.u32 %v3018_v45, 16  ;;  %v2162_v13 = vrot.slane %v2160_v15, 5  ;;  %v3240_v18 = vrot.slane %v3238_v56, 4 }
 0x21f   : > { %v1840_v34 = vpop.permute.xlu1 %1839  ;;  %v4934_v53 = vld [vmem:[#allocation3 + $0x6c] sm:$0xf0]  ;;  %v2157_v49 = vor.u32 %v2156_v41, %v2152_v57  ;;  %v3020_v41 = vld [vmem:[#allocation2 + $0xd4] sm:$0x1]  ;;  %v2315_v15 = vor.u32 %v2314_v43, %v2311_v38 }
 0x220   : > { %1926 = vst.msk [vmem:[#allocation3 + $0x78] sm:$0xf] %vm1915_vm2, %v1840_v34  ;;  %v2868_v8 = vpop.permute.xlu0 %2867  ;;  %v4937_v28 = vor.u32 %v5177_v40, %v4934_v53  ;;  %v7031_v12 = vpop.permute.xlu2 %2893  ;;  %v3385_v40 = vshll.u32 %v3018_v45, 16  ;;  %v2649_v34 = vrot.slane %v2647_v50, 4  ;;  %v3236_v50 = vsel %vm5697_vm3, %v3231_v9, %v3235_v3  ;;  %v1988_v45 = vld [vmem:[#allocation2 + $0xac] sm:$0xf] }
 0x221   : > { %v7061_v53 = vpop.f32.mrf.mxu2  ;;  %v2158_v27 = vrot.slane %v2157_v49, 4  ;;  %v2318_v57 = vshll.u32 %v1988_v45, 16  ;;  %v2322_v62 = vshrl.u32 %v1988_v45, 16  ;;  %v3397_v3 = vrot.slane %v3395_v55, 4 }
 0x222   : > { %4423 = vmatmul.bf16.gmra.mxu1 %v4937_v28  ;;  %v3717_v28 = vrot.slane %v3715_v52, 4  ;;  %v3387_v29 = vrot.slane %v3385_v40, 5  ;;  %v3401_v52 = vshll.u32 %v3020_v41, 16  ;;  %v2608_v9 = vrot.slane %v2473_v20, 5  ;;  %v1989_v40 = vld [vmem:[#allocation2 + $0xb0] sm:$0x1] }
 0x223   : > { %v2163_v1 = vsel %vm5697_vm3, %v2158_v27, %v2162_v13  ;;  %v2320_v0 = vrot.slane %v2318_v57, 5  ;;  %v2324_v13 = vrot.slane %v2322_v62, 4  ;;  %v5036_v27 = vld [vmem:[#allocation3 + $0x128] sm:$0xf] }
 0x224   : > { %5157 = vmatmul.msk.bf16.gmra.mxu2 %vm4257_vm1, %v5025_v59  ;;  %2425 = vst.msk [vmem:[#allocation3 + $0xa0] sm:$0xf] %vm226_vm0, %v2163_v1  ;;  %v3719_v5 = vsel %vm6329_vm13, %v3717_v28, %v3718_v30  ;;  %v2328_v28 = vshll.u32 %v1989_v40, 16  ;;  %v3403_v32 = vrot.slane %v3401_v52, 5 }
 0x225   : > { %2686 = vrot.lane.b32.xlu1 %v2602_v61, %s5553_s17  ;;  %v3384_v61 = vrot.slane %v3382_v14, 4  ;;  %3798 = vst.msk [vmem:[#allocation3 + $0x134] sm:$0xf] %vm226_vm0, %v3719_v5  ;;  %v2316_v14 = vrot.slane %v2315_v15, 4  ;;  %v2325_v44 = vor.u32 %v2324_v13, %v2320_v0  ;;  %v7102_v5 = vld [vmem:[#allocation8] ss:$0 sm:$0xff] }
 0x226   : > { %2712 = vrot.lane.b32.xlu0 %v2648_v4, %s5553_s17  ;;  %2877 = vrot.lane.b32.xlu2 %v2797_v46, %s5554_s18  ;;  %v1773_v46 = vld [vmem:[#allocation2 + $0x78] sm:$0xf]  ;;  %v2330_v7 = vrot.slane %v2328_v28, 5 }
 0x227   : > { %v2675_v23 = vpop.permute.xlu1 %2674  ;;  %v4944_v54 = vld [vmem:[#allocation3 + $0x78] sm:$0xf]  ;;  %v3388_v42 = vor.u32 %v3387_v29, %v3384_v61  ;;  %v2321_v29 = vsel %vm5697_vm3, %v2316_v14, %v2320_v0 }
 0x228   : > { %2759 = vst.msk [vmem:[#allocation3 + $0x88] sm:$0xf] %vm1382_vm14, %v2675_v23  ;;  %v2701_v22 = vpop.permute.xlu0 %2700  ;;  %v4945_v6 = vor.u32 %v5181_v11, %v4944_v54  ;;  %v7051_v17 = vpop.permute.xlu2 %3455  ;;  %v3393_v54 = vrot.slane %v3391_v39, 5 }
 0x229   : > { %2952 = vst.msk [vmem:[#allocation3 + $0x88] sm:$0xf] %vm1722_vm15, %v2868_v8  ;;  %v2812_v8 = vld [vmem:[#allocation2 + $0xd0] sm:$0xf]  ;;  %v7090_v59 = vpop.f32.mrf.mxu2  ;;  %v4315_v23 = vpop.f32.mrf.mxu0 }
 0x22a   : > { %3512 = vst.msk [vmem:[#allocation3 + $0x88] sm:$0xf] %vm1915_vm2, %v7009_v31  ;;  %4339 = vmatmul.bf16.gmra.mxu0 %v4945_v6  ;;  %v2650_v31 = vrot.slane %v7046_v58, 5  ;;  %v2811_v58 = vld [vmem:[#allocation2 + $0xcc] sm:$0xf]  ;;  %v3389_v6 = vrot.slane %v3388_v42, 4  ;;  %v4316_v20 = vadd.f32 %v7102_v5, %v4315_v23 }
 0x22b   : > { %2772 = vst.msk [vmem:[#allocation3 + $0x124] sm:$0xf] %vm1382_vm14, %v2701_v22 }
 0x22c   : > { %2965 = vst.msk [vmem:[#allocation3 + $0x124] sm:$0xf] %vm1722_vm15, %v7031_v12  ;;  %v7079_v12 = vld [vmem:[#allocation2 + $0x7c] sm:$0xf]  ;;  %v2651_v11 = vsel %vm6329_vm13, %v2649_v34, %v2650_v31  ;;  %v5203_v61 = vld [vmem:[#allocation3 + $0x130] sm:$0xf0]  ;;  %v3394_v21 = vsel %vm5697_vm3, %v3389_v6, %v3393_v54 }
 0x22d   : > { %3437 = vrot.lane.b32.xlu1 %v3226_v2, %s5555_s22  ;;  %v2605_v36 = vrot.slane %v7079_v12, 5  ;;  %v3398_v2 = vor.u32 %v3397_v3, %v3393_v54  ;;  %v5037_v39 = vor.u32 %v5203_v61, %v5036_v27  ;;  %2438 = vst.msk [vmem:[#allocation3 + $0x13c] sm:$0xf] %vm226_vm0, %v2321_v29  ;;  %v7138_v6 = vld [vmem:[#allocation2 + $0x94] sm:$0xf] }
 0x22e   : > { %2907 = vrot.lane.b32.xlu0 %v2812_v8, %s5554_s18  ;;  %3439 = vrot.lane.b32.xlu2 %v3236_v50, %s5555_s22  ;;  %v3243_v8 = vrot.slane %v3241_v37, 5  ;;  %v3001_v50 = vld [vmem:[#allocation2 + $0x88] sm:$0xf]  ;;  %v3002_v37 = vld [vmem:[#allocation2 + $0x8c] sm:$0x1]  ;;  %v3271_v14 = vshll.u32 %v7138_v6, 16 }
 0x22f   : > { %v3426_v19 = vpop.permute.xlu1 %3425  ;;  %v2607_v49 = vrot.slane %v2605_v36, 4  ;;  %v3247_v60 = vshll.u32 %v3001_v50, 16  ;;  %v3251_v41 = vshrl.u32 %v3001_v50, 16  ;;  %v3257_v15 = vshll.u32 %v3002_v37, 16 }
 0x230   : > { %3511 = vst.msk [vmem:[#allocation3 + $0x7c] sm:$0xf] %vm1915_vm2, %v3426_v19  ;;  %v2896_v48 = vpop.permute.xlu0 %2895  ;;  %v2677_v4 = vpop.permute.xlu2 %2676  ;;  %v3399_v19 = vrot.slane %v3398_v2, 4  ;;  %v3244_v35 = vor.u32 %v3243_v8, %v3240_v18  ;;  %v2799_v8 = vld [vmem:[#allocation2 + $0x84] sm:$0xf] }
 0x231   : > { %2760 = vst.msk [vmem:[#allocation3 + $0x94] sm:$0xf] %vm1382_vm14, %v2677_v4  ;;  %v4946_v22 = vld [vmem:[#allocation3 + $0x84] sm:$0xf0]  ;;  %v7108_v55 = vpop.f32.mrf.mxu2  ;;  %v2326_v4 = vrot.slane %v2325_v44, 4  ;;  %v4317_v56 = vpop.f32.mrf.mxu0  ;;  %v7125_v43 = vrot.slane %v3247_v60, 5 }
 0x232   : > { %v3404_v42 = vsel %vm5697_vm3, %v3399_v19, %v3403_v32  ;;  %v3245_v38 = vrot.slane %v3244_v35, 4  ;;  %v4318_v18 = vadd.f32 %v7102_v5, %v4317_v56  ;;  %v3275_v44 = vshrl.u32 %v7138_v6, 16  ;;  %v2800_v60 = vld [vmem:[#allocation2 + $0x88] sm:$0xf] }
 0x233   : > { %v1971_v56 = vld [vmem:[#allocation2 + $0x68] sm:$0x1] }
 0x234   : > { %5158 = vmatmul.msk.bf16.gmra.mxu2 %vm4257_vm1, %v5037_v39  ;;  %v2184_v37 = vshll.u32 %v1971_v56, 16  ;;  %v3277_v6 = vrot.slane %v3275_v44, 4 }
 0x235   : > { %2714 = vrot.lane.b32.xlu1 %v2651_v11, %s5553_s17 }
 0x236   : > { %1855 = vrot.lane.b32.xlu0 %v1773_v46, %s5555_s22  ;;  %2905 = vrot.lane.b32.xlu2 %v2811_v58, %s5554_s18  ;;  %v2471_v46 = vld [vmem:[#allocation2 + $0x78] sm:$0xe]  ;;  %v1774_v58 = vld [vmem:[#allocation2 + $0x7c] sm:$0xf] }
 0x237   : > { %v2703_v34 = vpop.permute.xlu1 %2702  ;;  %v5180_v24 = vld [vmem:[#allocation3 + $0x7c] sm:$0xf]  ;;  %v4859_v54 = vrot.slane %v2471_v46, 9 }
 0x238   : > { %2773 = vst.msk [vmem:[#allocation3 + $0x130] sm:$0xf] %vm1382_vm14, %v2703_v34  ;;  %v1844_v30 = vpop.permute.xlu0 %1843  ;;  %v4949_v31 = vor.u32 %v5180_v24, %v4946_v22  ;;  %v2872_v1 = vpop.permute.xlu2 %2871  ;;  %v3250_v22 = vsel %vm5697_vm3, %v3245_v38, %v7125_v43 }
 0x239   : > { %2966 = vst.msk [vmem:[#allocation3 + $0x130] sm:$0xf] %vm1722_vm15, %v2896_v48  ;;  %v2609_v48 = vsel %vm6329_vm13, %v2607_v49, %v2608_v9  ;;  %v7131_v3 = vpop.f32.mrf.mxu2  ;;  %v3253_v49 = vrot.slane %v3251_v41, 4  ;;  %v2606_v9 = vsel %vm6329_vm13, %v4859_v54, %v2605_v36  ;;  %v7153_v36 = vld [vmem:[#allocation2 + $0xb8] sm:$0xf]  ;;  %v7176_v41 = vrot.slane %v3271_v14, 5 }
 0x23a   : > { %3526 = vst.msk [vmem:[#allocation3 + $0x130] sm:$0xf] %vm1915_vm2, %v7051_v17  ;;  %4428 = vmatmul.bf16.gmra.mxu1 %v4949_v31  ;;  %v2331_v17 = vsel %vm5697_vm3, %v2326_v4, %v2330_v7  ;;  %v1970_v31 = vld [vmem:[#allocation2 + $0x64] sm:$0xf]  ;;  %v3572_v7 = vld [vmem:[#allocation2 + $0xb4] sm:$0xe] }
 0x23b   : > { %1928 = vst.msk [vmem:[#allocation3 + $0x90] sm:$0xf] %vm1915_vm2, %v1844_v30  ;;  %v3254_v28 = vor.u32 %v3253_v49, %v7125_v43  ;;  %v1969_v30 = vld [vmem:[#allocation2 + $0x60] sm:$0xf]  ;;  %v2174_v29 = vshll.u32 %v1970_v31, 16  ;;  %v2178_v4 = vshrl.u32 %v1970_v31, 16  ;;  %v3278_v44 = vor.u32 %v3277_v6, %v7176_v41 }
 0x23c   : > { %2439 = vst.msk [vmem:[#allocation3 + $0x148] sm:$0xf] %vm226_vm0, %v2331_v17  ;;  %v2165_v32 = vshrl.u32 %v1969_v30, 16  ;;  %v2168_v61 = vshll.u32 %v1969_v30, 16  ;;  %v3722_v35 = vrot.slane %v7153_v36, 5 }
 0x23d   : > { %3465 = vrot.lane.b32.xlu1 %v3394_v21, %s5555_s22  ;;  %v1776_v21 = vld [vmem:[#allocation2 + $0x88] sm:$0xf]  ;;  %v2176_v46 = vrot.slane %v2174_v29, 5  ;;  %v3255_v38 = vrot.slane %v3254_v28, 4  ;;  %v3574_v49 = vld [vmem:[#allocation2 + $0xbc] sm:$0x1] }
 0x23e   : > { %2690 = vrot.lane.b32.xlu0 %v2609_v48, %s5553_s17  ;;  %3467 = vrot.lane.b32.xlu2 %v3404_v42, %s5555_s22  ;;  %v4879_v48 = vrot.slane %v3572_v7, 9  ;;  %v2167_v17 = vrot.slane %v2165_v32, 4  ;;  %v2170_v42 = vrot.slane %v2168_v61, 5  ;;  %v3724_v28 = vrot.slane %v3722_v35, 4  ;;  %v1775_v61 = vld [vmem:[#allocation2 + $0x84] sm:$0xf] }
 0x23f   : > { %v3454_v11 = vpop.permute.xlu1 %3453  ;;  %v4404_v45 = vpop.f32.mrf.mxu1  ;;  %v3725_v30 = vrot.slane %v3574_v49, 5 }
 0x240   : > { %3525 = vst.msk [vmem:[#allocation3 + $0x124] sm:$0xf] %vm1915_vm2, %v3454_v11  ;;  %v4405_v57 = vadd.f32 %v4404_v45, %v4316_v20  ;;  %v2679_v62 = vpop.permute.xlu0 %2678  ;;  %v2705_v23 = vpop.permute.xlu2 %2704  ;;  %v2180_v11 = vrot.slane %v2178_v4, 4  ;;  %v2171_v43 = vor.u32 %v2170_v42, %v2167_v17  ;;  %v2476_v4 = vld [vmem:[#allocation2 + $0x8c] sm:$0x1] }
 0x241   : > { %2761 = vst.msk [vmem:[#allocation3 + $0xa0] sm:$0xf] %vm1382_vm14, %v2679_v62  ;;  %v5030_v0 = vld [vmem:[#allocation3 + $0x12c] sm:$0xf0]  ;;  %v7206_v42 = vld [vmem:[#allocation2 + $0x94] sm:$0xf] }
 0x242   : > { %2954 = vst.msk [vmem:[#allocation3 + $0xa0] sm:$0xf] %vm1722_vm15, %v2872_v1  ;;  %v4494_v52 = vadd.f32 %v6919_v26, %v4405_v57  ;;  %v7149_v26 = vrot.slane %v3257_v15, 5  ;;  %v4320_v1 = vpop.f32.mrf.mxu0  ;;  %v4956_v45 = vld [vmem:[#allocation3 + $0x90] sm:$0xf]  ;;  %v2181_v54 = vor.u32 %v2180_v11, %v2176_v46  ;;  %v2615_v56 = vrot.slane %v2476_v4, 5 }
 0x243   : > { %2774 = vst.msk [vmem:[#allocation3 + $0x13c] sm:$0xf] %vm1382_vm14, %v2705_v23  ;;  %v3003_v11 = vld [vmem:[#allocation2 + $0x90] sm:$0xf] }
 0x244   : > { %v4605_v40 = vmul.f32 0.01, %v4494_v52  ;;  %vm4573_vm4 = vcmp.ge.f32.partialorder %v4494_v52, 0.0  ;;  %v2182_v14 = vrot.slane %v2181_v54, 4 }
 0x245   : > { %1857 = vrot.lane.b32.xlu1 %v1774_v58, %s5555_s22 }
 0x246   : > { %3441 = vrot.lane.b32.xlu0 %v3250_v22, %s5555_s22  ;;  %2688 = vrot.lane.b32.xlu2 %v2606_v9, %s5553_s17  ;;  %v4637_v57 = vsel %vm4573_vm4, %v4494_v52, %v4605_v40  ;;  %v2172_v52 = vrot.slane %v2171_v43, 4  ;;  %v4321_v9 = vadd.f32 %v7102_v5, %v4320_v1  ;;  %v3005_v40 = vld [vmem:[#allocation2 + $0x98] sm:$0x1]  ;;  %v2801_v1 = vld [vmem:[#allocation2 + $0x90] sm:$0xf] }
 0x247   : > { %v1846_v13 = vpop.permute.xlu1 %1845  ;;  %v4406_v2 = vpop.f32.mrf.mxu1  ;;  %v5201_v12 = vld [vmem:[#allocation3 + $0x124] sm:$0xf]  ;;  %v3281_v32 = vshll.u32 %v3005_v40, 16 }
 0x248   : > { %1929 = vst.msk [vmem:[#allocation3 + $0x9c] sm:$0xf] %vm1915_vm2, %v1846_v13  ;;  %v4407_v34 = vadd.f32 %v4406_v2, %v4318_v18  ;;  %v3430_v24 = vpop.permute.xlu0 %3429  ;;  %v5033_v27 = vor.u32 %v5201_v12, %v5030_v0  ;;  %v7157_v50 = vpop.permute.xlu2 %2899  ;;  %v2186_v13 = vrot.slane %v2184_v37, 5  ;;  %v2474_v2 = vld [vmem:[#allocation2 + $0x84] sm:$0xe] }
 0x249   : > { %v7162_v39 = vpop.f32.mrf.mxu2  ;;  %v4860_v29 = vrot.slane %v2474_v2, 9  ;;  %v3283_v17 = vrot.slane %v3281_v32, 5 }
 0x24a   : > { %v4496_v19 = vadd.f32 %v6940_v51, %v4407_v34  ;;  %4463 = vmatmul.bf16.vlgmr.msrb.gmra.mxu3 %v5033_v27  ;;  %v3723_v51 = vsel %vm6329_vm13, %v4879_v48, %v3722_v35  ;;  %v3260_v34 = vsel %vm5697_vm3, %v3255_v38, %v7149_v26  ;;  %v2475_v27 = vld [vmem:[#allocation2 + $0x88] sm:$0xf]  ;;  %v4322_v31 = vpop.f32.mrf.mxu0  ;;  %v2187_v26 = vsel %vm5697_vm3, %v2182_v14, %v2186_v13 }
 0x24b   : > { %3799 = vst.msk [vmem:[#allocation3 + $0x140] sm:$0xf] %vm226_vm0, %v3723_v51  ;;  %v4323_v7 = vadd.f32 %v7102_v5, %v4322_v31  ;;  %v3265_v38 = vshll.u32 %v3003_v11, 16  ;;  %v1992_v31 = vld [vmem:[#allocation2 + $0xbc] sm:$0x1] }
 0x24c   : > { %vm4574_vm5 = vcmp.ge.f32.partialorder %v4496_v19, 0.0  ;;  %v4606_v20 = vmul.f32 0.01, %v4496_v19  ;;  %2427 = vst.msk [vmem:[#allocation3 + $0xb8] sm:$0xf] %vm226_vm0, %v2187_v26 }
 0x24d   : > { %2881 = vrot.lane.b32.xlu1 %v2799_v8, %s5554_s18  ;;  %v3267_v49 = vrot.slane %v3265_v38, 5 }
 0x24e   : > { %v4638_v62 = vsel %vm4574_vm5, %v4496_v19, %v4606_v20  ;;  %1861 = vrot.lane.b32.xlu0 %v1776_v21, %s5555_s22  ;;  %2883 = vrot.lane.b32.xlu2 %v2800_v60, %s5554_s18  ;;  %v2612_v21 = vrot.slane %v2475_v27, 5  ;;  %v3279_v60 = vrot.slane %v3278_v44, 4 }
 0x24f   : > { %v5234_v23 = vpack.c.bf16 %v4638_v62, %v4637_v57  ;;  %v2870_v58 = vpop.permute.xlu1 %2869  ;;  %v4409_v15 = vpop.f32.mrf.mxu1  ;;  %v5184_v22 = vld [vmem:[#allocation3 + $0x98] sm:$0xf0] }
 0x250   : > { %2953 = vst.msk [vmem:[#allocation3 + $0x94] sm:$0xf] %vm1722_vm15, %v2870_v58  ;;  %v2707_v0 = vpop.permute.xlu0 %2706  ;;  %v4957_v18 = vor.u32 %v5184_v22, %v4956_v45  ;;  %v1848_v12 = vpop.permute.xlu2 %1847  ;;  %v4410_v36 = vadd.f32 %v4409_v15, %v4321_v9  ;;  %v2614_v20 = vrot.slane %v2612_v21, 4  ;;  %v3262_v45 = vshrl.u32 %v3003_v11, 16  ;;  %v1990_v58 = vld [vmem:[#allocation2 + $0xb4] sm:$0xf] }
 0x251   : > { %5235 = vst [vmem:[%s7173_s24] sm:$0xff] %v5234_v23   ;;  %v7186_v8 = vpop.f32.mrf.mxu2  ;;  %v2613_v57 = vsel %vm6329_vm13, %v4860_v29, %v2612_v21  ;;  %v3284_v54 = vsel %vm5697_vm3, %v3279_v60, %v3283_v17  ;;  %v2619_v23 = vrot.slane %v7206_v42, 5  ;;  %v2477_v22 = vld [vmem:[#allocation2 + $0x90] sm:$0xe]  ;;  %v1991_v9 = vld [vmem:[#allocation2 + $0xb8] sm:$0xf]  ;;  %v2336_v13 = vshll.u32 %v1990_v58, 16 }
 0x252   : > { %3513 = vst.msk [vmem:[#allocation3 + $0x94] sm:$0xf] %vm1915_vm2, %v3430_v24  ;;  %4344 = vmatmul.bf16.gmra.mxu0 %v4957_v18  ;;  %v2177_v24 = vsel %vm5697_vm3, %v2172_v52, %v2176_v46  ;;  %v4499_v19 = vadd.f32 %v6963_v33, %v4410_v36  ;;  %v3264_v6 = vrot.slane %v3262_v45, 4  ;;  %v5048_v14 = vld [vmem:[#allocation3 + $0x140] sm:$0xf]  ;;  %v2342_v2 = vshll.u32 %v1991_v9, 16 }
 0x253   : > { %2775 = vst.msk [vmem:[#allocation3 + $0x148] sm:$0xf] %vm1382_vm14, %v2707_v0  ;;  %v2333_v0 = vshrl.u32 %v1990_v58, 16  ;;  %v4861_v27 = vrot.slane %v2477_v22, 9  ;;  %v2346_v21 = vshrl.u32 %v1991_v9, 16 }
 0x254   : > { %2968 = vst.msk [vmem:[#allocation3 + $0x148] sm:$0xf] %vm1722_vm15, %v7157_v50  ;;  %v3726_v50 = vsel %vm6329_vm13, %v3724_v28, %v3725_v30  ;;  %v4607_v43 = vmul.f32 0.01, %v4499_v19  ;;  %vm4575_vm6 = vcmp.ge.f32.partialorder %v4499_v19, 0.0  ;;  %v3268_v28 = vor.u32 %v3267_v49, %v3264_v6 }
 0x255   : > { %3443 = vrot.lane.b32.xlu1 %v3260_v34, %s5555_s22  ;;  %1930 = vst.msk [vmem:[#allocation3 + $0xa8] sm:$0xf] %vm1915_vm2, %v1848_v12  ;;  %v2335_v30 = vrot.slane %v2333_v0, 4  ;;  %v2620_v60 = vsel %vm6329_vm13, %v4861_v27, %v2619_v23  ;;  %v2348_v17 = vrot.slane %v2346_v21, 4  ;;  %v2479_v58 = vld [vmem:[#allocation2 + $0x98] sm:$0x1] }
 0x256   : > { %2885 = vrot.lane.b32.xlu0 %v2801_v1, %s5554_s18  ;;  %2426 = vst.msk [vmem:[#allocation3 + $0xac] sm:$0xf] %vm226_vm0, %v2177_v24  ;;  %1859 = vrot.lane.b32.xlu2 %v1775_v61, %s5555_s22  ;;  %v4639_v18 = vsel %vm4575_vm6, %v4499_v19, %v4607_v43  ;;  %v2338_v24 = vrot.slane %v2336_v13, 5  ;;  %v4325_v61 = vpop.f32.mrf.mxu0  ;;  %v2344_v19 = vrot.slane %v2342_v2, 5  ;;  %v3007_v9 = vld [vmem:[#allocation2 + $0xa0] sm:$0xf] }
 0x257   : > { %v3432_v48 = vpop.permute.xlu1 %3431  ;;  %v4411_v35 = vpop.f32.mrf.mxu1  ;;  %3800 = vst.msk [vmem:[#allocation3 + $0x14c] sm:$0xf] %vm226_vm0, %v3726_v50  ;;  %v2802_v50 = vld [vmem:[#allocation2 + $0x94] sm:$0xf]  ;;  %v4326_v11 = vadd.f32 %v7102_v5, %v4325_v61  ;;  %v2621_v13 = vrot.slane %v2619_v23, 4  ;;  %v2622_v2 = vrot.slane %v2479_v58, 5 }
 0x258   : > { %3514 = vst.msk [vmem:[#allocation3 + $0xa0] sm:$0xf] %vm1915_vm2, %v3432_v48  ;;  %v4412_v33 = vadd.f32 %v4411_v35, %v4323_v7  ;;  %v3458_v46 = vpop.permute.xlu0 %3457  ;;  %v2683_v51 = vpop.permute.xlu2 %2682  ;;  %v3269_v7 = vrot.slane %v3268_v28, 4  ;;  %v2339_v48 = vor.u32 %v2338_v24, %v2335_v30  ;;  %v2352_v35 = vshll.u32 %v1992_v31, 16  ;;  %v1972_v24 = vld [vmem:[#allocation2 + $0x6c] sm:$0xf] }
 0x259   : > { %v7213_v62 = vpop.f32.mrf.mxu2  ;;  %2763 = vst.msk [vmem:[#allocation3 + $0xb8] sm:$0xf] %vm1382_vm14, %v2683_v51  ;;  %v5183_v52 = vld [vmem:[#allocation3 + $0x94] sm:$0xf]  ;;  %v3006_v51 = vld [vmem:[#allocation2 + $0x9c] sm:$0xf] }
 0x25a   : > { %v4501_v37 = vadd.f32 %v6991_v25, %v4412_v33  ;;  %v2616_v25 = vsel %vm6329_vm13, %v2614_v20, %v2615_v56  ;;  %v3274_v33 = vsel %vm5697_vm3, %v3269_v7, %v7176_v41  ;;  %v2349_v20 = vor.u32 %v2348_v17, %v2344_v19 }
 0x25b   : > { %v2354_v56 = vrot.slane %v2352_v35, 5  ;;  %v3286_v22 = vshrl.u32 %v3006_v51, 16  ;;  %v3295_v27 = vshll.u32 %v3007_v9, 16  ;;  %v3299_v28 = vshrl.u32 %v3007_v9, 16 }
 0x25c   : > { %vm4576_vm7 = vcmp.ge.f32.partialorder %v4501_v37, 0.0  ;;  %v4608_v15 = vmul.f32 0.01, %v4501_v37  ;;  %v2350_v41 = vrot.slane %v2349_v20, 4  ;;  %v2189_v21 = vshrl.u32 %v1972_v24, 16 }
 0x25d   : > { %2692 = vrot.lane.b32.xlu1 %v2613_v57, %s5553_s17  ;;  %v4968_v57 = vld [vmem:[#allocation3 + $0xa8] sm:$0xf] }
 0x25e   : > { %v4640_v40 = vsel %vm4576_vm7, %v4501_v37, %v4608_v15  ;;  %3447 = vrot.lane.b32.xlu0 %v3284_v54, %s5555_s22  ;;  %2694 = vrot.lane.b32.xlu2 %v2616_v25, %s5553_s17  ;;  %v5206_v32 = vld [vmem:[#allocation3 + $0x148] sm:$0xf0]  ;;  %v1777_v15 = vld [vmem:[#allocation2 + $0x90] sm:$0xf]  ;;  %v3289_v25 = vshll.u32 %v3006_v51, 16  ;;  %v2355_v6 = vsel %vm5697_vm3, %v2350_v41, %v2354_v56 }
 0x25f   : > { %v5239_v12 = vpack.c.bf16 %v4640_v40, %v4639_v18  ;;  %v2898_v36 = vpop.permute.xlu1 %2897  ;;  %v4958_v34 = vld [vmem:[#allocation3 + $0x9c] sm:$0xf0]  ;;  %v5049_v26 = vor.u32 %v5206_v32, %v5048_v14  ;;  %2441 = vst.msk [vmem:[#allocation3 + $0x160] sm:$0xf] %vm226_vm0, %v2355_v6  ;;  %v4327_v18 = vpop.f32.mrf.mxu0  ;;  %v2623_v32 = vsel %vm6329_vm13, %v2621_v13, %v2622_v2 }
 0x260   : > { %2967 = vst.msk [vmem:[#allocation3 + $0x13c] sm:$0xf] %vm1722_vm15, %v2898_v36  ;;  %v1850_v1 = vpop.permute.xlu0 %1849  ;;  %v4961_v44 = vor.u32 %v5183_v52, %v4958_v34  ;;  %v7226_v29 = vpop.permute.xlu2 %3433  ;;  %v1778_v36 = vld [vmem:[#allocation2 + $0x94] sm:$0xf]  ;;  %v4328_v30 = vadd.f32 %v7102_v5, %v4327_v18  ;;  %v3291_v31 = vrot.slane %v3289_v25, 5 }
 0x261   : > { %5311 = vst [vmem:[%s7173_s24 + $0x8] sm:$0xff] %v5239_v12   ;;  %v7229_v4 = vpop.f32.mrf.mxu2  ;;  %5159 = vmatmul.msk.bf16.gmra.mxu2 %vm4257_vm1, %v5049_v26  ;;  %v2804_v12 = vld [vmem:[#allocation2 + $0xa0] sm:$0xf] }
 0x262   : > { %3527 = vst.msk [vmem:[#allocation3 + $0x13c] sm:$0xf] %vm1915_vm2, %v3458_v46  ;;  %4433 = vmatmul.bf16.gmra.mxu1 %v4961_v44  ;;  %v2340_v46 = vrot.slane %v2339_v48, 4  ;;  %v3297_v48 = vrot.slane %v3295_v27, 5 }
 0x263   : > { %1931 = vst.msk [vmem:[#allocation3 + $0xb4] sm:$0xf] %vm1915_vm2, %v1850_v1 }
 0x264   : > { %v2345_v45 = vsel %vm5697_vm3, %v2340_v46, %v2344_v19  ;;  %v1973_v19 = vld [vmem:[#allocation2 + $0x70] sm:$0xf] }
 0x265   : > { %2887 = vrot.lane.b32.xlu1 %v2802_v50, %s5554_s18  ;;  %2440 = vst.msk [vmem:[#allocation3 + $0x154] sm:$0xf] %vm226_vm0, %v2345_v45  ;;  %v2192_v50 = vshll.u32 %v1972_v24, 16  ;;  %v2202_v17 = vshrl.u32 %v1973_v19, 16  ;;  %v3008_v45 = vld [vmem:[#allocation2 + $0xa4] sm:$0x1] }
 0x266   : > { %2696 = vrot.lane.b32.xlu0 %v2620_v60, %s5553_s17  ;;  %3445 = vrot.lane.b32.xlu2 %v3274_v33, %s5555_s22  ;;  %v2198_v60 = vshll.u32 %v1973_v19, 16  ;;  %v3301_v33 = vrot.slane %v3299_v28, 4  ;;  %v3305_v58 = vshll.u32 %v3008_v45, 16 }
 0x267   : > { %v3460_v38 = vpop.permute.xlu1 %3459  ;;  %v4414_v43 = vpop.f32.mrf.mxu1  ;;  %v2194_v51 = vrot.slane %v2192_v50, 5 }
 0x268   : > { %3528 = vst.msk [vmem:[#allocation3 + $0x148] sm:$0xf] %vm1915_vm2, %v3460_v38  ;;  %v4415_v37 = vadd.f32 %v4414_v43, %v4326_v11  ;;  %v2874_v54 = vpop.permute.xlu0 %2873  ;;  %v2711_v52 = vpop.permute.xlu2 %2710  ;;  %v2191_v11 = vrot.slane %v2189_v21, 4  ;;  %v2803_v38 = vld [vmem:[#allocation2 + $0x9c] sm:$0xf]  ;;  %v2200_v43 = vrot.slane %v2198_v60, 5  ;;  %v3302_v41 = vor.u32 %v3301_v33, %v3297_v48 }
 0x269   : > { %v7250_v0 = vpop.f32.mrf.mxu2  ;;  %2777 = vst.msk [vmem:[#allocation3 + $0x160] sm:$0xf] %vm1382_vm14, %v2711_v52  ;;  %v5204_v34 = vld [vmem:[#allocation3 + $0x13c] sm:$0xf] }
 0x26a   : > { %v5187_v49 = vld [vmem:[#allocation3 + $0xb0] sm:$0xf0]  ;;  %v4504_v40 = vadd.f32 %v7017_v16, %v4415_v37  ;;  %v3288_v16 = vrot.slane %v3286_v22, 4  ;;  %v2204_v37 = vrot.slane %v2202_v17, 4  ;;  %v3303_v2 = vrot.slane %v3302_v41, 4 }
 0x26b   : > { %v4969_v14 = vor.u32 %v5187_v49, %v4968_v57 }
 0x26c   : > { %v4609_v1 = vmul.f32 0.01, %v4504_v40  ;;  %v3292_v20 = vor.u32 %v3291_v31, %v3288_v16  ;;  %vm4577_vm8 = vcmp.ge.f32.partialorder %v4504_v40, 0.0 }
 0x26d   : > { %4349 = vmatmul.bf16.gmra.mxu0 %v4969_v14  ;;  %1863 = vrot.lane.b32.xlu1 %v1777_v15, %s5555_s22 }
 0x26e   : > { %2891 = vrot.lane.b32.xlu0 %v2804_v12, %s5554_s18  ;;  %1865 = vrot.lane.b32.xlu2 %v1778_v36, %s5555_s22  ;;  %v4641_v22 = vsel %vm4577_vm8, %v4504_v40, %v4609_v1  ;;  %v3293_v6 = vrot.slane %v3292_v20, 4  ;;  %v3307_v12 = vrot.slane %v3305_v58, 5  ;;  %v4330_v40 = vpop.f32.mrf.mxu0 }
 0x26f   : > { %v2681_v42 = vpop.permute.xlu1 %2680  ;;  %v4416_v23 = vpop.f32.mrf.mxu1  ;;  %v5042_v44 = vld [vmem:[#allocation3 + $0x144] sm:$0xf0] }
 0x270   : > { %2762 = vst.msk [vmem:[#allocation3 + $0xac] sm:$0xf] %vm1382_vm14, %v2681_v42  ;;  %v4417_v61 = vadd.f32 %v4416_v23, %v4328_v30  ;;  %v5045_v26 = vor.u32 %v5204_v34, %v5042_v44  ;;  %v3436_v7 = vpop.permute.xlu0 %3435  ;;  %v7265_v35 = vpop.permute.xlu2 %3461  ;;  %v3298_v27 = vsel %vm5697_vm3, %v3293_v6, %v3297_v48  ;;  %v3308_v16 = vsel %vm5697_vm3, %v3303_v2, %v3307_v12  ;;  %v1993_v42 = vld [vmem:[#allocation2 + $0xc0] sm:$0xf] }
 0x271   : > { %2955 = vst.msk [vmem:[#allocation3 + $0xac] sm:$0xf] %vm1722_vm15, %v2874_v54  ;;  %v7270_v56 = vpop.f32.mrf.mxu2  ;;  %v2195_v54 = vor.u32 %v2194_v51, %v2191_v11  ;;  %v2357_v24 = vshrl.u32 %v1993_v42, 16  ;;  %v7295_v48 = vpop.f32.mrf.mxu3 }
 0x272   : > { %v4506_v46 = vadd.f32 %v7037_v47, %v4417_v61  ;;  %4468 = vmatmul.bf16.gmra.mxu3 %v5045_v26  ;;  %3515 = vst.msk [vmem:[#allocation3 + $0xac] sm:$0xf] %vm1915_vm2, %v7226_v29  ;;  %v1974_v47 = vld [vmem:[#allocation2 + $0x74] sm:$0x1]  ;;  %v2205_v29 = vor.u32 %v2204_v37, %v2200_v43  ;;  %v2360_v61 = vshll.u32 %v1993_v42, 16  ;;  %v4331_v26 = vadd.f32 %v7102_v5, %v4330_v40 }
 0x273   : > { %v2208_v15 = vshll.u32 %v1974_v47, 16  ;;  %v2196_v52 = vrot.slane %v2195_v54, 4  ;;  %v2359_v17 = vrot.slane %v2357_v24, 4  ;;  %v1976_v24 = vld [vmem:[#allocation2 + $0x7c] sm:$0xf] }
 0x274   : > { %vm4578_vm9 = vcmp.ge.f32.partialorder %v4506_v46, 0.0  ;;  %v4610_v57 = vmul.f32 0.01, %v4506_v46  ;;  %v2206_v18 = vrot.slane %v2205_v29, 4  ;;  %v2362_v33 = vrot.slane %v2360_v61, 5 }
 0x275   : > { %2698 = vrot.lane.b32.xlu1 %v2623_v32, %s5553_s17  ;;  %v2210_v14 = vrot.slane %v2208_v15, 5  ;;  %v2201_v34 = vsel %vm5697_vm3, %v2196_v52, %v2200_v43  ;;  %v1994_v32 = vld [vmem:[#allocation2 + $0xc4] sm:$0xf]  ;;  %v1995_v43 = vld [vmem:[#allocation2 + $0xc8] sm:$0x1] }
 0x276   : > { %v4642_v25 = vsel %vm4578_vm9, %v4506_v46, %v4610_v57  ;;  %2889 = vrot.lane.b32.xlu2 %v2803_v38, %s5554_s18  ;;  %2428 = vst.msk [vmem:[#allocation3 + $0xc4] sm:$0xf] %vm226_vm0, %v2201_v34  ;;  %v2366_v21 = vshll.u32 %v1994_v32, 16  ;;  %v2370_v50 = vshrl.u32 %v1994_v32, 16  ;;  %v4332_v51 = vpop.f32.mrf.mxu0  ;;  %v2363_v38 = vor.u32 %v2362_v33, %v2359_v17 }
 0x277   : > { %v5244_v49 = vpack.c.bf16 %v4642_v25, %v4641_v22  ;;  %v2876_v9 = vpop.permute.xlu1 %2875  ;;  %v2211_v30 = vsel %vm5697_vm3, %v2206_v18, %v2210_v14  ;;  %v2376_v37 = vshll.u32 %v1995_v43, 16  ;;  %v4333_v54 = vadd.f32 %v7102_v5, %v4332_v51 }
 0x278   : > { %2956 = vst.msk [vmem:[#allocation3 + $0xb8] sm:$0xf] %vm1722_vm15, %v2876_v9  ;;  %v2902_v13 = vpop.permute.xlu0 %2901  ;;  %v1854_v36 = vpop.permute.xlu2 %1853  ;;  %v2368_v20 = vrot.slane %v2366_v21, 5  ;;  %v2372_v11 = vrot.slane %v2370_v50, 4  ;;  %v2364_v57 = vrot.slane %v2363_v38, 4 }
 0x279   : > { %5312 = vst [vmem:[%s7173_s24 + $0x10] sm:$0xff] %v5244_v49   ;;  %v7281_v28 = vpop.f32.mrf.mxu2  ;;  %v5186_v1 = vld [vmem:[#allocation3 + $0xac] sm:$0xf]  ;;  %v2378_v29 = vrot.slane %v2376_v37, 5  ;;  %v7312_v18 = vpop.f32.mrf.mxu3 }
 0x27a   : > { %3516 = vst.msk [vmem:[#allocation3 + $0xb8] sm:$0xf] %vm1915_vm2, %v3436_v7  ;;  %v2373_v41 = vor.u32 %v2372_v11, %v2368_v20  ;;  %v2369_v52 = vsel %vm5697_vm3, %v2364_v57, %v2368_v20  ;;  %v2226_v20 = vshrl.u32 %v1976_v24, 16 }
 0x27b   : > { %1933 = vst.msk [vmem:[#allocation3 + $0xcc] sm:$0xf] %vm1915_vm2, %v1854_v36 }
 0x27c   : > { %2429 = vst.msk [vmem:[#allocation3 + $0xd0] sm:$0xf] %vm226_vm0, %v2211_v30  ;;  %v1975_v30 = vld [vmem:[#allocation2 + $0x78] sm:$0xf]  ;;  %v2228_v43 = vrot.slane %v2226_v20, 4 }
 0x27d   : > { %3449 = vrot.lane.b32.xlu1 %v3298_v27, %s5555_s22  ;;  %2442 = vst.msk [vmem:[#allocation3 + $0x16c] sm:$0xf] %vm226_vm0, %v2369_v52  ;;  %v2216_v42 = vshll.u32 %v1975_v30, 16 }
 0x27e   : > { %3451 = vrot.lane.b32.xlu2 %v3308_v16, %s5555_s22 }
 0x27f   : > { %v2709_v31 = vpop.permute.xlu1 %2708 }
 0x280   : > { %2776 = vst.msk [vmem:[#allocation3 + $0x154] sm:$0xf] %vm1382_vm14, %v2709_v31  ;;  %v4419_v23 = vpop.f32.mrf.mxu1  ;;  %v3464_v44 = vpop.permute.xlu0 %3463 }
 0x281   : > { %2969 = vst.msk [vmem:[#allocation3 + $0x154] sm:$0xf] %vm1722_vm15, %v2902_v13  ;;  %v4970_v7 = vld [vmem:[#allocation3 + $0xb4] sm:$0xf0]  ;;  %v2878_v19 = vpop.permute.xlu2 %2877  ;;  %v4420_v46 = vadd.f32 %v4419_v23, %v4331_v26  ;;  %v7299_v45 = vpop.f32.mrf.mxu2 }
 0x282   : > { %v4973_v60 = vor.u32 %v5186_v1, %v4970_v7  ;;  %3529 = vst.msk [vmem:[#allocation3 + $0x154] sm:$0xf] %vm1915_vm2, %v7265_v35  ;;  %v2374_v35 = vrot.slane %v2373_v41, 4  ;;  %v2213_v1 = vshrl.u32 %v1975_v30, 16  ;;  %v7320_v32 = vpop.f32.mrf.mxu3  ;;  %v5190_v61 = vld [vmem:[#allocation3 + $0xc8] sm:$0xf0] }
 0x283   : > { %v4509_v58 = vadd.f32 %v7061_v53, %v4420_v46  ;;  %v2222_v7 = vshll.u32 %v1976_v24, 16  ;;  %v1977_v41 = vld [vmem:[#allocation2 + $0x80] sm:$0x1] }
 0x284   : > { %4438 = vmatmul.bf16.gmra.mxu1 %v4973_v60  ;;  %v2379_v49 = vsel %vm5697_vm3, %v2374_v35, %v2378_v29  ;;  %v2215_v23 = vrot.slane %v2213_v1, 4  ;;  %v2232_v57 = vshll.u32 %v1977_v41, 16  ;;  %v1980_v41 = vld [vmem:[#allocation2 + $0x8c] sm:$0x1] }
 0x285   : > { %v4611_v53 = vmul.f32 0.01, %v4509_v58  ;;  %vm4579_vm10 = vcmp.ge.f32.partialorder %v4509_v58, 0.0  ;;  %2443 = vst.msk [vmem:[#allocation3 + $0x178] sm:$0xf] %vm226_vm0, %v2379_v49  ;;  %v2224_v60 = vrot.slane %v2222_v7, 5 }
 0x286   : > { %v2234_v35 = vrot.slane %v2232_v57, 5 }
 0x287   : > { %v2904_v47 = vpop.permute.xlu1 %2903  ;;  %v4643_v12 = vsel %vm4579_vm10, %v4509_v58, %v4611_v53  ;;  %v2229_v37 = vor.u32 %v2228_v43, %v2224_v60 }
 0x288   : > { %2970 = vst.msk [vmem:[#allocation3 + $0x160] sm:$0xf] %vm1722_vm15, %v2904_v47  ;;  %v4421_v15 = vpop.f32.mrf.mxu1  ;;  %v2685_v22 = vpop.permute.xlu0 %2684 }
 0x289   : > { %3530 = vst.msk [vmem:[#allocation3 + $0x160] sm:$0xf] %vm1915_vm2, %v3464_v44  ;;  %v4422_v25 = vadd.f32 %v4421_v15, %v4333_v54  ;;  %v3440_v6 = vpop.permute.xlu2 %3439  ;;  %v5207_v13 = vld [vmem:[#allocation3 + $0x154] sm:$0xf]  ;;  %v7316_v2 = vpop.f32.mrf.mxu2  ;;  %v2218_v44 = vrot.slane %v2216_v42, 5  ;;  %v2230_v47 = vrot.slane %v2229_v37, 4 }
 0x28a   : > { %2764 = vst.msk [vmem:[#allocation3 + $0xc4] sm:$0xf] %vm1382_vm14, %v2685_v22  ;;  %v3576_v54 = vld [vmem:[#allocation2 + $0xc4] sm:$0xf]  ;;  %v7332_v58 = vpop.f32.mrf.mxu3  ;;  %v3575_v22 = vld [vmem:[#allocation2 + $0xc0] sm:$0xe] }
 0x28b   : > { %v4511_v9 = vadd.f32 %v7090_v59, %v4422_v25  ;;  %2957 = vst.msk [vmem:[#allocation3 + $0xc4] sm:$0xf] %vm1722_vm15, %v2878_v19  ;;  %v2219_v26 = vor.u32 %v2218_v44, %v2215_v23  ;;  %v3729_v29 = vrot.slane %v3576_v54, 5  ;;  %v3577_v25 = vld [vmem:[#allocation2 + $0xc8] sm:$0x1]  ;;  %v2235_v49 = vsel %vm5697_vm3, %v2230_v47, %v2234_v35 }
 0x28c   : > { %v4880_v53 = vrot.slane %v3575_v22, 9  ;;  %2431 = vst.msk [vmem:[#allocation3 + $0xe8] sm:$0xf] %vm226_vm0, %v2235_v49  ;;  %v2256_v47 = vshll.u32 %v1980_v41, 16 }
 0x28d   : > { %vm4580_vm11 = vcmp.ge.f32.partialorder %v4511_v9, 0.0  ;;  %v4612_v14 = vmul.f32 0.01, %v4511_v9  ;;  %v2220_v50 = vrot.slane %v2219_v26, 4  ;;  %v1979_v26 = vld [vmem:[#allocation2 + $0x88] sm:$0xf] }
 0x28f   : > { %v4644_v36 = vsel %vm4580_vm11, %v4511_v9, %v4612_v14  ;;  %v1852_v34 = vpop.permute.xlu1 %1851  ;;  %v4335_v51 = vpop.f32.mrf.mxu0  ;;  %v2225_v38 = vsel %vm5697_vm3, %v2220_v50, %v2224_v60  ;;  %v3731_v9 = vrot.slane %v3729_v29, 4 }
 0x290   : > { %v5249_v40 = vpack.c.bf16 %v4644_v36, %v4643_v12  ;;  %1932 = vst.msk [vmem:[#allocation3 + $0xc0] sm:$0xf] %vm1915_vm2, %v1852_v34  ;;  %v5054_v59 = vld [vmem:[#allocation3 + $0x15c] sm:$0xf0]  ;;  %v2880_v27 = vpop.permute.xlu0 %2879  ;;  %v4336_v14 = vadd.f32 %v7102_v5, %v4335_v51  ;;  %v3732_v12 = vrot.slane %v3577_v25, 5  ;;  %v3730_v34 = vsel %vm6329_vm13, %v4880_v53, %v3729_v29 }
 0x291   : > { %v5057_v16 = vor.u32 %v5207_v13, %v5054_v59  ;;  %v2906_v31 = vpop.permute.xlu2 %2905  ;;  %v7323_v46 = vpop.f32.mrf.mxu2  ;;  %2430 = vst.msk [vmem:[#allocation3 + $0xdc] sm:$0xf] %vm226_vm0, %v2225_v38  ;;  %v3578_v25 = vld [vmem:[#allocation2 + $0xcc] sm:$0xe] }
 0x292   : > { %5313 = vst [vmem:[%s7173_s24 + $0x18] sm:$0xff] %v5249_v40   ;;  %v3733_v59 = vsel %vm6329_vm13, %v3731_v9, %v3732_v12  ;;  %v2258_v9 = vrot.slane %v2256_v47, 5 }
 0x293   : > { %4473 = vmatmul.bf16.gmra.mxu3 %v5057_v16  ;;  %3801 = vst.msk [vmem:[#allocation3 + $0x158] sm:$0xf] %vm226_vm0, %v3730_v34  ;;  %v7348_v16 = vpop.f32.mrf.mxu3  ;;  %v3580_v34 = vld [vmem:[#allocation2 + $0xd4] sm:$0x1] }
 0x294   : > { %3802 = vst.msk [vmem:[#allocation3 + $0x164] sm:$0xf] %vm226_vm0, %v3733_v59 }
 0x297   : > { %v2687_v19 = vpop.permute.xlu1 %2686  ;;  %v4980_v21 = vld [vmem:[#allocation3 + $0xc0] sm:$0xf] }
 0x298   : > { %2765 = vst.msk [vmem:[#allocation3 + $0xd0] sm:$0xf] %vm1382_vm14, %v2687_v19  ;;  %v4981_v17 = vor.u32 %v5190_v61, %v4980_v21  ;;  %v2713_v33 = vpop.permute.xlu0 %2712  ;;  %v1978_v61 = vld [vmem:[#allocation2 + $0x84] sm:$0xf] }
 0x299   : > { %2958 = vst.msk [vmem:[#allocation3 + $0xd0] sm:$0xf] %vm1722_vm15, %v2880_v27  ;;  %v3468_v11 = vpop.permute.xlu2 %3467  ;;  %v7339_v36 = vpop.f32.mrf.mxu2  ;;  %v2237_v50 = vshrl.u32 %v1978_v61, 16  ;;  %v2240_v60 = vshll.u32 %v1978_v61, 16 }
 0x29a   : > { %4354 = vmatmul.bf16.gmra.mxu0 %v4981_v17  ;;  %3518 = vst.msk [vmem:[#allocation3 + $0xd0] sm:$0xf] %vm1915_vm2, %v3440_v6  ;;  %v4337_v27 = vpop.f32.mrf.mxu0 }
 0x29b   : > { %2778 = vst.msk [vmem:[#allocation3 + $0x16c] sm:$0xf] %vm1382_vm14, %v2713_v33  ;;  %v2239_v20 = vrot.slane %v2237_v50, 4  ;;  %v2242_v51 = vrot.slane %v2240_v60, 5 }
 0x29c   : > { %2971 = vst.msk [vmem:[#allocation3 + $0x16c] sm:$0xf] %vm1722_vm15, %v2906_v31  ;;  %v4338_v31 = vadd.f32 %v7102_v5, %v4337_v27  ;;  %v2246_v5 = vshll.u32 %v1979_v26, 16 }
 0x29d   : > { %v2243_v54 = vor.u32 %v2242_v51, %v2239_v20 }
 0x29e   : > { %v2248_v43 = vrot.slane %v2246_v5, 5 }
 0x29f   : > { %v3438_v15 = vpop.permute.xlu1 %3437  ;;  %v4424_v6 = vpop.f32.mrf.mxu1  ;;  %v2244_v22 = vrot.slane %v2243_v54, 4 }
 0x2a0   : > { %3517 = vst.msk [vmem:[#allocation3 + $0xc4] sm:$0xf] %vm1915_vm2, %v3438_v15  ;;  %v2908_v52 = vpop.permute.xlu0 %2907  ;;  %v4425_v40 = vadd.f32 %v4424_v6, %v4336_v14  ;;  %v7359_v6 = vpop.f32.mrf.mxu3 }
 0x2a1   : > { %v2689_v13 = vpop.permute.xlu2 %2688  ;;  %v4982_v30 = vld [vmem:[#allocation3 + $0xcc] sm:$0xf0]  ;;  %v7357_v38 = vpop.f32.mrf.mxu2  ;;  %v2249_v59 = vsel %vm5697_vm3, %v2244_v22, %v2248_v43 }
 0x2a2   : > { %2766 = vst.msk [vmem:[#allocation3 + $0xdc] sm:$0xf] %vm1382_vm14, %v2689_v13  ;;  %v4514_v1 = vadd.f32 %v7108_v55, %v4425_v40  ;;  %v2250_v55 = vshrl.u32 %v1979_v26, 16  ;;  %v4881_v40 = vrot.slane %v3578_v25, 9  ;;  %v7376_v26 = vld [vmem:[#allocation8] ss:$0 sm:$0xff] }
 0x2a3   : > { %2432 = vst.msk [vmem:[#allocation3 + $0xf4] sm:$0xf] %vm226_vm0, %v2249_v59 }
 0x2a4   : > { %v4613_v17 = vmul.f32 0.01, %v4514_v1  ;;  %vm4581_vm12 = vcmp.ge.f32.partialorder %v4514_v1, 0.0  ;;  %v2252_v37 = vrot.slane %v2250_v55, 4 }
 0x2a6   : > { %v2253_v35 = vor.u32 %v2252_v37, %v2248_v43  ;;  %v4645_v29 = vsel %vm4581_vm12, %v4514_v1, %v4613_v17  ;;  %v1981_v37 = vld [vmem:[#allocation2 + $0x90] sm:$0xf] }
 0x2a7   : > { %v2715_v42 = vpop.permute.xlu1 %2714  ;;  %v5189_v23 = vld [vmem:[#allocation3 + $0xc4] sm:$0xf]  ;;  %v4426_v44 = vpop.f32.mrf.mxu1 }
 0x2a8   : > { %2779 = vst.msk [vmem:[#allocation3 + $0x178] sm:$0xf] %vm1382_vm14, %v2715_v42  ;;  %v4985_v24 = vor.u32 %v5189_v23, %v4982_v30  ;;  %v4427_v7 = vadd.f32 %v4426_v44, %v4338_v31  ;;  %v1856_v19 = vpop.permute.xlu0 %1855  ;;  %v4340_v49 = vpop.f32.mrf.mxu0  ;;  %v2254_v53 = vrot.slane %v2253_v35, 4  ;;  %v3739_v31 = vrot.slane %v3580_v34, 5  ;;  %v1983_v34 = vld [vmem:[#allocation2 + $0x98] sm:$0x1] }
 0x2a9   : > { %2972 = vst.msk [vmem:[#allocation3 + $0x178] sm:$0xf] %vm1722_vm15, %v2908_v52  ;;  %v2884_v21 = vpop.permute.xlu2 %2883  ;;  %v7370_v42 = vpop.f32.mrf.mxu2 }
 0x2aa   : > { %4443 = vmatmul.bf16.gmra.mxu1 %v4985_v24  ;;  %3532 = vst.msk [vmem:[#allocation3 + $0x178] sm:$0xf] %vm1915_vm2, %v3468_v11  ;;  %v4516_v33 = vadd.f32 %v7131_v3, %v4427_v7  ;;  %v3579_v11 = vld [vmem:[#allocation2 + $0xd0] sm:$0xf]  ;;  %v2259_v27 = vsel %vm5697_vm3, %v2254_v53, %v2258_v9  ;;  %v4341_v7 = vadd.f32 %v7376_v26, %v4340_v49  ;;  %v7384_v55 = vpop.f32.mrf.mxu3  ;;  %v5209_v53 = vld [vmem:[#allocation3 + $0x160] sm:$0xf0] }
 0x2ab   : > { %1934 = vst.msk [vmem:[#allocation3 + $0xd8] sm:$0xf] %vm1915_vm2, %v1856_v19  ;;  %v3736_v14 = vrot.slane %v3579_v11, 5  ;;  %v1982_v11 = vld [vmem:[#allocation2 + $0x94] sm:$0xf] }
 0x2ac   : > { %vm4582_vm4 = vcmp.ge.f32.partialorder %v4516_v33, 0.0  ;;  %v4614_v57 = vmul.f32 0.01, %v4516_v33  ;;  %2433 = vst.msk [vmem:[#allocation3 + $0x100] sm:$0xf] %vm226_vm0, %v2259_v27  ;;  %v2270_v22 = vshll.u32 %v1982_v11, 16 }
 0x2ad   : > { %v3738_v30 = vrot.slane %v3736_v14, 4  ;;  %v3737_v23 = vsel %vm6329_vm13, %v4881_v40, %v3736_v14  ;;  %v2274_v25 = vshrl.u32 %v1982_v11, 16  ;;  %v5060_v49 = vld [vmem:[#allocation3 + $0x158] sm:$0xf] }
 0x2ae   : > { %v4646_v15 = vsel %vm4582_vm4, %v4516_v33, %v4614_v57  ;;  %3803 = vst.msk [vmem:[#allocation3 + $0x170] sm:$0xf] %vm226_vm0, %v3737_v23 }
 0x2af   : > { %v3466_v3 = vpop.permute.xlu1 %3465  ;;  %v5254_v52 = vpack.c.bf16 %v4646_v15, %v4645_v29  ;;  %v2261_v15 = vshrl.u32 %v1981_v37, 16  ;;  %v2276_v40 = vrot.slane %v2274_v25, 4 }
 0x2b0   : > { %3531 = vst.msk [vmem:[#allocation3 + $0x16c] sm:$0xf] %vm1915_vm2, %v3466_v3  ;;  %v2691_v13 = vpop.permute.xlu0 %2690  ;;  %v4342_v17 = vpop.f32.mrf.mxu0  ;;  %v2264_v3 = vshll.u32 %v1981_v37, 16 }
 0x2b1   : > { %v1860_v12 = vpop.permute.xlu2 %1859  ;;  %5314 = vst [vmem:[%s7173_s24 + $0x20] sm:$0xff] %v5254_v52   ;;  %v5066_v1 = vld [vmem:[#allocation3 + $0x174] sm:$0xf0]  ;;  %v4343_v20 = vadd.f32 %v7376_v26, %v4342_v17  ;;  %v7390_v47 = vpop.f32.mrf.mxu2  ;;  %v2263_v9 = vrot.slane %v2261_v15, 4 }
 0x2b2   : > { %2767 = vst.msk [vmem:[#allocation3 + $0xe8] sm:$0xf] %vm1382_vm14, %v2691_v13  ;;  %v4992_v33 = vld [vmem:[#allocation3 + $0xd8] sm:$0xf]  ;;  %v2266_v14 = vrot.slane %v2264_v3, 5  ;;  %v2272_v13 = vrot.slane %v2270_v22, 5  ;;  %v7395_v59 = vpop.f32.mrf.mxu3  ;;  %v4378_v3 = vadd.f32 %v7376_v26, %v7312_v18 }
 0x2b3   : > { %2960 = vst.msk [vmem:[#allocation3 + $0xe8] sm:$0xf] %vm1722_vm15, %v2884_v21  ;;  %v3740_v21 = vsel %vm6329_vm13, %v3738_v30, %v3739_v31  ;;  %v2280_v30 = vshll.u32 %v1983_v34, 16 }
 0x2b4   : > { %1936 = vst.msk [vmem:[#allocation3 + $0xf0] sm:$0xf] %vm1915_vm2, %v1860_v12  ;;  %v2267_v27 = vor.u32 %v2266_v14, %v2263_v9  ;;  %v2277_v23 = vor.u32 %v2276_v40, %v2272_v13 }
 0x2b5   : > { %3804 = vst.msk [vmem:[#allocation3 + $0x17c] sm:$0xf] %vm226_vm0, %v3740_v21 }
 0x2b7   : > { %v1858_v44 = vpop.permute.xlu1 %1857  ;;  %v4429_v24 = vpop.f32.mrf.mxu1  ;;  %v5210_v61 = vld [vmem:[#allocation3 + $0x16c] sm:$0xf] }
 0x2b8   : > { %1935 = vst.msk [vmem:[#allocation3 + $0xe4] sm:$0xf] %vm1915_vm2, %v1858_v44  ;;  %v5069_v19 = vor.u32 %v5210_v61, %v5066_v1  ;;  %v3442_v50 = vpop.permute.xlu0 %3441  ;;  %v4430_v5 = vadd.f32 %v4429_v24, %v4341_v7  ;;  %v5061_v1 = vor.u32 %v5209_v53, %v5060_v49  ;;  %v2268_v61 = vrot.slane %v2267_v27, 4 }
 0x2b9   : > { %v2695_v60 = vpop.permute.xlu2 %2694  ;;  %v2282_v7 = vrot.slane %v2280_v30, 5  ;;  %v4553_v17 = vpop.f32.mrf.mxu2 }
 0x2ba   : > { %4478 = vmatmul.bf16.gmra.mxu3 %v5069_v19  ;;  %2769 = vst.msk [vmem:[#allocation3 + $0x100] sm:$0xf] %vm1382_vm14, %v2695_v60  ;;  %v4519_v51 = vadd.f32 %v7162_v39, %v4430_v5  ;;  %v2278_v19 = vrot.slane %v2277_v23, 4  ;;  %v2273_v60 = vsel %vm5697_vm3, %v2268_v61, %v2272_v13 }
 0x2bb   : > { %2434 = vst.msk [vmem:[#allocation3 + $0x10c] sm:$0xf] %vm226_vm0, %v2273_v60 }
 0x2bc   : > { %v4615_v39 = vmul.f32 0.01, %v4519_v51  ;;  %vm4583_vm13 = vcmp.ge.f32.partialorder %v4519_v51, 0.0  ;;  %v2283_v5 = vsel %vm5697_vm3, %v2278_v19, %v2282_v7  ;;  %v5212_v15 = vld [vmem:[#allocation3 + $0x178] sm:$0xf0] }
 0x2bd   : > { %2435 = vst.msk [vmem:[#allocation3 + $0x118] sm:$0xf] %vm226_vm0, %v2283_v5 }
 0x2be   : > { %v4647_v31 = vsel %vm4583_vm13, %v4519_v51, %v4615_v39 }
 0x2bf   : > { %v2882_v63 = vpop.permute.xlu1 %2881  ;;  %v4431_v43 = vpop.f32.mrf.mxu1  ;;  %v5193_v41 = vld [vmem:[#allocation3 + $0xe0] sm:$0xf0] }
 0x2c0   : > { %2959 = vst.msk [vmem:[#allocation3 + $0xdc] sm:$0xf] %vm1722_vm15, %v2882_v63  ;;  %v4432_v57 = vadd.f32 %v4431_v43, %v4343_v20  ;;  %v4993_v54 = vor.u32 %v5193_v41, %v4992_v33  ;;  %v1862_v35 = vpop.permute.xlu0 %1861  ;;  %v5004_v33 = vld [vmem:[#allocation3 + $0xf0] sm:$0xf]  ;;  %v4376_v43 = vadd.f32 %v7376_v26, %v7295_v48 }
 0x2c1   : > { %3519 = vst.msk [vmem:[#allocation3 + $0xdc] sm:$0xf] %vm1915_vm2, %v3442_v50  ;;  %v3446_v29 = vpop.permute.xlu2 %3445  ;;  %v4555_v25 = vpop.f32.mrf.mxu2 }
 0x2c2   : > { %v4521_v52 = vadd.f32 %v7186_v8, %v4432_v57  ;;  %4359 = vmatmul.bf16.gmra.mxu0 %v4993_v54  ;;  %1937 = vst.msk [vmem:[#allocation3 + $0xfc] sm:$0xf] %vm1915_vm2, %v1862_v35  ;;  %v5072_v35 = vld [vmem:[#allocation3 + $0x170] sm:$0xf] }
 0x2c4   : > { %vm4584_vm5 = vcmp.ge.f32.partialorder %v4521_v52, 0.0  ;;  %v4616_v12 = vmul.f32 0.01, %v4521_v52 }
 0x2c6   : > { %v4648_v8 = vsel %vm4584_vm5, %v4521_v52, %v4616_v12  ;;  %v5073_v52 = vor.u32 %v5212_v15, %v5072_v35  ;;  %v4381_v35 = vadd.f32 %v7376_v26, %v7320_v32 }
 0x2c7   : > { %v5259_v44 = vpack.c.bf16 %v4648_v8, %v4647_v31  ;;  %v3444_v24 = vpop.permute.xlu1 %3443 }
 0x2c8   : > { %3520 = vst.msk [vmem:[#allocation3 + $0xe8] sm:$0xf] %vm1915_vm2, %v3444_v24  ;;  %v2886_v21 = vpop.permute.xlu0 %2885  ;;  %v5192_v63 = vld [vmem:[#allocation3 + $0xdc] sm:$0xf] }
 0x2c9   : > { %5315 = vst [vmem:[%s7173_s24 + $0x28] sm:$0xff] %v5259_v44   ;;  %v1866_v50 = vpop.permute.xlu2 %1865  ;;  %v5196_v20 = vld [vmem:[#allocation3 + $0xf8] sm:$0xf0] }
 0x2ca   : > { %5160 = vmatmul.msk.bf16.vlgmr.msra.gmra.mxu3 %vm4257_vm1, %v5061_v1  ;;  %1939 = vst.msk [vmem:[#allocation3 + $0x114] sm:$0xf] %vm1915_vm2, %v1866_v50  ;;  %v5005_v41 = vor.u32 %v5196_v20, %v5004_v33 }
 0x2cd   : > { %v4464_v51 = vpop.f32.mrf.mxu3 }
 0x2ce   : > { %v4465_v54 = vadd.f32 %v4464_v51, %v4376_v43 }
 0x2cf   : > { %v2693_v37 = vpop.permute.xlu1 %2692  ;;  %v4994_v57 = vld [vmem:[#allocation3 + $0xe4] sm:$0xf0]  ;;  %v4345_v13 = vpop.f32.mrf.mxu0 }
 0x2d0   : > { %2768 = vst.msk [vmem:[#allocation3 + $0xf4] sm:$0xf] %vm1382_vm14, %v2693_v37  ;;  %v4997_v10 = vor.u32 %v5192_v63, %v4994_v57  ;;  %v3448_v11 = vpop.permute.xlu0 %3447  ;;  %v4554_v48 = vadd.f32 %v4553_v17, %v4465_v54  ;;  %v4346_v8 = vadd.f32 %v7376_v26, %v4345_v13 }
 0x2d1   : > { %2961 = vst.msk [vmem:[#allocation3 + $0xf4] sm:$0xf] %vm1722_vm15, %v2886_v21  ;;  %v2890_v14 = vpop.permute.xlu2 %2889  ;;  %v5199_v61 = vld [vmem:[#allocation3 + $0x110] sm:$0xf0] }
 0x2d2   : > { %4364 = vmatmul.bf16.gmra.mxu0 %v5005_v41  ;;  %4448 = vmatmul.bf16.gmra.mxu1 %v4997_v10  ;;  %3521 = vst.msk [vmem:[#allocation3 + $0xf4] sm:$0xf] %vm1915_vm2, %v3446_v29  ;;  %v4629_v53 = vmul.f32 0.01, %v4554_v48  ;;  %vm4597_vm0 = vcmp.ge.f32.partialorder %v4554_v48, 0.0 }
 0x2d4   : > { %v4661_v18 = vsel %vm4597_vm0, %v4554_v48, %v4629_v53 }
 0x2d5   : > { %v4466_v22 = vpop.f32.mrf.mxu3 }
 0x2d6   : > { %v4467_v39 = vadd.f32 %v4466_v22, %v4378_v3  ;;  %v4383_v22 = vadd.f32 %v7376_v26, %v7332_v58 }
 0x2d7   : > { %v2888_v49 = vpop.permute.xlu1 %2887  ;;  %v4347_v24 = vpop.f32.mrf.mxu0 }
 0x2d8   : > { %v4556_v9 = vadd.f32 %v4555_v25, %v4467_v39  ;;  %2962 = vst.msk [vmem:[#allocation3 + $0x100] sm:$0xf] %vm1722_vm15, %v2888_v49  ;;  %v2697_v29 = vpop.permute.xlu0 %2696  ;;  %v4348_v7 = vadd.f32 %v7376_v26, %v4347_v24 }
 0x2d9   : > { %3522 = vst.msk [vmem:[#allocation3 + $0x100] sm:$0xf] %vm1915_vm2, %v3448_v11  ;;  %v5195_v27 = vld [vmem:[#allocation3 + $0xf4] sm:$0xf]  ;;  %v3452_v50 = vpop.permute.xlu2 %3451 }
 0x2da   : > { %vm4598_vm3 = vcmp.ge.f32.partialorder %v4556_v9, 0.0  ;;  %v4630_v12 = vmul.f32 0.01, %v4556_v9  ;;  %5161 = vmatmul.msk.bf16.gmra.mxu3 %vm4257_vm1, %v5073_v52  ;;  %2770 = vst.msk [vmem:[#allocation3 + $0x10c] sm:$0xf] %vm1382_vm14, %v2697_v29 }
 0x2db   : > { %2963 = vst.msk [vmem:[#allocation3 + $0x10c] sm:$0xf] %vm1722_vm15, %v2890_v14 }
 0x2dc   : > { %v4662_v34 = vsel %vm4598_vm3, %v4556_v9, %v4630_v12 }
 0x2dd   : > { %v5294_v40 = vpack.c.bf16 %v4662_v34, %v4661_v18 }
 0x2df   : > { %5322 = vst [vmem:[%s7173_s24 + $0x60] sm:$0xff] %v5294_v40   ;;  %v1864_v30 = vpop.permute.xlu1 %1863  ;;  %v4434_v31 = vpop.f32.mrf.mxu1 }
 0x2e0   : > { %1938 = vst.msk [vmem:[#allocation3 + $0x108] sm:$0xf] %vm1915_vm2, %v1864_v30  ;;  %v5006_v1 = vld [vmem:[#allocation3 + $0xfc] sm:$0xf0]  ;;  %v4435_v44 = vadd.f32 %v4434_v31, %v4346_v8  ;;  %v2892_v21 = vpop.permute.xlu0 %2891 }
 0x2e1   : > { %v5009_v23 = vor.u32 %v5195_v27, %v5006_v1 }
 0x2e2   : > { %v4524_v19 = vadd.f32 %v7213_v62, %v4435_v44 }
 0x2e3   : > { %4453 = vmatmul.bf16.gmra.mxu1 %v5009_v23 }
 0x2e4   : > { %v4617_v51 = vmul.f32 0.01, %v4524_v19  ;;  %vm4585_vm1 = vcmp.ge.f32.partialorder %v4524_v19, 0.0  ;;  %v4558_v54 = vpop.f32.mrf.mxu2 }
 0x2e6   : > { %v4649_v43 = vsel %vm4585_vm1, %v4524_v19, %v4617_v51 }
 0x2e7   : > { %v2699_v60 = vpop.permute.xlu1 %2698  ;;  %v4436_v5 = vpop.f32.mrf.mxu1  ;;  %v5016_v17 = vld [vmem:[#allocation3 + $0x108] sm:$0xf] }
 0x2e8   : > { %2771 = vst.msk [vmem:[#allocation3 + $0x118] sm:$0xf] %vm1382_vm14, %v2699_v60  ;;  %v4437_v33 = vadd.f32 %v4436_v5, %v4348_v7  ;;  %v5017_v20 = vor.u32 %v5199_v61, %v5016_v17 }
 0x2e9   : > { %2964 = vst.msk [vmem:[#allocation3 + $0x118] sm:$0xf] %vm1722_vm15, %v2892_v21 }
 0x2ea   : > { %v4526_v63 = vadd.f32 %v7229_v4, %v4437_v33  ;;  %4369 = vmatmul.bf16.gmra.mxu0 %v5017_v20  ;;  %3524 = vst.msk [vmem:[#allocation3 + $0x118] sm:$0xf] %vm1915_vm2, %v3452_v50  ;;  %v4350_v48 = vpop.f32.mrf.mxu0 }
 0x2eb   : > { %v4351_v13 = vadd.f32 %v7376_v26, %v4350_v48 }
 0x2ec   : > { %vm4586_vm6 = vcmp.ge.f32.partialorder %v4526_v63, 0.0  ;;  %v4618_v62 = vmul.f32 0.01, %v4526_v63  ;;  %v4560_v52 = vpop.f32.mrf.mxu2 }
 0x2ee   : > { %v4650_v41 = vsel %vm4586_vm6, %v4526_v63, %v4618_v62 }
 0x2ef   : > { %v5264_v37 = vpack.c.bf16 %v4650_v41, %v4649_v43  ;;  %v3450_v57 = vpop.permute.xlu1 %3449 }
 0x2f0   : > { %3523 = vst.msk [vmem:[#allocation3 + $0x10c] sm:$0xf] %vm1915_vm2, %v3450_v57 }
 0x2f1   : > { %5316 = vst [vmem:[%s7173_s24 + $0x30] sm:$0xff] %v5264_v37   ;;  %v5018_v11 = vld [vmem:[#allocation3 + $0x114] sm:$0xf0] }
 0x2f2   : > { %v4352_v34 = vpop.f32.mrf.mxu0 }
 0x2f3   : > { %v4353_v58 = vadd.f32 %v7376_v26, %v4352_v34 }
 0x2f5   : > { %v4469_v10 = vpop.f32.mrf.mxu3 }
 0x2f6   : > { %v4470_v15 = vadd.f32 %v4469_v10, %v4381_v35 }
 0x2f7   : > { %v5198_v4 = vld [vmem:[#allocation3 + $0x10c] sm:$0xf] }
 0x2f8   : > { %v5021_v3 = vor.u32 %v5198_v4, %v5018_v11  ;;  %v4559_v25 = vadd.f32 %v4558_v54, %v4470_v15 }
 0x2fa   : > { %4458 = vmatmul.bf16.gmra.mxu1 %v5021_v3  ;;  %v4631_v53 = vmul.f32 0.01, %v4559_v25  ;;  %vm4599_vm14 = vcmp.ge.f32.partialorder %v4559_v25, 0.0  ;;  %v4388_v3 = vadd.f32 %v7376_v26, %v7359_v6 }
 0x2fc   : > { %v4663_v29 = vsel %vm4599_vm14, %v4559_v25, %v4631_v53 }
 0x2fd   : > { %v4471_v39 = vpop.f32.mrf.mxu3 }
 0x2fe   : > { %v4472_v49 = vadd.f32 %v4471_v39, %v4383_v22 }
 0x300   : > { %v4561_v9 = vadd.f32 %v4560_v52, %v4472_v49 }
 0x301   : > { %v4439_v14 = vpop.f32.mrf.mxu1 }
 0x302   : > { %vm4600_vm15 = vcmp.ge.f32.partialorder %v4561_v9, 0.0  ;;  %v4632_v32 = vmul.f32 0.01, %v4561_v9  ;;  %v4440_v18 = vadd.f32 %v4439_v14, %v4351_v13 }
 0x304   : > { %v4664_v12 = vsel %vm4600_vm15, %v4561_v9, %v4632_v32  ;;  %v4529_v27 = vadd.f32 %v7250_v0, %v4440_v18 }
 0x305   : > { %v5299_v40 = vpack.c.bf16 %v4664_v12, %v4663_v29 }
 0x306   : > { %v4619_v8 = vmul.f32 0.01, %v4529_v27  ;;  %vm4587_vm2 = vcmp.ge.f32.partialorder %v4529_v27, 0.0 }
 0x307   : > { %5323 = vst [vmem:[%s7173_s24 + $0x68] sm:$0xff] %v5299_v40  }
 0x308   : > { %v4651_v44 = vsel %vm4587_vm2, %v4529_v27, %v4619_v8 }
 0x309   : > { %v4441_v30 = vpop.f32.mrf.mxu1 }
 0x30a   : > { %v4442_v31 = vadd.f32 %v4441_v30, %v4353_v58  ;;  %v4391_v58 = vadd.f32 %v7376_v26, %v7384_v55 }
 0x30c   : > { %v4531_v1 = vadd.f32 %v7270_v56, %v4442_v31 }
 0x30e   : > { %vm4588_vm7 = vcmp.ge.f32.partialorder %v4531_v1, 0.0  ;;  %v4620_v23 = vmul.f32 0.01, %v4531_v1 }
 0x310   : > { %v4652_v24 = vsel %vm4588_vm7, %v4531_v1, %v4620_v23 }
 0x311   : > { %v5269_v61 = vpack.c.bf16 %v4652_v24, %v4651_v44 }
 0x313   : > { %5317 = vst [vmem:[%s7173_s24 + $0x38] sm:$0xff] %v5269_v61  }
 0x316   : > { %v4474_v60 = vpop.f32.mrf.mxu3 }
 0x317   : > { %v4355_v7 = vpop.f32.mrf.mxu0 }
 0x318   : > { %v4356_v21 = vadd.f32 %v7376_v26, %v4355_v7 }
 0x31e   : > { %v4476_v62 = vpop.f32.mrf.mxu3 }
 0x31f   : > { %v4357_v0 = vpop.f32.mrf.mxu0  ;;  %v4477_v25 = vadd.f32 %v4476_v62, %v4388_v3 }
 0x320   : > { %v4358_v5 = vadd.f32 %v7376_v26, %v4357_v0 }
 0x327   : > { %v4444_v19 = vpop.f32.mrf.mxu1 }
 0x328   : > { %v4445_v50 = vadd.f32 %v4444_v19, %v4356_v21 }
 0x32a   : > { %v4534_v17 = vadd.f32 %v7281_v28, %v4445_v50  ;;  %v4386_v28 = vadd.f32 %v7376_v26, %v7348_v16 }
 0x32c   : > { %v4621_v20 = vmul.f32 0.01, %v4534_v17  ;;  %vm4589_vm8 = vcmp.ge.f32.partialorder %v4534_v17, 0.0  ;;  %v4475_v4 = vadd.f32 %v4474_v60, %v4386_v28 }
 0x32e   : > { %v4653_v43 = vsel %vm4589_vm8, %v4534_v17, %v4621_v20 }
 0x32f   : > { %v4446_v56 = vpop.f32.mrf.mxu1 }
 0x330   : > { %v4447_v33 = vadd.f32 %v4446_v56, %v4358_v5 }
 0x332   : > { %v4536_v51 = vadd.f32 %v7299_v45, %v4447_v33 }
 0x334   : > { %vm4590_vm9 = vcmp.ge.f32.partialorder %v4536_v51, 0.0  ;;  %v4622_v63 = vmul.f32 0.01, %v4536_v51 }
 0x336   : > { %v4654_v41 = vsel %vm4590_vm9, %v4536_v51, %v4622_v63 }
 0x337   : > { %v5274_v37 = vpack.c.bf16 %v4654_v41, %v4653_v43 }
 0x339   : > { %5318 = vst [vmem:[%s7173_s24 + $0x40] sm:$0xff] %v5274_v37  }
 0x33d   : > { %v4479_v57 = vpop.f32.mrf.mxu3 }
 0x33e   : > { %v4480_v8 = vadd.f32 %v4479_v57, %v4391_v58 }
 0x33f   : > { %v4360_v10 = vpop.f32.mrf.mxu0 }
 0x340   : > { %v4361_v15 = vadd.f32 %v7376_v26, %v4360_v10 }
 0x345   : > { %v4481_v54 = vpop.f32.mrf.mxu3 }
 0x347   : > { %v4362_v45 = vpop.f32.mrf.mxu0 }
 0x348   : > { %v4363_v52 = vadd.f32 %v7376_v26, %v4362_v45 }
 0x34d   : > { %v4563_v11 = vpop.f32.mrf.mxu3 }
 0x34e   : > { %v4564_v48 = vadd.f32 %v4563_v11, %v4475_v4 }
 0x34f   : > { %v4449_v35 = vpop.f32.mrf.mxu1  ;;  %v4365_v29 = vpop.f32.mrf.mxu0 }
 0x350   : > { %v4450_v22 = vadd.f32 %v4449_v35, %v4361_v15  ;;  %v4633_v49 = vmul.f32 0.01, %v4564_v48  ;;  %vm4601_vm10 = vcmp.ge.f32.partialorder %v4564_v48, 0.0  ;;  %v4366_v23 = vadd.f32 %v7376_v26, %v4365_v29 }
 0x352   : > { %v4539_v53 = vadd.f32 %v7316_v2, %v4450_v22  ;;  %v4665_v32 = vsel %vm4601_vm10, %v4564_v48, %v4633_v49 }
 0x354   : > { %v4623_v12 = vmul.f32 0.01, %v4539_v53  ;;  %vm4591_vm12 = vcmp.ge.f32.partialorder %v4539_v53, 0.0 }
 0x355   : > { %v4565_v39 = vpop.f32.mrf.mxu3 }
 0x356   : > { %v4566_v9 = vadd.f32 %v4565_v39, %v4477_v25  ;;  %v4655_v27 = vsel %vm4591_vm12, %v4539_v53, %v4623_v12 }
 0x357   : > { %v4451_v16 = vpop.f32.mrf.mxu1  ;;  %v4367_v7 = vpop.f32.mrf.mxu0 }
 0x358   : > { %vm4602_vm11 = vcmp.ge.f32.partialorder %v4566_v9, 0.0  ;;  %v4634_v14 = vmul.f32 0.01, %v4566_v9  ;;  %v4452_v13 = vadd.f32 %v4451_v16, %v4363_v52  ;;  %v4368_v55 = vadd.f32 %v7376_v26, %v4367_v7 }
 0x35a   : > { %v4666_v6 = vsel %vm4602_vm11, %v4566_v9, %v4634_v14  ;;  %v4541_v18 = vadd.f32 %v7323_v46, %v4452_v13  ;;  %v4393_v46 = vadd.f32 %v7376_v26, %v7395_v59 }
 0x35b   : > { %v5304_v34 = vpack.c.bf16 %v4666_v6, %v4665_v32 }
 0x35c   : > { %vm4592_vm4 = vcmp.ge.f32.partialorder %v4541_v18, 0.0  ;;  %v4624_v40 = vmul.f32 0.01, %v4541_v18  ;;  %v4482_v61 = vadd.f32 %v4481_v54, %v4393_v46 }
 0x35d   : > { %5324 = vst [vmem:[%s7173_s24 + $0x70] sm:$0xff] %v5304_v34   ;;  %v4568_v2 = vpop.f32.mrf.mxu3 }
 0x35e   : > { %v4656_v30 = vsel %vm4592_vm4, %v4541_v18, %v4624_v40  ;;  %v4569_v44 = vadd.f32 %v4568_v2, %v4480_v8 }
 0x35f   : > { %v5279_v31 = vpack.c.bf16 %v4656_v30, %v4655_v27 }
 0x360   : > { %v4454_v1 = vpop.f32.mrf.mxu1  ;;  %v4635_v21 = vmul.f32 0.01, %v4569_v44  ;;  %vm4603_vm13 = vcmp.ge.f32.partialorder %v4569_v44, 0.0 }
 0x361   : > { %5319 = vst [vmem:[%s7173_s24 + $0x48] sm:$0xff] %v5279_v31   ;;  %v4455_v24 = vadd.f32 %v4454_v1, %v4366_v23 }
 0x362   : > { %v4667_v56 = vsel %vm4603_vm13, %v4569_v44, %v4635_v21 }
 0x363   : > { %v4544_v60 = vadd.f32 %v7339_v36, %v4455_v24 }
 0x365   : > { %v4570_v19 = vpop.f32.mrf.mxu3  ;;  %v4625_v33 = vmul.f32 0.01, %v4544_v60  ;;  %vm4593_vm0 = vcmp.ge.f32.partialorder %v4544_v60, 0.0 }
 0x366   : > { %v4571_v50 = vadd.f32 %v4570_v19, %v4482_v61 }
 0x367   : > { %v4657_v62 = vsel %vm4593_vm0, %v4544_v60, %v4625_v33  ;;  %v4370_v37 = vpop.f32.mrf.mxu0 }
 0x368   : > { %vm4604_vm5 = vcmp.ge.f32.partialorder %v4571_v50, 0.0  ;;  %v4636_v0 = vmul.f32 0.01, %v4571_v50  ;;  %v4456_v5 = vpop.f32.mrf.mxu1  ;;  %v4371_v57 = vadd.f32 %v7376_v26, %v4370_v37 }
 0x369   : > { %v4457_v17 = vadd.f32 %v4456_v5, %v4368_v55 }
 0x36a   : > { %v4668_v59 = vsel %vm4604_vm5, %v4571_v50, %v4636_v0 }
 0x36b   : > { %v5309_v20 = vpack.c.bf16 %v4668_v59, %v4667_v56  ;;  %v4546_v51 = vadd.f32 %v7357_v38, %v4457_v17 }
 0x36d   : > { %5325 = vst [vmem:[%s7173_s24 + $0x78] sm:$0xff] %v5309_v20   ;;  %vm4594_vm3 = vcmp.ge.f32.partialorder %v4546_v51, 0.0  ;;  %v4626_v63 = vmul.f32 0.01, %v4546_v51 }
 0x36f   : > { %v4658_v43 = vsel %vm4594_vm3, %v4546_v51, %v4626_v63  ;;  %v4372_v10 = vpop.f32.mrf.mxu0 }
 0x370   : > { %v5284_v41 = vpack.c.bf16 %v4658_v43, %v4657_v62  ;;  %v4373_v11 = vadd.f32 %v7376_v26, %v4372_v10 }
 0x372   : > { %5320 = vst [vmem:[%s7173_s24 + $0x50] sm:$0xff] %v5284_v41  }
 0x377   : > { %v4459_v36 = vpop.f32.mrf.mxu1 }
 0x378   : > { %v4460_v54 = vadd.f32 %v4459_v36, %v4371_v57 }
 0x37a   : > { %v4549_v28 = vadd.f32 %v7370_v42, %v4460_v54 }
 0x37c   : > { %v4627_v4 = vmul.f32 0.01, %v4549_v28  ;;  %vm4595_vm1 = vcmp.ge.f32.partialorder %v4549_v28, 0.0 }
 0x37e   : > { %v4659_v3 = vsel %vm4595_vm1, %v4549_v28, %v4627_v4 }
 0x37f   : > { %v4461_v38 = vpop.f32.mrf.mxu1 }
 0x380   : > { %v4462_v35 = vadd.f32 %v4461_v38, %v4373_v11 }
 0x382   : > { %v4551_v15 = vadd.f32 %v7390_v47, %v4462_v35 }
 0x384   : > { %vm4596_vm6 = vcmp.ge.f32.partialorder %v4551_v15, 0.0  ;;  %v4628_v45 = vmul.f32 0.01, %v4551_v15 }
 0x386   : > { %v4660_v48 = vsel %vm4596_vm6, %v4551_v15, %v4628_v45 }
 0x387   : > { %v5289_v22 = vpack.c.bf16 %v4660_v48, %v4659_v3 }
 0x389   : > { %5321 = vst [vmem:[%s7173_s24 + $0x58] sm:$0xff] %v5289_v22  }
 0x38a PF: > { %p14_p4 = scmp.ge.s32.totalorder %s5625_s5, 4   ;;  %s7501_s12 = smov %s5536_s13 }
 0x38b   : > { %s7502_s13 = smov %s5540_s14  ;;  %s7503_s14 = smov %s5636_s9 }
 0x38c   : > { %s7504_s15 = smov %s5625_s5  ;;  %16 = sbr.rel (!%p14_p4) target bundleno = 4 (0x4), region = 82 }
 0x391   :  { %4755 = vsyncpa [#allocation5], 1 }
 0x392   :  { %4757 = vsyncpa [#allocation5 + $0x1], 1 }
 0x393   :  { %4758 = vsyncpa [#allocation7], 1 }

</bundles_post_ra>
